<compile_context>
chip_gen: v5e
topology: v5e:2x2
jax: 0.10.0
libtpu: 0.0.40
codegen_flags: <defaults>
</compile_context>

<pallas_src>
import functools

import jax
import jax.numpy as jnp
from jax import lax
from jax.experimental import pallas as pl
from jax.experimental.pallas import tpu as pltpu

LRELU_SLOPE = 0.2
IN_EPS = 1e-5


def _default_max_tp():
    """P-tile cap: 1024 on 128 MiB-VMEM parts (v5e/v6e), 512 on v7x (64 MiB)."""
    try:
        vmem = getattr(pltpu.get_tpu_info(), "vmem_capacity_bytes", 0)
    except Exception:
        vmem = 0
    return 1024 if vmem >= (100 << 20) else 512


_MAX_TP = _default_max_tp()


def _round_up(x, m):
    return ((x + m - 1) // m) * m


def _pick_tp(p_pad, max_tp):
    """Largest multiple-of-128 divisor of p_pad that is <= max_tp (p_pad % 128 == 0)."""
    m = p_pad // 128
    d = min(m, max(max_tp // 128, 1))
    while d > 1 and m % d:
        d -= 1
    return 128 * d


def _vmem_limit_bytes(*byte_counts):
    """Scoped-VMEM limit derived from actual block footprints.

    2x margin (+8 MiB) for compiler temporaries, floored at the 32 MiB default
    and capped at v7x's 64 MiB physical VMEM.
    """
    need = sum(byte_counts)
    return int(min(max(32 << 20, 2 * need + (8 << 20)), 64 << 20))


# -----------------------------------------------------------------------------
# Pallas kernels
# -----------------------------------------------------------------------------
def _conv_lrelu_kernel(p_ref, w_ref, o_ref, *, lrelu):
    """Conv-as-matmul, lane-dense output (Cout, TP), optional fused LeakyReLU.

    p_ref: (1, Kdim, TP) bf16   im2col patches (P on lanes)
    w_ref: (Cout, Kdim)  bf16   flattened conv weight
    o_ref: (1, Cout, TP) bf16
    """
    y = jnp.dot(w_ref[...], p_ref[0], preferred_element_type=jnp.float32)
    if lrelu:
        y = jnp.where(y >= 0, y, LRELU_SLOPE * y)
    o_ref[0] = y.astype(o_ref.dtype)


def _conv_in_lrelu_kernel(p_ref, w_ref, o_ref, acc_ref, *, inv_p, n_pad, tp, n_tiles):
    """Fused Conv + InstanceNorm + LeakyReLU, single pass over the P tiles.

    grid = (B, n_tiles); axis 1 ("arbitrary") streams P tiles of one sample.
    p_ref:   (1, Kdim, TP)        bf16 im2col patches for the current tile
    w_ref:   (Cout, Kdim)         bf16 flattened conv weight
    o_ref:   (1, Cout, P_pad)     bf16, resident across axis 1, written at last tile
    acc_ref: (n_tiles, Cout, TP)  f32 VMEM scratch holding the pre-norm conv output
    """
    pi = pl.program_id(1)
    y = jnp.dot(w_ref[...], p_ref[0], preferred_element_type=jnp.float32)
    acc_ref[pi] = y                                         # stays in VMEM, never HBM

    @pl.when(pi == n_tiles - 1)
    def _finalize():
        cout = w_ref.shape[0]
        # Pass 1: per-channel mean (zero-padded tail columns contribute 0).
        tot = jnp.zeros((cout, 1), jnp.float32)
        for j in range(n_tiles):
            tot = tot + jnp.sum(acc_ref[j], axis=-1, keepdims=True)
        mu = tot * inv_p
        # Pass 2: centered (two-pass) variance -> no E[x^2]-E[x]^2 cancellation.
        # Padded tail columns each contribute mu^2; subtract them exactly.
        sq = jnp.zeros((cout, 1), jnp.float32)
        for j in range(n_tiles):
            d = acc_ref[j] - mu
            sq = sq + jnp.sum(d * d, axis=-1, keepdims=True)
        var = jnp.maximum((sq - n_pad * (mu * mu)) * inv_p, 0.0)
        rstd = lax.rsqrt(var + IN_EPS)
        # Pass 3: normalize + LeakyReLU in f32, emit bf16 once, lane-dense.
        for j in range(n_tiles):
            yn = (acc_ref[j] - mu) * rstd
            o_ref[0, :, j * tp:(j + 1) * tp] = jnp.where(
                yn >= 0, yn, LRELU_SLOPE * yn).astype(o_ref.dtype)


def _head_kernel(p_ref, w_ref, o_ref, acc_ref, *, inv_p):
    """Final Conv2d(8C,1,4,p=1) + full-spatial avg-pool + sigmoid, folded & P-tiled.

    mean_p(w . patch_p) == w . mean_p(patch_p) (conv is linear); patch column
    sums are accumulated per P tile, the tiny w-dot + sigmoid runs at the end.
    p_ref: (1, Kdim, TP) bf16, w_ref: (Kdim, 1) bf16,
    o_ref: (1, 1, 1) f32 (revisited across the P axis), acc_ref: (Kdim, 1) f32.
    """
    pi = pl.program_id(1)

    @pl.when(pi == 0)
    def _init():
        acc_ref[...] = jnp.zeros_like(acc_ref)

    p = p_ref[0].astype(jnp.float32)                       # (Kdim, TP)
    acc_ref[...] += jnp.sum(p, axis=-1, keepdims=True)     # (Kdim, 1)

    @pl.when(pi == pl.num_programs(1) - 1)
    def _finalize():
        w = w_ref[...].astype(jnp.float32)                 # (Kdim, 1)
        logit = jnp.sum(w * acc_ref[...], axis=0, keepdims=True) * inv_p  # (1, 1)
        o_ref[0] = 1.0 / (1.0 + jnp.exp(-logit))


# -----------------------------------------------------------------------------
# JAX-side glue
# -----------------------------------------------------------------------------
def _im2col_nchw(x, KH, KW, stride, pad):
    """NCHW im2col -> (B, Cin*KH*KW, Ho*Wo) with the spatial axis P on lanes.

    Contraction-axis order is (cin, kh, kw), matching a row-major flatten of the
    PyTorch weight layout (Cout, Cin, KH, KW).
    """
    # TODO(synk): remove this HBM materialization (4x at stride 2 / 16x at
    # stride 1 activation-read blow-up + an extra HBM write) by DMA-ing a padded
    # NCHW slab into VMEM and accumulating 16 shifted (Cout,Cin)@(Cin,TP)
    # matmuls inside the kernel.
    B, Cin, H, W = x.shape
    xp = jnp.pad(x, ((0, 0), (0, 0), (pad, pad), (pad, pad)))
    Ho = (H + 2 * pad - KH) // stride + 1
    Wo = (W + 2 * pad - KW) // stride + 1
    cols = []
    for kh in range(KH):
        for kw in range(KW):
            cols.append(
                xp[:, :, kh:kh + stride * Ho:stride, kw:kw + stride * Wo:stride])
    patches = jnp.stack(cols, axis=2).reshape(B, Cin * KH * KW, Ho * Wo)
    return patches, Ho, Wo


def _conv_layer(x, w, *, stride, pad, norm):
    """x: (B, Cin, H, W) NCHW float.  w: (Cout, Cin, KH, KW) (PyTorch layout)."""
    B = x.shape[0]
    Cout, Cin, KH, KW = w.shape
    patches, Ho, Wo = _im2col_nchw(x, KH, KW, stride, pad)
    P = Ho * Wo
    Kdim = Cin * KH * KW

    # Pad P to a multiple of 128: lane-dense unmasked stores, and the zero
    # patch columns contribute exactly 0 to the conv output and the IN stats.
    P_pad = _round_up(P, 128)
    if P_pad != P:
        patches = jnp.pad(patches, ((0, 0), (0, 0), (0, P_pad - P)))

    # bf16 MXU inputs (2x MXU rate, half the HBM/VMEM traffic); f32 accumulate.
    patches = patches.astype(jnp.bfloat16)
    w_flat = w.reshape(Cout, Kdim).astype(jnp.bfloat16)

    TP = _pick_tp(P_pad, _MAX_TP)
    NP = P_pad // TP
    grid = (B, NP)

    p_spec = pl.BlockSpec((1, Kdim, TP), lambda b, p: (b, 0, p))
    w_spec = pl.BlockSpec((Cout, Kdim), lambda b, p: (0, 0))

    if not norm:
        vmem = _vmem_limit_bytes(
            2 * (Kdim * TP) * 2,       # patch tile, 2 pipeline buffers, bf16
            2 * (Cout * Kdim) * 2,     # weight block (constant index map), bf16
            2 * (Cout * TP) * 2,       # output tile, 2 pipeline buffers, bf16
        )
        out = pl.pallas_call(
            functools.partial(_conv_lrelu_kernel, lrelu=True),
            out_shape=jax.ShapeDtypeStruct((B, Cout, P_pad), jnp.bfloat16),
            grid=grid,
            in_specs=[p_spec, w_spec],
            out_specs=pl.BlockSpec((1, Cout, TP), lambda b, p: (b, 0, p)),
            compiler_params=pltpu.CompilerParams(
                dimension_semantics=("parallel", "parallel"),
                vmem_limit_bytes=vmem),
        )(patches, w_flat)
    else:
        # Fused single-pass conv + InstanceNorm + LeakyReLU.  The per-batch
        # pre-norm activation lives only in a VMEM scratch; the bf16 output is
        # resident across the P axis and written once at the last tile.
        vmem = _vmem_limit_bytes(
            2 * (Kdim * TP) * 2,        # patch tile, 2 pipeline buffers, bf16
            2 * (Cout * Kdim) * 2,      # weight block, bf16
            2 * (Cout * P_pad) * 2,     # resident per-batch output, bf16
            NP * Cout * TP * 4,         # f32 pre-norm scratch
        )
        out = pl.pallas_call(
            functools.partial(_conv_in_lrelu_kernel,
                              inv_p=1.0 / P, n_pad=float(P_pad - P),
                              tp=TP, n_tiles=NP),
            out_shape=jax.ShapeDtypeStruct((B, Cout, P_pad), jnp.bfloat16),
            grid=grid,
            in_specs=[p_spec, w_spec],
            out_specs=pl.BlockSpec((1, Cout, P_pad), lambda b, p: (b, 0, 0)),
            scratch_shapes=[pltpu.VMEM((NP, Cout, TP), jnp.float32)],
            compiler_params=pltpu.CompilerParams(
                dimension_semantics=("parallel", "arbitrary"),
                vmem_limit_bytes=vmem),
        )(patches, w_flat)

    out = out[:, :, :P]                       # drop the lane padding
    return out.reshape(B, Cout, Ho, Wo)


def _head_layer(x, w):
    """Final conv (Cout=1) folded with global-avg-pool + sigmoid -> (B, 1)."""
    B = x.shape[0]
    _, Cin, KH, KW = w.shape
    Kdim = Cin * KH * KW
    patches, _, _ = _im2col_nchw(x, KH, KW, 1, 1)          # (B, Kdim, P)
    P = patches.shape[-1]
    P_pad = _round_up(P, 128)
    if P_pad != P:
        patches = jnp.pad(patches, ((0, 0), (0, 0), (0, P_pad - P)))
    patches = patches.astype(jnp.bfloat16)
    w_col = w.reshape(Kdim, 1).astype(jnp.bfloat16)        # (cin, kh, kw) order

    TP = _pick_tp(P_pad, _MAX_TP)
    NP = P_pad // TP
    vmem = _vmem_limit_bytes(
        2 * (Kdim * TP) * 2,           # patch tile, 2 pipeline buffers, bf16
        2 * Kdim * 2,                  # weight column, bf16
        Kdim * 128 * 4,                # (Kdim, 1) f32 accumulator (lane padded)
    )
    out = pl.pallas_call(
        functools.partial(_head_kernel, inv_p=1.0 / P),
        out_shape=jax.ShapeDtypeStruct((B, 1, 1), jnp.float32),
        grid=(B, NP),
        in_specs=[pl.BlockSpec((1, Kdim, TP), lambda b, p: (b, 0, p)),
                  pl.BlockSpec((Kdim, 1), lambda b, p: (0, 0))],
        out_specs=pl.BlockSpec((1, 1, 1), lambda b, p: (b, 0, 0)),
        scratch_shapes=[pltpu.VMEM((Kdim, 1), jnp.float32)],
        compiler_params=pltpu.CompilerParams(
            dimension_semantics=("parallel", "arbitrary"),
            vmem_limit_bytes=vmem),
    )(patches, w_col)
    return out.reshape(B, 1)


def init_discriminator_params(key, num_channels):
    """Synthetic weights in PyTorch Conv2d layout (Cout, Cin, KH, KW), bias=False."""
    C = num_channels
    shapes = [
        (C, 3, 4, 4),
        (2 * C, C, 4, 4),
        (4 * C, 2 * C, 4, 4),
        (8 * C, 4 * C, 4, 4),
        (1, 8 * C, 4, 4),
    ]
    keys = jax.random.split(key, len(shapes))
    return [0.05 * jax.random.normal(k, s, dtype=jnp.float32)
            for k, s in zip(keys, shapes)]


@jax.jit
def discriminator_forward(x_nchw, params):
    """Discriminator.forward.  x_nchw: (B, 3, H, W) float32 -> (B, 1) in (0, 1)."""
    w1, w2, w3, w4, w5 = params
    x = x_nchw.astype(jnp.float32)
    x = _conv_layer(x, w1, stride=2, pad=1, norm=False)
    x = _conv_layer(x, w2, stride=2, pad=1, norm=True)
    x = _conv_layer(x, w3, stride=2, pad=1, norm=True)
    x = _conv_layer(x, w4, stride=1, pad=1, norm=True)
    return _head_layer(x, w5)          # (B, 1), already sigmoid'ed


if __name__ == "__main__":
    key = jax.random.PRNGKey(0)
    k_x, k_w = jax.random.split(key)

    num_channels = 8          # small synthetic width (PyTorch default would be 64)
    B, H, W = 2, 32, 32       # 32x32 keeps every conv output non-empty
    x = jax.random.normal(k_x, (B, 3, H, W), dtype=jnp.float32)  # NCHW like PyTorch

    params = init_discriminator_params(k_w, num_channels)

    out = discriminator_forward(x, params)
    out = jax.block_until_ready(out)

    assert out.shape == (B, 1), out.shape
    assert bool(jnp.all(jnp.isfinite(out)))
    assert bool(jnp.all((out >= 0.0) & (out <= 1.0)))
    print("KERNEL_OK")
</pallas_src>

<mosaic_0001>
module attributes {stable_mosaic.version = 11 : i64} {
  func.func @_conv_lrelu_kernel(%arg0: i32, %arg1: i32, %arg2: memref<1x48x256xbf16, #tpu.memory_space<vmem>>, %arg3: memref<8x48xbf16, #tpu.memory_space<vmem>>, %arg4: memref<1x8x256xbf16, #tpu.memory_space<vmem>>) attributes {dimension_semantics = [#tpu.dimension_semantics<parallel>, #tpu.dimension_semantics<parallel>], iteration_bounds = array<i64: 2, 1>, scalar_prefetch = 0 : i64, scratch_operands = 0 : i64, tpu.core_type = #tpu.core_type<tc>, window_params = [{transform_indices = @transform_0, window_bounds = array<i64: 1, 48, 256>}, {pipeline_mode = #tpu.pipeline_mode<synchronous>, transform_indices = @transform_1, window_bounds = array<i64: 8, 48>}, {transform_indices = @transform_2, window_bounds = array<i64: 1, 8, 256>}]} {
    %c0 = arith.constant 0 : index
    %c0_0 = arith.constant 0 : index
    %0 = vector.load %arg3[%c0, %c0_0] : memref<8x48xbf16, #tpu.memory_space<vmem>>, vector<8x48xbf16>
    %c0_1 = arith.constant 0 : index
    %c0_2 = arith.constant 0 : index
    %c0_3 = arith.constant 0 : index
    %1 = vector.load %arg2[%c0_1, %c0_2, %c0_3] : memref<1x48x256xbf16, #tpu.memory_space<vmem>>, vector<1x48x256xbf16>
    %2 = vector.shape_cast %1 : vector<1x48x256xbf16> to vector<48x256xbf16>
    %cst = arith.constant dense<0.000000e+00> : vector<8x256xf32>
    %3 = tpu.matmul %0, %2, %cst {dimension_numbers = #tpu.dot_dimension_numbers<[1], [0], [0], [1], [0, 0, 1, 1], [], []>} : vector<8x48xbf16>, vector<48x256xbf16>, vector<8x256xf32> -> vector<8x256xf32>
    %cst_4 = arith.constant 0.000000e+00 : f32
    %4 = vector.broadcast %cst_4 : f32 to vector<8x256xf32>
    %5 = arith.cmpf oge, %3, %4 : vector<8x256xf32>
    %cst_5 = arith.constant 2.000000e-01 : f32
    %6 = vector.broadcast %cst_5 : f32 to vector<8x256xf32>
    %7 = arith.mulf %6, %3 : vector<8x256xf32>
    %8 = arith.select %5, %3, %7 : vector<8x256xi1>, vector<8x256xf32>
    %9 = arith.truncf %8 : vector<8x256xf32> to vector<8x256xbf16>
    %c0_6 = arith.constant 0 : index
    %c0_7 = arith.constant 0 : index
    %c0_8 = arith.constant 0 : index
    %10 = vector.load %arg4[%c0_6, %c0_7, %c0_8] : memref<1x8x256xbf16, #tpu.memory_space<vmem>>, vector<1x8x256xbf16>
    %11 = vector.shape_cast %10 : vector<1x8x256xbf16> to vector<8x256xbf16>
    %12 = vector.shape_cast %9 : vector<8x256xbf16> to vector<1x8x256xbf16>
    tpu.vector_store %arg4[%c0_6, %c0_7, %c0_8], %12 {strides = array<i32>} : memref<1x8x256xbf16, #tpu.memory_space<vmem>>, vector<1x8x256xbf16>,
    return
  }
  func.func @transform_0(%arg0: i32, %arg1: i32) -> (i32, i32, i32) {
    %c0_i32 = arith.constant 0 : i32
    %c0_i32_0 = arith.constant 0 : i32
    return %arg0, %c0_i32, %arg1 : i32, i32, i32
  }
  func.func @transform_1(%arg0: i32, %arg1: i32) -> (i32, i32) {
    %c0_i32 = arith.constant 0 : i32
    %c0_i32_0 = arith.constant 0 : i32
    %c0_i32_1 = arith.constant 0 : i32
    return %c0_i32, %c0_i32_0 : i32, i32
  }
  func.func @transform_2(%arg0: i32, %arg1: i32) -> (i32, i32, i32) {
    %c0_i32 = arith.constant 0 : i32
    %c0_i32_0 = arith.constant 0 : i32
    return %arg0, %c0_i32, %arg1 : i32, i32, i32
  }
}

module attributes {stable_mosaic.version = 11 : i64} {
  func.func @_conv_in_lrelu_kernel(%arg0: i32, %arg1: i32, %arg2: memref<1x128x128xbf16, #tpu.memory_space<vmem>>, %arg3: memref<16x128xbf16, #tpu.memory_space<vmem>>, %arg4: memref<1x16x128xbf16, #tpu.memory_space<vmem>>, %arg5: memref<1x16x128xf32, #tpu.memory_space<vmem>>) attributes {dimension_semantics = [#tpu.dimension_semantics<parallel>, #tpu.dimension_semantics<arbitrary>], iteration_bounds = array<i64: 2, 1>, scalar_prefetch = 0 : i64, scratch_operands = 1 : i64, tpu.core_type = #tpu.core_type<tc>, window_params = [{transform_indices = @transform_0, window_bounds = array<i64: 1, 128, 128>}, {pipeline_mode = #tpu.pipeline_mode<synchronous>, transform_indices = @transform_1, window_bounds = array<i64: 16, 128>}, {transform_indices = @transform_2, window_bounds = array<i64: 1, 16, 128>}]} {
    %c0 = arith.constant 0 : index
    %c0_0 = arith.constant 0 : index
    %0 = vector.load %arg3[%c0, %c0_0] : memref<16x128xbf16, #tpu.memory_space<vmem>>, vector<16x128xbf16>
    %c0_1 = arith.constant 0 : index
    %c0_2 = arith.constant 0 : index
    %c0_3 = arith.constant 0 : index
    %1 = vector.load %arg2[%c0_1, %c0_2, %c0_3] : memref<1x128x128xbf16, #tpu.memory_space<vmem>>, vector<1x128x128xbf16>
    %2 = vector.shape_cast %1 : vector<1x128x128xbf16> to vector<128x128xbf16>
    %cst = arith.constant dense<0.000000e+00> : vector<16x128xf32>
    %3 = tpu.matmul %0, %2, %cst {dimension_numbers = #tpu.dot_dimension_numbers<[1], [0], [0], [1], [0, 0, 1, 1], [], []>} : vector<16x128xbf16>, vector<128x128xbf16>, vector<16x128xf32> -> vector<16x128xf32>
    %4 = arith.index_cast %arg1 : i32 to index
    %c0_4 = arith.constant 0 : index
    %c0_5 = arith.constant 0 : index
    %5 = vector.load %arg5[%4, %c0_4, %c0_5] : memref<1x16x128xf32, #tpu.memory_space<vmem>>, vector<1x16x128xf32>
    %6 = vector.shape_cast %5 : vector<1x16x128xf32> to vector<16x128xf32>
    %7 = vector.shape_cast %3 : vector<16x128xf32> to vector<1x16x128xf32>
    tpu.vector_store %arg5[%4, %c0_4, %c0_5], %7 {strides = array<i32>} : memref<1x16x128xf32, #tpu.memory_space<vmem>>, vector<1x16x128xf32>,
    %c0_i32 = arith.constant 0 : i32
    %8 = arith.cmpi eq, %arg1, %c0_i32 : i32
    %9 = arith.extui %8 : i1 to i32
    %c0_i32_6 = arith.constant 0 : i32
    %10 = arith.cmpi ne, %9, %c0_i32_6 : i32
    scf.if %10 {
      %cst_7 = arith.constant 0.000000e+00 : f32
      %11 = vector.broadcast %cst_7 : f32 to vector<16x1xf32>
      %c0_8 = arith.constant 0 : index
      %c0_9 = arith.constant 0 : index
      %c0_10 = arith.constant 0 : index
      %12 = vector.load %arg5[%c0_8, %c0_9, %c0_10] : memref<1x16x128xf32, #tpu.memory_space<vmem>>, vector<1x16x128xf32>
      %13 = vector.shape_cast %12 : vector<1x16x128xf32> to vector<16x128xf32>
      %cst_11 = arith.constant dense<0.000000e+00> : vector<16xf32>
      %14 = vector.multi_reduction <add>, %13, %cst_11 [1] : vector<16x128xf32> to vector<16xf32>
      %15 = vector.shape_cast %14 : vector<16xf32> to vector<16x1xf32>
      %16 = arith.addf %11, %15 : vector<16x1xf32>
      %cst_12 = arith.constant 1.562500e-02 : f32
      %17 = vector.broadcast %cst_12 : f32 to vector<16x1xf32>
      %18 = arith.mulf %16, %17 : vector<16x1xf32>
      %cst_13 = arith.constant 0.000000e+00 : f32
      %19 = vector.broadcast %cst_13 : f32 to vector<16x1xf32>
      %c0_14 = arith.constant 0 : index
      %c0_15 = arith.constant 0 : index
      %c0_16 = arith.constant 0 : index
      %20 = vector.load %arg5[%c0_14, %c0_15, %c0_16] : memref<1x16x128xf32, #tpu.memory_space<vmem>>, vector<1x16x128xf32>
      %21 = vector.shape_cast %20 : vector<1x16x128xf32> to vector<16x128xf32>
      %22 = vector.broadcast %18 : vector<16x1xf32> to vector<16x128xf32>
      %23 = arith.subf %21, %22 : vector<16x128xf32>
      %24 = arith.mulf %23, %23 : vector<16x128xf32>
      %cst_17 = arith.constant dense<0.000000e+00> : vector<16xf32>
      %25 = vector.multi_reduction <add>, %24, %cst_17 [1] : vector<16x128xf32> to vector<16xf32>
      %26 = vector.shape_cast %25 : vector<16xf32> to vector<16x1xf32>
      %27 = arith.addf %19, %26 : vector<16x1xf32>
      %28 = arith.mulf %18, %18 : vector<16x1xf32>
      %cst_18 = arith.constant 6.400000e+01 : f32
      %29 = vector.broadcast %cst_18 : f32 to vector<16x1xf32>
      %30 = arith.mulf %29, %28 : vector<16x1xf32>
      %31 = arith.subf %27, %30 : vector<16x1xf32>
      %cst_19 = arith.constant 1.562500e-02 : f32
      %32 = vector.broadcast %cst_19 : f32 to vector<16x1xf32>
      %33 = arith.mulf %31, %32 : vector<16x1xf32>
      %cst_20 = arith.constant 0.000000e+00 : f32
      %34 = vector.broadcast %cst_20 : f32 to vector<16x1xf32>
      %35 = arith.maximumf %33, %34 : vector<16x1xf32>
      %cst_21 = arith.constant 9.99999974E-6 : f32
      %36 = vector.broadcast %cst_21 : f32 to vector<16x1xf32>
      %37 = arith.addf %35, %36 : vector<16x1xf32>
      %38 = math.rsqrt %37 : vector<16x1xf32>
      %c0_22 = arith.constant 0 : index
      %c0_23 = arith.constant 0 : index
      %c0_24 = arith.constant 0 : index
      %39 = vector.load %arg5[%c0_22, %c0_23, %c0_24] : memref<1x16x128xf32, #tpu.memory_space<vmem>>, vector<1x16x128xf32>
      %40 = vector.shape_cast %39 : vector<1x16x128xf32> to vector<16x128xf32>
      %41 = vector.broadcast %18 : vector<16x1xf32> to vector<16x128xf32>
      %42 = arith.subf %40, %41 : vector<16x128xf32>
      %43 = vector.broadcast %38 : vector<16x1xf32> to vector<16x128xf32>
      %44 = arith.mulf %42, %43 : vector<16x128xf32>
      %cst_25 = arith.constant 0.000000e+00 : f32
      %45 = vector.broadcast %cst_25 : f32 to vector<16x128xf32>
      %46 = arith.cmpf oge, %44, %45 : vector<16x128xf32>
      %cst_26 = arith.constant 2.000000e-01 : f32
      %47 = vector.broadcast %cst_26 : f32 to vector<16x128xf32>
      %48 = arith.mulf %47, %44 : vector<16x128xf32>
      %49 = arith.select %46, %44, %48 : vector<16x128xi1>, vector<16x128xf32>
      %50 = arith.truncf %49 : vector<16x128xf32> to vector<16x128xbf16>
      %c0_27 = arith.constant 0 : index
      %c0_28 = arith.constant 0 : index
      %c0_29 = arith.constant 0 : index
      %51 = vector.load %arg4[%c0_27, %c0_28, %c0_29] : memref<1x16x128xbf16, #tpu.memory_space<vmem>>, vector<1x16x128xbf16>
      %52 = vector.shape_cast %51 : vector<1x16x128xbf16> to vector<16x128xbf16>
      %53 = vector.shape_cast %50 : vector<16x128xbf16> to vector<1x16x128xbf16>
      tpu.vector_store %arg4[%c0_27, %c0_28, %c0_29], %53 {strides = array<i32>} : memref<1x16x128xbf16, #tpu.memory_space<vmem>>, vector<1x16x128xbf16>,
    } else {
    }
    return
  }
  func.func @transform_0(%arg0: i32, %arg1: i32) -> (i32, i32, i32) {
    %c0_i32 = arith.constant 0 : i32
    %c0_i32_0 = arith.constant 0 : i32
    return %arg0, %c0_i32, %arg1 : i32, i32, i32
  }
  func.func @transform_1(%arg0: i32, %arg1: i32) -> (i32, i32) {
    %c0_i32 = arith.constant 0 : i32
    %c0_i32_0 = arith.constant 0 : i32
    %c0_i32_1 = arith.constant 0 : i32
    return %c0_i32, %c0_i32_0 : i32, i32
  }
  func.func @transform_2(%arg0: i32, %arg1: i32) -> (i32, i32, i32) {
    %c0_i32 = arith.constant 0 : i32
    %c0_i32_0 = arith.constant 0 : i32
    %c0_i32_1 = arith.constant 0 : i32
    return %arg0, %c0_i32, %c0_i32_0 : i32, i32, i32
  }
}

module attributes {stable_mosaic.version = 11 : i64} {
  func.func @_conv_in_lrelu_kernel(%arg0: i32, %arg1: i32, %arg2: memref<1x256x128xbf16, #tpu.memory_space<vmem>>, %arg3: memref<32x256xbf16, #tpu.memory_space<vmem>>, %arg4: memref<1x32x128xbf16, #tpu.memory_space<vmem>>, %arg5: memref<1x32x128xf32, #tpu.memory_space<vmem>>) attributes {dimension_semantics = [#tpu.dimension_semantics<parallel>, #tpu.dimension_semantics<arbitrary>], iteration_bounds = array<i64: 2, 1>, scalar_prefetch = 0 : i64, scratch_operands = 1 : i64, tpu.core_type = #tpu.core_type<tc>, window_params = [{transform_indices = @transform_0, window_bounds = array<i64: 1, 256, 128>}, {pipeline_mode = #tpu.pipeline_mode<synchronous>, transform_indices = @transform_1, window_bounds = array<i64: 32, 256>}, {transform_indices = @transform_2, window_bounds = array<i64: 1, 32, 128>}]} {
    %c0 = arith.constant 0 : index
    %c0_0 = arith.constant 0 : index
    %0 = vector.load %arg3[%c0, %c0_0] : memref<32x256xbf16, #tpu.memory_space<vmem>>, vector<32x256xbf16>
    %c0_1 = arith.constant 0 : index
    %c0_2 = arith.constant 0 : index
    %c0_3 = arith.constant 0 : index
    %1 = vector.load %arg2[%c0_1, %c0_2, %c0_3] : memref<1x256x128xbf16, #tpu.memory_space<vmem>>, vector<1x256x128xbf16>
    %2 = vector.shape_cast %1 : vector<1x256x128xbf16> to vector<256x128xbf16>
    %cst = arith.constant dense<0.000000e+00> : vector<32x128xf32>
    %3 = tpu.matmul %0, %2, %cst {dimension_numbers = #tpu.dot_dimension_numbers<[1], [0], [0], [1], [0, 0, 1, 1], [], []>} : vector<32x256xbf16>, vector<256x128xbf16>, vector<32x128xf32> -> vector<32x128xf32>
    %4 = arith.index_cast %arg1 : i32 to index
    %c0_4 = arith.constant 0 : index
    %c0_5 = arith.constant 0 : index
    %5 = vector.load %arg5[%4, %c0_4, %c0_5] : memref<1x32x128xf32, #tpu.memory_space<vmem>>, vector<1x32x128xf32>
    %6 = vector.shape_cast %5 : vector<1x32x128xf32> to vector<32x128xf32>
    %7 = vector.shape_cast %3 : vector<32x128xf32> to vector<1x32x128xf32>
    tpu.vector_store %arg5[%4, %c0_4, %c0_5], %7 {strides = array<i32>} : memref<1x32x128xf32, #tpu.memory_space<vmem>>, vector<1x32x128xf32>,
    %c0_i32 = arith.constant 0 : i32
    %8 = arith.cmpi eq, %arg1, %c0_i32 : i32
    %9 = arith.extui %8 : i1 to i32
    %c0_i32_6 = arith.constant 0 : i32
    %10 = arith.cmpi ne, %9, %c0_i32_6 : i32
    scf.if %10 {
      %cst_7 = arith.constant 0.000000e+00 : f32
      %11 = vector.broadcast %cst_7 : f32 to vector<32x1xf32>
      %c0_8 = arith.constant 0 : index
      %c0_9 = arith.constant 0 : index
      %c0_10 = arith.constant 0 : index
      %12 = vector.load %arg5[%c0_8, %c0_9, %c0_10] : memref<1x32x128xf32, #tpu.memory_space<vmem>>, vector<1x32x128xf32>
      %13 = vector.shape_cast %12 : vector<1x32x128xf32> to vector<32x128xf32>
      %cst_11 = arith.constant dense<0.000000e+00> : vector<32xf32>
      %14 = vector.multi_reduction <add>, %13, %cst_11 [1] : vector<32x128xf32> to vector<32xf32>
      %15 = vector.shape_cast %14 : vector<32xf32> to vector<32x1xf32>
      %16 = arith.addf %11, %15 : vector<32x1xf32>
      %cst_12 = arith.constant 6.250000e-02 : f32
      %17 = vector.broadcast %cst_12 : f32 to vector<32x1xf32>
      %18 = arith.mulf %16, %17 : vector<32x1xf32>
      %cst_13 = arith.constant 0.000000e+00 : f32
      %19 = vector.broadcast %cst_13 : f32 to vector<32x1xf32>
      %c0_14 = arith.constant 0 : index
      %c0_15 = arith.constant 0 : index
      %c0_16 = arith.constant 0 : index
      %20 = vector.load %arg5[%c0_14, %c0_15, %c0_16] : memref<1x32x128xf32, #tpu.memory_space<vmem>>, vector<1x32x128xf32>
      %21 = vector.shape_cast %20 : vector<1x32x128xf32> to vector<32x128xf32>
      %22 = vector.broadcast %18 : vector<32x1xf32> to vector<32x128xf32>
      %23 = arith.subf %21, %22 : vector<32x128xf32>
      %24 = arith.mulf %23, %23 : vector<32x128xf32>
      %cst_17 = arith.constant dense<0.000000e+00> : vector<32xf32>
      %25 = vector.multi_reduction <add>, %24, %cst_17 [1] : vector<32x128xf32> to vector<32xf32>
      %26 = vector.shape_cast %25 : vector<32xf32> to vector<32x1xf32>
      %27 = arith.addf %19, %26 : vector<32x1xf32>
      %28 = arith.mulf %18, %18 : vector<32x1xf32>
      %cst_18 = arith.constant 1.120000e+02 : f32
      %29 = vector.broadcast %cst_18 : f32 to vector<32x1xf32>
      %30 = arith.mulf %29, %28 : vector<32x1xf32>
      %31 = arith.subf %27, %30 : vector<32x1xf32>
      %cst_19 = arith.constant 6.250000e-02 : f32
      %32 = vector.broadcast %cst_19 : f32 to vector<32x1xf32>
      %33 = arith.mulf %31, %32 : vector<32x1xf32>
      %cst_20 = arith.constant 0.000000e+00 : f32
      %34 = vector.broadcast %cst_20 : f32 to vector<32x1xf32>
      %35 = arith.maximumf %33, %34 : vector<32x1xf32>
      %cst_21 = arith.constant 9.99999974E-6 : f32
      %36 = vector.broadcast %cst_21 : f32 to vector<32x1xf32>
      %37 = arith.addf %35, %36 : vector<32x1xf32>
      %38 = math.rsqrt %37 : vector<32x1xf32>
      %c0_22 = arith.constant 0 : index
      %c0_23 = arith.constant 0 : index
      %c0_24 = arith.constant 0 : index
      %39 = vector.load %arg5[%c0_22, %c0_23, %c0_24] : memref<1x32x128xf32, #tpu.memory_space<vmem>>, vector<1x32x128xf32>
      %40 = vector.shape_cast %39 : vector<1x32x128xf32> to vector<32x128xf32>
      %41 = vector.broadcast %18 : vector<32x1xf32> to vector<32x128xf32>
      %42 = arith.subf %40, %41 : vector<32x128xf32>
      %43 = vector.broadcast %38 : vector<32x1xf32> to vector<32x128xf32>
      %44 = arith.mulf %42, %43 : vector<32x128xf32>
      %cst_25 = arith.constant 0.000000e+00 : f32
      %45 = vector.broadcast %cst_25 : f32 to vector<32x128xf32>
      %46 = arith.cmpf oge, %44, %45 : vector<32x128xf32>
      %cst_26 = arith.constant 2.000000e-01 : f32
      %47 = vector.broadcast %cst_26 : f32 to vector<32x128xf32>
      %48 = arith.mulf %47, %44 : vector<32x128xf32>
      %49 = arith.select %46, %44, %48 : vector<32x128xi1>, vector<32x128xf32>
      %50 = arith.truncf %49 : vector<32x128xf32> to vector<32x128xbf16>
      %c0_27 = arith.constant 0 : index
      %c0_28 = arith.constant 0 : index
      %c0_29 = arith.constant 0 : index
      %51 = vector.load %arg4[%c0_27, %c0_28, %c0_29] : memref<1x32x128xbf16, #tpu.memory_space<vmem>>, vector<1x32x128xbf16>
      %52 = vector.shape_cast %51 : vector<1x32x128xbf16> to vector<32x128xbf16>
      %53 = vector.shape_cast %50 : vector<32x128xbf16> to vector<1x32x128xbf16>
      tpu.vector_store %arg4[%c0_27, %c0_28, %c0_29], %53 {strides = array<i32>} : memref<1x32x128xbf16, #tpu.memory_space<vmem>>, vector<1x32x128xbf16>,
    } else {
    }
    return
  }
  func.func @transform_0(%arg0: i32, %arg1: i32) -> (i32, i32, i32) {
    %c0_i32 = arith.constant 0 : i32
    %c0_i32_0 = arith.constant 0 : i32
    return %arg0, %c0_i32, %arg1 : i32, i32, i32
  }
  func.func @transform_1(%arg0: i32, %arg1: i32) -> (i32, i32) {
    %c0_i32 = arith.constant 0 : i32
    %c0_i32_0 = arith.constant 0 : i32
    %c0_i32_1 = arith.constant 0 : i32
    return %c0_i32, %c0_i32_0 : i32, i32
  }
  func.func @transform_2(%arg0: i32, %arg1: i32) -> (i32, i32, i32) {
    %c0_i32 = arith.constant 0 : i32
    %c0_i32_0 = arith.constant 0 : i32
    %c0_i32_1 = arith.constant 0 : i32
    return %arg0, %c0_i32, %c0_i32_0 : i32, i32, i32
  }
}

module attributes {stable_mosaic.version = 11 : i64} {
  func.func @_conv_in_lrelu_kernel(%arg0: i32, %arg1: i32, %arg2: memref<1x512x128xbf16, #tpu.memory_space<vmem>>, %arg3: memref<64x512xbf16, #tpu.memory_space<vmem>>, %arg4: memref<1x64x128xbf16, #tpu.memory_space<vmem>>, %arg5: memref<1x64x128xf32, #tpu.memory_space<vmem>>) attributes {dimension_semantics = [#tpu.dimension_semantics<parallel>, #tpu.dimension_semantics<arbitrary>], iteration_bounds = array<i64: 2, 1>, scalar_prefetch = 0 : i64, scratch_operands = 1 : i64, tpu.core_type = #tpu.core_type<tc>, window_params = [{transform_indices = @transform_0, window_bounds = array<i64: 1, 512, 128>}, {pipeline_mode = #tpu.pipeline_mode<synchronous>, transform_indices = @transform_1, window_bounds = array<i64: 64, 512>}, {transform_indices = @transform_2, window_bounds = array<i64: 1, 64, 128>}]} {
    %c0 = arith.constant 0 : index
    %c0_0 = arith.constant 0 : index
    %0 = vector.load %arg3[%c0, %c0_0] : memref<64x512xbf16, #tpu.memory_space<vmem>>, vector<64x512xbf16>
    %c0_1 = arith.constant 0 : index
    %c0_2 = arith.constant 0 : index
    %c0_3 = arith.constant 0 : index
    %1 = vector.load %arg2[%c0_1, %c0_2, %c0_3] : memref<1x512x128xbf16, #tpu.memory_space<vmem>>, vector<1x512x128xbf16>
    %2 = vector.shape_cast %1 : vector<1x512x128xbf16> to vector<512x128xbf16>
    %cst = arith.constant dense<0.000000e+00> : vector<64x128xf32>
    %3 = tpu.matmul %0, %2, %cst {dimension_numbers = #tpu.dot_dimension_numbers<[1], [0], [0], [1], [0, 0, 1, 1], [], []>} : vector<64x512xbf16>, vector<512x128xbf16>, vector<64x128xf32> -> vector<64x128xf32>
    %4 = arith.index_cast %arg1 : i32 to index
    %c0_4 = arith.constant 0 : index
    %c0_5 = arith.constant 0 : index
    %5 = vector.load %arg5[%4, %c0_4, %c0_5] : memref<1x64x128xf32, #tpu.memory_space<vmem>>, vector<1x64x128xf32>
    %6 = vector.shape_cast %5 : vector<1x64x128xf32> to vector<64x128xf32>
    %7 = vector.shape_cast %3 : vector<64x128xf32> to vector<1x64x128xf32>
    tpu.vector_store %arg5[%4, %c0_4, %c0_5], %7 {strides = array<i32>} : memref<1x64x128xf32, #tpu.memory_space<vmem>>, vector<1x64x128xf32>,
    %c0_i32 = arith.constant 0 : i32
    %8 = arith.cmpi eq, %arg1, %c0_i32 : i32
    %9 = arith.extui %8 : i1 to i32
    %c0_i32_6 = arith.constant 0 : i32
    %10 = arith.cmpi ne, %9, %c0_i32_6 : i32
    scf.if %10 {
      %cst_7 = arith.constant 0.000000e+00 : f32
      %11 = vector.broadcast %cst_7 : f32 to vector<64x1xf32>
      %c0_8 = arith.constant 0 : index
      %c0_9 = arith.constant 0 : index
      %c0_10 = arith.constant 0 : index
      %12 = vector.load %arg5[%c0_8, %c0_9, %c0_10] : memref<1x64x128xf32, #tpu.memory_space<vmem>>, vector<1x64x128xf32>
      %13 = vector.shape_cast %12 : vector<1x64x128xf32> to vector<64x128xf32>
      %cst_11 = arith.constant dense<0.000000e+00> : vector<64xf32>
      %14 = vector.multi_reduction <add>, %13, %cst_11 [1] : vector<64x128xf32> to vector<64xf32>
      %15 = vector.shape_cast %14 : vector<64xf32> to vector<64x1xf32>
      %16 = arith.addf %11, %15 : vector<64x1xf32>
      %cst_12 = arith.constant 0.111111112 : f32
      %17 = vector.broadcast %cst_12 : f32 to vector<64x1xf32>
      %18 = arith.mulf %16, %17 : vector<64x1xf32>
      %cst_13 = arith.constant 0.000000e+00 : f32
      %19 = vector.broadcast %cst_13 : f32 to vector<64x1xf32>
      %c0_14 = arith.constant 0 : index
      %c0_15 = arith.constant 0 : index
      %c0_16 = arith.constant 0 : index
      %20 = vector.load %arg5[%c0_14, %c0_15, %c0_16] : memref<1x64x128xf32, #tpu.memory_space<vmem>>, vector<1x64x128xf32>
      %21 = vector.shape_cast %20 : vector<1x64x128xf32> to vector<64x128xf32>
      %22 = vector.broadcast %18 : vector<64x1xf32> to vector<64x128xf32>
      %23 = arith.subf %21, %22 : vector<64x128xf32>
      %24 = arith.mulf %23, %23 : vector<64x128xf32>
      %cst_17 = arith.constant dense<0.000000e+00> : vector<64xf32>
      %25 = vector.multi_reduction <add>, %24, %cst_17 [1] : vector<64x128xf32> to vector<64xf32>
      %26 = vector.shape_cast %25 : vector<64xf32> to vector<64x1xf32>
      %27 = arith.addf %19, %26 : vector<64x1xf32>
      %28 = arith.mulf %18, %18 : vector<64x1xf32>
      %cst_18 = arith.constant 1.190000e+02 : f32
      %29 = vector.broadcast %cst_18 : f32 to vector<64x1xf32>
      %30 = arith.mulf %29, %28 : vector<64x1xf32>
      %31 = arith.subf %27, %30 : vector<64x1xf32>
      %cst_19 = arith.constant 0.111111112 : f32
      %32 = vector.broadcast %cst_19 : f32 to vector<64x1xf32>
      %33 = arith.mulf %31, %32 : vector<64x1xf32>
      %cst_20 = arith.constant 0.000000e+00 : f32
      %34 = vector.broadcast %cst_20 : f32 to vector<64x1xf32>
      %35 = arith.maximumf %33, %34 : vector<64x1xf32>
      %cst_21 = arith.constant 9.99999974E-6 : f32
      %36 = vector.broadcast %cst_21 : f32 to vector<64x1xf32>
      %37 = arith.addf %35, %36 : vector<64x1xf32>
      %38 = math.rsqrt %37 : vector<64x1xf32>
      %c0_22 = arith.constant 0 : index
      %c0_23 = arith.constant 0 : index
      %c0_24 = arith.constant 0 : index
      %39 = vector.load %arg5[%c0_22, %c0_23, %c0_24] : memref<1x64x128xf32, #tpu.memory_space<vmem>>, vector<1x64x128xf32>
      %40 = vector.shape_cast %39 : vector<1x64x128xf32> to vector<64x128xf32>
      %41 = vector.broadcast %18 : vector<64x1xf32> to vector<64x128xf32>
      %42 = arith.subf %40, %41 : vector<64x128xf32>
      %43 = vector.broadcast %38 : vector<64x1xf32> to vector<64x128xf32>
      %44 = arith.mulf %42, %43 : vector<64x128xf32>
      %cst_25 = arith.constant 0.000000e+00 : f32
      %45 = vector.broadcast %cst_25 : f32 to vector<64x128xf32>
      %46 = arith.cmpf oge, %44, %45 : vector<64x128xf32>
      %cst_26 = arith.constant 2.000000e-01 : f32
      %47 = vector.broadcast %cst_26 : f32 to vector<64x128xf32>
      %48 = arith.mulf %47, %44 : vector<64x128xf32>
      %49 = arith.select %46, %44, %48 : vector<64x128xi1>, vector<64x128xf32>
      %50 = arith.truncf %49 : vector<64x128xf32> to vector<64x128xbf16>
      %c0_27 = arith.constant 0 : index
      %c0_28 = arith.constant 0 : index
      %c0_29 = arith.constant 0 : index
      %51 = vector.load %arg4[%c0_27, %c0_28, %c0_29] : memref<1x64x128xbf16, #tpu.memory_space<vmem>>, vector<1x64x128xbf16>
      %52 = vector.shape_cast %51 : vector<1x64x128xbf16> to vector<64x128xbf16>
      %53 = vector.shape_cast %50 : vector<64x128xbf16> to vector<1x64x128xbf16>
      tpu.vector_store %arg4[%c0_27, %c0_28, %c0_29], %53 {strides = array<i32>} : memref<1x64x128xbf16, #tpu.memory_space<vmem>>, vector<1x64x128xbf16>,
    } else {
    }
    return
  }
  func.func @transform_0(%arg0: i32, %arg1: i32) -> (i32, i32, i32) {
    %c0_i32 = arith.constant 0 : i32
    %c0_i32_0 = arith.constant 0 : i32
    return %arg0, %c0_i32, %arg1 : i32, i32, i32
  }
  func.func @transform_1(%arg0: i32, %arg1: i32) -> (i32, i32) {
    %c0_i32 = arith.constant 0 : i32
    %c0_i32_0 = arith.constant 0 : i32
    %c0_i32_1 = arith.constant 0 : i32
    return %c0_i32, %c0_i32_0 : i32, i32
  }
  func.func @transform_2(%arg0: i32, %arg1: i32) -> (i32, i32, i32) {
    %c0_i32 = arith.constant 0 : i32
    %c0_i32_0 = arith.constant 0 : i32
    %c0_i32_1 = arith.constant 0 : i32
    return %arg0, %c0_i32, %c0_i32_0 : i32, i32, i32
  }
}

module attributes {stable_mosaic.version = 11 : i64} {
  func.func @_head_kernel(%arg0: i32, %arg1: i32, %arg2: memref<1x1024x128xbf16, #tpu.memory_space<vmem>>, %arg3: memref<1024x1xbf16, #tpu.memory_space<vmem>>, %arg4: memref<1x1x1xf32, #tpu.memory_space<vmem>>, %arg5: memref<1024x1xf32, #tpu.memory_space<vmem>>) attributes {dimension_semantics = [#tpu.dimension_semantics<parallel>, #tpu.dimension_semantics<arbitrary>], iteration_bounds = array<i64: 2, 1>, scalar_prefetch = 0 : i64, scratch_operands = 1 : i64, tpu.core_type = #tpu.core_type<tc>, window_params = [{transform_indices = @transform_0, window_bounds = array<i64: 1, 1024, 128>}, {pipeline_mode = #tpu.pipeline_mode<synchronous>, transform_indices = @transform_1, window_bounds = array<i64: 1024, 1>}, {transform_indices = @transform_2, window_bounds = array<i64: 1, 1, 1>}]} {
    %c0_i32 = arith.constant 0 : i32
    %0 = arith.cmpi eq, %arg1, %c0_i32 : i32
    %1 = arith.extui %0 : i1 to i32
    %c0_i32_0 = arith.constant 0 : i32
    %2 = arith.cmpi ne, %1, %c0_i32_0 : i32
    scf.if %2 {
      %cst_9 = arith.constant 0.000000e+00 : f32
      %14 = vector.broadcast %cst_9 : f32 to vector<1024x1xf32>
      %c0_10 = arith.constant 0 : index
      %c0_11 = arith.constant 0 : index
      %15 = vector.load %arg5[%c0_10, %c0_11] : memref<1024x1xf32, #tpu.memory_space<vmem>>, vector<1024x1xf32>
      tpu.vector_store %arg5[%c0_10, %c0_11], %14 {strides = array<i32>} : memref<1024x1xf32, #tpu.memory_space<vmem>>, vector<1024x1xf32>,
    } else {
    }
    %c0 = arith.constant 0 : index
    %c0_1 = arith.constant 0 : index
    %c0_2 = arith.constant 0 : index
    %3 = vector.load %arg2[%c0, %c0_1, %c0_2] : memref<1x1024x128xbf16, #tpu.memory_space<vmem>>, vector<1x1024x128xbf16>
    %4 = vector.shape_cast %3 : vector<1x1024x128xbf16> to vector<1024x128xbf16>
    %5 = arith.extf %4 : vector<1024x128xbf16> to vector<1024x128xf32>
    %c0_3 = arith.constant 0 : index
    %c0_4 = arith.constant 0 : index
    %6 = vector.load %arg5[%c0_3, %c0_4] : memref<1024x1xf32, #tpu.memory_space<vmem>>, vector<1024x1xf32>
    %cst = arith.constant dense<0.000000e+00> : vector<1024xf32>
    %7 = vector.multi_reduction <add>, %5, %cst [1] : vector<1024x128xf32> to vector<1024xf32>
    %8 = vector.shape_cast %7 : vector<1024xf32> to vector<1024x1xf32>
    %9 = arith.addf %6, %8 : vector<1024x1xf32>
    %c0_5 = arith.constant 0 : index
    %c0_6 = arith.constant 0 : index
    %10 = vector.load %arg5[%c0_5, %c0_6] : memref<1024x1xf32, #tpu.memory_space<vmem>>, vector<1024x1xf32>
    tpu.vector_store %arg5[%c0_5, %c0_6], %9 {strides = array<i32>} : memref<1024x1xf32, #tpu.memory_space<vmem>>, vector<1024x1xf32>,
    %c0_i32_7 = arith.constant 0 : i32
    %11 = arith.cmpi eq, %arg1, %c0_i32_7 : i32
    %12 = arith.extui %11 : i1 to i32
    %c0_i32_8 = arith.constant 0 : i32
    %13 = arith.cmpi ne, %12, %c0_i32_8 : i32
    scf.if %13 {
      %c0_9 = arith.constant 0 : index
      %c0_10 = arith.constant 0 : index
      %14 = vector.load %arg3[%c0_9, %c0_10] : memref<1024x1xbf16, #tpu.memory_space<vmem>>, vector<1024x1xbf16>
      %15 = arith.extf %14 : vector<1024x1xbf16> to vector<1024x1xf32>
      %c0_11 = arith.constant 0 : index
      %c0_12 = arith.constant 0 : index
      %16 = vector.load %arg5[%c0_11, %c0_12] : memref<1024x1xf32, #tpu.memory_space<vmem>>, vector<1024x1xf32>
      %17 = arith.mulf %15, %16 : vector<1024x1xf32>
      %cst_13 = arith.constant dense<0.000000e+00> : vector<1xf32>
      %18 = vector.multi_reduction <add>, %17, %cst_13 [0] : vector<1024x1xf32> to vector<1xf32>
      %19 = vector.shape_cast %18 : vector<1xf32> to vector<1x1xf32>
      %cst_14 = arith.constant 2.500000e-01 : f32
      %20 = vector.broadcast %cst_14 : f32 to vector<1x1xf32>
      %21 = arith.mulf %19, %20 : vector<1x1xf32>
      %cst_15 = arith.constant 0.000000e+00 : f32
      %22 = vector.broadcast %cst_15 : f32 to vector<1x1xf32>
      %23 = arith.subf %22, %21 : vector<1x1xf32>
      %24 = math.exp %23 : vector<1x1xf32>
      %cst_16 = arith.constant 1.000000e+00 : f32
      %25 = vector.broadcast %cst_16 : f32 to vector<1x1xf32>
      %26 = arith.addf %25, %24 : vector<1x1xf32>
      %cst_17 = arith.constant 1.000000e+00 : f32
      %27 = vector.broadcast %cst_17 : f32 to vector<1x1xf32>
      %28 = arith.divf %27, %26 : vector<1x1xf32>
      %c0_18 = arith.constant 0 : index
      %c0_19 = arith.constant 0 : index
      %c0_20 = arith.constant 0 : index
      %29 = vector.load %arg4[%c0_18, %c0_19, %c0_20] : memref<1x1x1xf32, #tpu.memory_space<vmem>>, vector<1x1x1xf32>
      %30 = vector.shape_cast %29 : vector<1x1x1xf32> to vector<1x1xf32>
      %31 = vector.shape_cast %28 : vector<1x1xf32> to vector<1x1x1xf32>
      tpu.vector_store %arg4[%c0_18, %c0_19, %c0_20], %31 {strides = array<i32>} : memref<1x1x1xf32, #tpu.memory_space<vmem>>, vector<1x1x1xf32>,
    } else {
    }
    return
  }
  func.func @transform_0(%arg0: i32, %arg1: i32) -> (i32, i32, i32) {
    %c0_i32 = arith.constant 0 : i32
    %c0_i32_0 = arith.constant 0 : i32
    return %arg0, %c0_i32, %arg1 : i32, i32, i32
  }
  func.func @transform_1(%arg0: i32, %arg1: i32) -> (i32, i32) {
    %c0_i32 = arith.constant 0 : i32
    %c0_i32_0 = arith.constant 0 : i32
    %c0_i32_1 = arith.constant 0 : i32
    return %c0_i32, %c0_i32_0 : i32, i32
  }
  func.func @transform_2(%arg0: i32, %arg1: i32) -> (i32, i32, i32) {
    %c0_i32 = arith.constant 0 : i32
    %c0_i32_0 = arith.constant 0 : i32
    %c0_i32_1 = arith.constant 0 : i32
    return %arg0, %c0_i32, %c0_i32_0 : i32, i32, i32
  }
}

</mosaic_0001>

<bundles_post_ra>
// kernel: discriminator_forward.5
= control target key start
LH: loop header
LB: loop body
LE: loop exit
PB: predicated region body
PF: predicated region fallthrough
CT: control target
= control target key end

     0   :  { %s453_s9 = smov 0   ;;  %s455_s10 = smov 0   ;;  %s493_s0 = inlined_call_operand.vmem [shape: bf16[2,48,256], index: 0, kind: input, shape index: {}]   ;;  %s494_s1 = inlined_call_operand.vmem [shape: bf16[8,48], index: 1, kind: input, shape index: {}]   ;;  %s495_s2 = inlined_call_operand.vmem [shape: bf16[2,8,256], index: 2, kind: output, shape index: {}]  }
   0x1   :  { %s457_s11 = smov 0  }
   0x2 LB: > { %s24_s12 = sadd.s32 1, %s432_s10  ;;  %p350_p0 = scmp.ge.s32.totalorder %s436_s11, 1  ;;  %s436_s11 = sphi %s457_s11, %s12_s11   ;;  %s432_s10 = sphi %s455_s10, %s497_s10   ;;  %s428_s9 = sphi %s453_s9, %s496_s9  }
   0x3   : > { %p26_p1 = scmp.ge.s32.totalorder %s24_s12, 2  ;;  %p133_p2 = scmp.lt.s32.totalorder %s436_s11, 3 }
   0x5   : > { %s499_s12 = smov (%p26_p1, %s24_s12), 0  ;;  %p134_p3 = pnand %p350_p0, %p133_p2 }
   0x6   : > { %p164_p4 = scmp.lt.s32.totalorder (!%p134_p3), %s428_s9, 1 }
   0x7   : > { %137 = sbr.rel (%p134_p3) target bundleno = 165 (0xa5), region = 28 }
   0xc   : > { %s501_s9 = smov (!%p164_p4, %s428_s9), 1  ;;  %v184_v18 = vld [vmem:[%s494_s1] sm:$0xf]  ;;  %vm221_vm0 = vcmask 392192  }
   0xd   : > { %s389_s13 = smul.u32 48, %s501_s9  ;;  %s382_s19 = sshll.u32 %s501_s9, 3 }
   0xe   : > { %s181_s22 = scalar_lea.vmem %s495_s2, %s382_s19 }
   0xf   : > { %s171_s16 = scalar_lea.vmem %s493_s0, %s389_s13 }
  0x10   : > { %v372_v0 = vld [vmem:[%s171_s16 + $0x20] sm:$0xf]  ;;  %v388_v1 = vld [vmem:[%s171_s16 + $0x24] sm:$0xf0]  ;;  %v387_v2 = vld [vmem:[%s171_s16 + $0x24] sm:$0xf] }
  0x11   : > { %v373_v3 = vor.u32 %v388_v1, %v372_v0  ;;  %v374_v4 = vld [vmem:[%s171_s16 + $0x28] sm:$0xf0]  ;;  %v364_v5 = vld [vmem:[%s171_s16 + $0x10] sm:$0xf]  ;;  %v386_v6 = vld [vmem:[%s171_s16 + $0x14] sm:$0xf0] }
  0x12   : > { %v377_v7 = vor.u32 %v387_v2, %v374_v4  ;;  %v385_v8 = vld [vmem:[%s171_s16 + $0x14] sm:$0xf]  ;;  %v366_v9 = vld [vmem:[%s171_s16 + $0x18] sm:$0xf0]  ;;  %v365_v10 = vor.u32 %v386_v6, %v364_v5  ;;  %v356_v12 = vld [vmem:[%s171_s16] sm:$0xf] }
  0x13   : > { %230 = vmatpush.bf16.msra.mxu0 %v373_v3  ;;  %v369_v11 = vor.u32 %v385_v8, %v366_v9  ;;  %v384_v13 = vld [vmem:[%s171_s16 + $0x4] sm:$0xf0]  ;;  %v383_v14 = vld [vmem:[%s171_s16 + $0x4] sm:$0xf]  ;;  %v358_v15 = vld [vmem:[%s171_s16 + $0x8] sm:$0xf0] }
  0x14   : > { %243 = vmatpush.bf16.msra.mxu1 %v377_v7  ;;  %v357_v16 = vor.u32 %v384_v13, %v356_v12  ;;  %v361_v17 = vor.u32 %v383_v14, %v358_v15 }
  0x17   : > { %231 = vmatpush.bf16.msra.mxu0 %v365_v10 }
  0x18   : > { %244 = vmatpush.bf16.msra.mxu1 %v369_v11 }
  0x1b   : > { %232 = vmatpush.bf16.msra.mxu0 %v357_v16 }
  0x1c   : > { %245 = vmatpush.bf16.msra.mxu1 %v361_v17 }
  0x1e   : > { %378 = vmatmul.msk.bf16.vlgmr.msra.gmra.mxu0 %vm221_vm0, %v184_v18 }
  0x1f   : > { %379 = vmatmul.msk.bf16.vlgmr.msra.gmra.mxu1 %vm221_vm0, %v184_v18 }
  0x9b   : > { %v234_v19 = vpop.f32.mrf.mxu0 }
  0x9c   : > { %vm251_vm1 = vcmp.ge.f32.partialorder %v234_v19, 0.0  ;;  %v253_v20 = vmul.f32 0.2, %v234_v19  ;;  %v247_v21 = vpop.f32.mrf.mxu1 }
  0x9d   : > { %vm252_vm2 = vcmp.ge.f32.partialorder %v247_v21, 0.0  ;;  %v254_v22 = vmul.f32 0.2, %v247_v21 }
  0x9e   : > { %v255_v23 = vsel %vm251_vm1, %v234_v19, %v253_v20 }
  0x9f   : > { %v256_v24 = vsel %vm252_vm2, %v247_v21, %v254_v22 }
  0xa0   : > { %v257_v25 = vpack.c.bf16 %v256_v24, %v255_v23 }
  0xa2   : > { %258 = vst [vmem:[%s181_s22] sm:$0xff] %v257_v25 }
  0xa3   : > { %v236_v26 = vpop.f32.mrf.mxu0 }
  0xa4   : > { %v249_v27 = vpop.f32.mrf.mxu1 }
  0xa5 PF: > { %s12_s11 = sadd.s32 1, %s436_s11   ;;  %s496_s9 = smov %s432_s10 }
  0xa6   : > { %p9_p5 = scmp.ge.s32.totalorder %s12_s11, 4   ;;  %s497_s10 = smov %s499_s12 }
  0xa8   :  { %11 = sbr.rel (!%p9_p5) target bundleno = 2 (0x2), region = 58 }

// kernel: discriminator_forward.6
= control target key start
LH: loop header
LB: loop body
LE: loop exit
PB: predicated region body
PF: predicated region fallthrough
CT: control target
= control target key end

     0   :  { %s526_s9 = smov 0   ;;  %s528_s10 = smov 0   ;;  %s566_s0 = inlined_call_operand.vmem [shape: bf16[2,128,128], index: 0, kind: input, shape index: {}]   ;;  %s567_s1 = inlined_call_operand.vmem [shape: bf16[16,128], index: 1, kind: input, shape index: {}]   ;;  %s568_s2 = inlined_call_operand.vmem [shape: bf16[2,16,128], index: 2, kind: output, shape index: {}]  }
   0x1   :  { %s530_s11 = smov 0  }
   0x2 LB: > { %s24_s12 = sadd.s32 1, %s505_s10  ;;  %p400_p0 = scmp.ge.s32.totalorder %s509_s11, 1  ;;  %s509_s11 = sphi %s530_s11, %s12_s11   ;;  %s505_s10 = sphi %s528_s10, %s570_s10   ;;  %s501_s9 = sphi %s526_s9, %s569_s9  }
   0x3   : > { %p26_p1 = scmp.ge.s32.totalorder %s24_s12, 2  ;;  %p129_p2 = scmp.lt.s32.totalorder %s509_s11, 3 }
   0x5   : > { %s572_s12 = smov (%p26_p1, %s24_s12), 0  ;;  %p130_p3 = pnand %p400_p0, %p129_p2 }
   0x6   : > { %p154_p4 = scmp.lt.s32.totalorder (!%p130_p3), %s501_s9, 1 }
   0x7   : > { %133 = sbr.rel (%p130_p3) target bundleno = 453 (0x1c5), region = 28 }
   0xc   : > { %s574_s9 = smov (!%p154_p4, %s501_s9), 1  ;;  %v445_v8 = vld [vmem:[%s567_s1] sm:$0xff] }
   0xd   : > { %s443_s13 = sshll.u32 %s574_s9, 6  ;;  %s444_s19 = sshll.u32 %s574_s9, 3 }
   0xe   : > { %s161_s16 = scalar_lea.vmem %s566_s0, %s443_s13  ;;  %s166_s22 = scalar_lea.vmem %s568_s2, %s444_s19 }
   0xf   : > { %v453_v0 = vld [vmem:[%s161_s16 + $0x38] sm:$0xff]  ;;  %v452_v1 = vld [vmem:[%s161_s16 + $0x30] sm:$0xff]  ;;  %v451_v2 = vld [vmem:[%s161_s16 + $0x28] sm:$0xff] }
  0x10   : > { %239 = vmatpush.bf16.msra.mxu0 %v453_v0  ;;  %v450_v3 = vld [vmem:[%s161_s16 + $0x20] sm:$0xff]  ;;  %v449_v4 = vld [vmem:[%s161_s16 + $0x18] sm:$0xff]  ;;  %v448_v5 = vld [vmem:[%s161_s16 + $0x10] sm:$0xff] }
  0x11   : > { %v447_v6 = vld [vmem:[%s161_s16 + $0x8] sm:$0xff]  ;;  %v446_v7 = vld [vmem:[%s161_s16] sm:$0xff] }
  0x14   : > { %240 = vmatpush.bf16.msra.mxu0 %v452_v1 }
  0x18   : > { %241 = vmatpush.bf16.msra.mxu0 %v451_v2 }
  0x1c   : > { %242 = vmatpush.bf16.msra.mxu0 %v450_v3 }
  0x20   : > { %243 = vmatpush.bf16.msra.mxu0 %v449_v4 }
  0x24   : > { %244 = vmatpush.bf16.msra.mxu0 %v448_v5 }
  0x28   : > { %245 = vmatpush.bf16.msra.mxu0 %v447_v6 }
  0x2c   : > { %246 = vmatpush.bf16.msra.mxu0 %v446_v7 }
  0x2f   : > { %247 = vmatmul.bf16.vlgmr.msra.gmra.mxu0 %v445_v8 }
  0xac   : > { %v248_v9 = vpop.f32.mrf.mxu0 }
  0xad   : > { %263 = vadd.xlane.f32.xlu0 %v248_v9 }
  0xb4   : > { %v250_v10 = vpop.f32.mrf.mxu0 }
  0xb5   : > { %265 = vadd.xlane.f32.xlu0 %v250_v10 }
 0x120   : > { %v264_v11 = vpop.xlane.xlu0 %263 }
 0x121   : > { %v269_v12 = vmul.f32 0.015625, %v264_v11 }
 0x123   : > { %v271_v13 = vsub.f32 %v248_v9, %v269_v12  ;;  %v281_v19 = vmul.f32 %v269_v12, %v269_v12 }
 0x125   : > { %v273_v14 = vmul.f32 %v271_v13, %v271_v13  ;;  %v283_v20 = vmul.f32 64.0, %v281_v19 }
 0x127   : > { %275 = vadd.xlane.f32.xlu1 %v273_v14 }
 0x128   : > { %v266_v15 = vpop.xlane.xlu0 %265 }
 0x129   : > { %v270_v16 = vmul.f32 0.015625, %v266_v15 }
 0x12b   : > { %v272_v17 = vsub.f32 %v250_v10, %v270_v16  ;;  %v282_v23 = vmul.f32 %v270_v16, %v270_v16 }
 0x12d   : > { %v274_v18 = vmul.f32 %v272_v17, %v272_v17  ;;  %v284_v26 = vmul.f32 64.0, %v282_v23 }
 0x12f   : > { %277 = vadd.xlane.f32.xlu1 %v274_v18 }
 0x19a   : > { %v276_v21 = vpop.xlane.xlu1 %275 }
 0x19b   : > { %v285_v22 = vsub.f32 %v276_v21, %v283_v20 }
 0x19d   : > { %v287_v24 = vmul.f32 0.015625, %v285_v22 }
 0x19f   : > { %v289_v25 = vmax.f32 %v287_v24, 0.0 }
 0x1a1   : > { %v291_v27 = vadd.f32 1e-05, %v289_v25 }
 0x1a2   : > { %v278_v28 = vpop.xlane.xlu1 %277 }
 0x1a3   : > { %483 = vrsqrt.f32 %v291_v27  ;;  %v286_v29 = vsub.f32 %v278_v28, %v284_v26  ;;  %vm299_vm1 = vweird.f32 %v291_v27 }
 0x1a5   : > { %v288_v30 = vmul.f32 0.015625, %v286_v29 }
 0x1a7   : > { %v290_v31 = vmax.f32 %v288_v30, 0.0 }
 0x1a9   : > { %v484_v32 = vpop.eup %483  ;;  %v292_v33 = vadd.f32 1e-05, %v290_v31 }
 0x1aa   : > { %v294_v34 = vmul.f32 %v484_v32, %v291_v27  ;;  %vm300_vm0 = vweird.f32 %v484_v32 }
 0x1ab   : > { %485 = vrsqrt.f32 %v292_v33  ;;  %vm301_vm2 = vmor %vm299_vm1, %vm300_vm0  ;;  %vm309_vm4 = vweird.f32 %v292_v33 }
 0x1ac   : > { %v295_v35 = vmul.f32 %v484_v32, %v294_v34 }
 0x1ae   : > { %v296_v36 = vmul.f32 0.5, %v295_v35 }
 0x1b0   : > { %v297_v37 = vsub.f32 1.5, %v296_v36 }
 0x1b1   : > { %v486_v38 = vpop.eup %485 }
 0x1b2   : > { %v298_v39 = vmul.f32 %v484_v32, %v297_v37  ;;  %v304_v40 = vmul.f32 %v486_v38, %v292_v33  ;;  %vm310_vm3 = vweird.f32 %v486_v38 }
 0x1b3   : > { %vm311_vm5 = vmor %vm309_vm4, %vm310_vm3 }
 0x1b4   : > { %v305_v41 = vmul.f32 %v486_v38, %v304_v40  ;;  %v302_v42 = vsel %vm301_vm2, %v484_v32, %v298_v39 }
 0x1b5   : > { %v313_v45 = vmul.f32 %v302_v42, %v271_v13 }
 0x1b6   : > { %v306_v43 = vmul.f32 0.5, %v305_v41 }
 0x1b7   : > { %v317_v48 = vmul.f32 0.2, %v313_v45  ;;  %vm315_vm6 = vcmp.ge.f32.partialorder %v313_v45, 0.0 }
 0x1b8   : > { %v307_v44 = vsub.f32 1.5, %v306_v43 }
 0x1b9   : > { %v319_v51 = vsel %vm315_vm6, %v313_v45, %v317_v48 }
 0x1ba   : > { %v308_v46 = vmul.f32 %v486_v38, %v307_v44 }
 0x1bc   : > { %v312_v47 = vsel %vm311_vm5, %v486_v38, %v308_v46 }
 0x1bd   : > { %v314_v49 = vmul.f32 %v312_v47, %v272_v17 }
 0x1bf   : > { %vm316_vm7 = vcmp.ge.f32.partialorder %v314_v49, 0.0  ;;  %v318_v50 = vmul.f32 0.2, %v314_v49 }
 0x1c1   : > { %v320_v52 = vsel %vm316_vm7, %v314_v49, %v318_v50 }
 0x1c2   : > { %v457_v53 = vpack.c.bf16 %v320_v52, %v319_v51 }
 0x1c4   : > { %458 = vst [vmem:[%s166_s22] sm:$0xff] %v457_v53  }
 0x1c5 PF: > { %s12_s11 = sadd.s32 1, %s509_s11   ;;  %s569_s9 = smov %s505_s10 }
 0x1c6   : > { %p9_p5 = scmp.ge.s32.totalorder %s12_s11, 4   ;;  %s570_s10 = smov %s572_s12 }
 0x1c8   :  { %11 = sbr.rel (!%p9_p5) target bundleno = 2 (0x2), region = 63 }

// kernel: discriminator_forward.7
= control target key start
LH: loop header
LB: loop body
LE: loop exit
PB: predicated region body
PF: predicated region fallthrough
CT: control target
= control target key end

     0   :  { %s777_s9 = smov 0   ;;  %s779_s10 = smov 0   ;;  %s876_s0 = inlined_call_operand.vmem [shape: bf16[2,256,128], index: 0, kind: input, shape index: {}]   ;;  %s877_s1 = inlined_call_operand.vmem [shape: bf16[32,256], index: 1, kind: input, shape index: {}]   ;;  %s878_s2 = inlined_call_operand.vmem [shape: bf16[2,32,128], index: 2, kind: output, shape index: {}]  }
   0x1   :  { %s781_s11 = smov 0  }
   0x2 LB: > { %s24_s12 = sadd.s32 1, %s756_s10  ;;  %p570_p0 = scmp.ge.s32.totalorder %s760_s11, 1  ;;  %s760_s11 = sphi %s781_s11, %s12_s11   ;;  %s756_s10 = sphi %s779_s10, %s880_s10   ;;  %s752_s9 = sphi %s777_s9, %s879_s9  }
   0x3   : > { %p26_p1 = scmp.ge.s32.totalorder %s24_s12, 2  ;;  %p129_p2 = scmp.lt.s32.totalorder %s760_s11, 3 }
   0x5   : > { %s882_s12 = smov (%p26_p1, %s24_s12), 0  ;;  %p130_p3 = pnand %p570_p0, %p129_p2 }
   0x6   : > { %p154_p4 = scmp.lt.s32.totalorder (!%p130_p3), %s752_s9, 1 }
   0x7   : > { %133 = sbr.rel (%p130_p3) target bundleno = 462 (0x1ce), region = 28 }
   0xc   : > { %s884_s9 = smov (!%p154_p4, %s752_s9), 1  ;;  %v577_v14 = vld [vmem:[%s877_s1] sm:$0xf]  ;;  %v660_v16 = vld [vmem:[%s877_s1 + $0x4] sm:$0xf0] }
   0xd   : > { %s657_s13 = sshll.u32 %s884_s9, 7  ;;  %v585_v17 = vld [vmem:[%s877_s1 + $0x10] sm:$0xf]  ;;  %v662_v19 = vld [vmem:[%s877_s1 + $0x14] sm:$0xf0]  ;;  %v578_v24 = vor.u32 %v660_v16, %v577_v14  ;;  %s658_s5 = sshll.u32 %s884_s9, 4 }
   0xe   : > { %s801_s16 = scalar_lea.vmem %s876_s0, %s657_s13  ;;  %v659_v20 = vld [vmem:[%s877_s1 + $0x4] sm:$0xf]  ;;  %v579_v21 = vld [vmem:[%s877_s1 + $0x8] sm:$0xf0]  ;;  %v661_v22 = vld [vmem:[%s877_s1 + $0x14] sm:$0xf]  ;;  %v586_v25 = vor.u32 %v662_v19, %v585_v17  ;;  %s166_s8 = scalar_lea.vmem %s878_s2, %s658_s5 }
   0xf   : > { %v670_v0 = vld [vmem:[%s801_s16 + $0x38] sm:$0xff]  ;;  %v669_v2 = vld [vmem:[%s801_s16 + $0x30] sm:$0xff]  ;;  %v668_v4 = vld [vmem:[%s801_s16 + $0x28] sm:$0xff]  ;;  %v582_v26 = vor.u32 %v659_v20, %v579_v21 }
  0x10   : > { %v678_v1 = vld [vmem:[%s801_s16 + $0x78] sm:$0xff]  ;;  %319 = vmatpush.bf16.msra.mxu0 %v670_v0  ;;  %690 = vmatpush.bf16.msra.mxu2 %v670_v0  ;;  %v677_v3 = vld [vmem:[%s801_s16 + $0x70] sm:$0xff]  ;;  %v676_v5 = vld [vmem:[%s801_s16 + $0x68] sm:$0xff] }
  0x11   : > { %338 = vmatpush.bf16.msra.mxu1 %v678_v1  ;;  %698 = vmatpush.bf16.msra.mxu3 %v678_v1  ;;  %v667_v6 = vld [vmem:[%s801_s16 + $0x20] sm:$0xff]  ;;  %v666_v8 = vld [vmem:[%s801_s16 + $0x18] sm:$0xff]  ;;  %v665_v10 = vld [vmem:[%s801_s16 + $0x10] sm:$0xff] }
  0x12   : > { %v675_v7 = vld [vmem:[%s801_s16 + $0x60] sm:$0xff]  ;;  %v674_v9 = vld [vmem:[%s801_s16 + $0x58] sm:$0xff]  ;;  %v673_v11 = vld [vmem:[%s801_s16 + $0x50] sm:$0xff] }
  0x13   : > { %v664_v12 = vld [vmem:[%s801_s16 + $0x8] sm:$0xff]  ;;  %v663_v15 = vld [vmem:[%s801_s16] sm:$0xff]  ;;  %v587_v23 = vld [vmem:[%s877_s1 + $0x18] sm:$0xf0] }
  0x14   : > { %320 = vmatpush.bf16.msra.mxu0 %v669_v2  ;;  %691 = vmatpush.bf16.msra.mxu2 %v669_v2  ;;  %v672_v13 = vld [vmem:[%s801_s16 + $0x48] sm:$0xff]  ;;  %v671_v18 = vld [vmem:[%s801_s16 + $0x40] sm:$0xff]  ;;  %v590_v27 = vor.u32 %v661_v22, %v587_v23 }
  0x15   : > { %339 = vmatpush.bf16.msra.mxu1 %v677_v3  ;;  %699 = vmatpush.bf16.msra.mxu3 %v677_v3 }
  0x18   : > { %321 = vmatpush.bf16.msra.mxu0 %v668_v4  ;;  %692 = vmatpush.bf16.msra.mxu2 %v668_v4 }
  0x19   : > { %340 = vmatpush.bf16.msra.mxu1 %v676_v5  ;;  %700 = vmatpush.bf16.msra.mxu3 %v676_v5 }
  0x1c   : > { %322 = vmatpush.bf16.msra.mxu0 %v667_v6  ;;  %693 = vmatpush.bf16.msra.mxu2 %v667_v6 }
  0x1d   : > { %341 = vmatpush.bf16.msra.mxu1 %v675_v7  ;;  %701 = vmatpush.bf16.msra.mxu3 %v675_v7 }
  0x20   : > { %323 = vmatpush.bf16.msra.mxu0 %v666_v8  ;;  %694 = vmatpush.bf16.msra.mxu2 %v666_v8 }
  0x21   : > { %342 = vmatpush.bf16.msra.mxu1 %v674_v9  ;;  %702 = vmatpush.bf16.msra.mxu3 %v674_v9 }
  0x24   : > { %324 = vmatpush.bf16.msra.mxu0 %v665_v10  ;;  %695 = vmatpush.bf16.msra.mxu2 %v665_v10 }
  0x25   : > { %343 = vmatpush.bf16.msra.mxu1 %v673_v11  ;;  %703 = vmatpush.bf16.msra.mxu3 %v673_v11 }
  0x28   : > { %325 = vmatpush.bf16.msra.mxu0 %v664_v12  ;;  %696 = vmatpush.bf16.msra.mxu2 %v664_v12 }
  0x29   : > { %344 = vmatpush.bf16.msra.mxu1 %v672_v13  ;;  %704 = vmatpush.bf16.msra.mxu3 %v672_v13 }
  0x2c   : > { %326 = vmatpush.bf16.msra.mxu0 %v663_v15  ;;  %697 = vmatpush.bf16.msra.mxu2 %v663_v15 }
  0x2d   : > { %345 = vmatpush.bf16.msra.mxu1 %v671_v18  ;;  %705 = vmatpush.bf16.msra.mxu3 %v671_v18 }
  0x2f   : > { %327 = vmatmul.bf16.vlgmr.msra.gmra.mxu0 %v578_v24  ;;  %332 = vmatmul.bf16.vlgmr.msra.gmra.mxu2 %v586_v25 }
  0x30   : > { %346 = vmatmul.bf16.vlgmr.msra.gmra.mxu1 %v582_v26  ;;  %351 = vmatmul.bf16.vlgmr.msra.gmra.mxu3 %v590_v27 }
  0xac   : > { %v328_v28 = vpop.f32.mrf.mxu0 }
  0xad   : > { %v347_v29 = vpop.f32.mrf.mxu1 }
  0xae   : > { %v348_v30 = vadd.f32 %v347_v29, %v328_v28 }
  0xb0   : > { %371 = vadd.xlane.f32.xlu0 %v348_v30 }
  0xb2   : > { %v333_v31 = vpop.f32.mrf.mxu2 }
  0xb3   : > { %v352_v32 = vpop.f32.mrf.mxu3 }
  0xb4   : > { %v353_v33 = vadd.f32 %v352_v32, %v333_v31  ;;  %v330_v34 = vpop.f32.mrf.mxu0 }
  0xb5   : > { %v349_v35 = vpop.f32.mrf.mxu1 }
  0xb6   : > { %v350_v36 = vadd.f32 %v349_v35, %v330_v34  ;;  %375 = vadd.xlane.f32.xlu1 %v353_v33 }
  0xb8   : > { %373 = vadd.xlane.f32.xlu0 %v350_v36 }
  0xba   : > { %v335_v37 = vpop.f32.mrf.mxu2 }
  0xbb   : > { %v354_v38 = vpop.f32.mrf.mxu3 }
  0xbc   : > { %v355_v39 = vadd.f32 %v354_v38, %v335_v37 }
  0xbe   : > { %377 = vadd.xlane.f32.xlu1 %v355_v39 }
 0x123   : > { %v372_v40 = vpop.xlane.xlu0 %371 }
 0x124   : > { %v383_v41 = vmul.f32 0.0625, %v372_v40 }
 0x126   : > { %v843_v42 = vsub.f32 %v348_v30, %v383_v41  ;;  %v407_v56 = vmul.f32 %v383_v41, %v383_v41 }
 0x128   : > { %v391_v43 = vmul.f32 %v843_v42, %v843_v42  ;;  %v411_v57 = vmul.f32 112.0, %v407_v56 }
 0x129   : > { %v376_v44 = vpop.xlane.xlu1 %375 }
 0x12a   : > { %v385_v45 = vmul.f32 0.0625, %v376_v44  ;;  %395 = vadd.xlane.f32.xlu2 %v391_v43 }
 0x12b   : > { %v374_v46 = vpop.xlane.xlu0 %373 }
 0x12c   : > { %v847_v47 = vsub.f32 %v353_v33, %v385_v45  ;;  %v384_v48 = vmul.f32 0.0625, %v374_v46  ;;  %v409_v59 = vmul.f32 %v385_v45, %v385_v45 }
 0x12e   : > { %v849_v49 = vsub.f32 %v350_v36, %v384_v48  ;;  %v393_v50 = vmul.f32 %v847_v47, %v847_v47  ;;  %v408_v61 = vmul.f32 %v384_v48, %v384_v48  ;;  %v413_v0 = vmul.f32 112.0, %v409_v59 }
 0x130   : > { %399 = vadd.xlane.f32.xlu0 %v393_v50  ;;  %v392_v51 = vmul.f32 %v849_v49, %v849_v49  ;;  %v412_v4 = vmul.f32 112.0, %v408_v61 }
 0x131   : > { %v378_v52 = vpop.xlane.xlu1 %377 }
 0x132   : > { %v386_v53 = vmul.f32 0.0625, %v378_v52  ;;  %397 = vadd.xlane.f32.xlu2 %v392_v51 }
 0x134   : > { %v855_v54 = vsub.f32 %v355_v39, %v386_v53  ;;  %v410_v6 = vmul.f32 %v386_v53, %v386_v53 }
 0x136   : > { %v394_v55 = vmul.f32 %v855_v54, %v855_v54  ;;  %v414_v13 = vmul.f32 112.0, %v410_v6 }
 0x138   : > { %401 = vadd.xlane.f32.xlu1 %v394_v55 }
 0x19d   : > { %v396_v58 = vpop.xlane.xlu2 %395 }
 0x19e   : > { %v415_v60 = vsub.f32 %v396_v58, %v411_v57 }
 0x1a0   : > { %v419_v62 = vmul.f32 0.0625, %v415_v60 }
 0x1a2   : > { %v423_v63 = vmax.f32 %v419_v62, 0.0 }
 0x1a3   : > { %v400_v1 = vpop.xlane.xlu0 %399 }
 0x1a4   : > { %v427_v2 = vadd.f32 1e-05, %v423_v63  ;;  %v417_v3 = vsub.f32 %v400_v1, %v413_v0 }
 0x1a5   : > { %v398_v5 = vpop.xlane.xlu2 %397 }
 0x1a6   : > { %730 = vrsqrt.f32 %v427_v2  ;;  %v421_v7 = vmul.f32 0.0625, %v417_v3  ;;  %v416_v8 = vsub.f32 %v398_v5, %v412_v4  ;;  %vm437_vm1 = vweird.f32 %v427_v2 }
 0x1a8   : > { %v425_v9 = vmax.f32 %v421_v7, 0.0  ;;  %v420_v10 = vmul.f32 0.0625, %v416_v8 }
 0x1aa   : > { %v429_v11 = vadd.f32 1e-05, %v425_v9  ;;  %v424_v12 = vmax.f32 %v420_v10, 0.0 }
 0x1ab   : > { %v402_v14 = vpop.xlane.xlu1 %401 }
 0x1ac   : > { %v731_v15 = vpop.eup %730  ;;  %732 = vrsqrt.f32 %v429_v11  ;;  %v428_v16 = vadd.f32 1e-05, %v424_v12  ;;  %v418_v17 = vsub.f32 %v402_v14, %v414_v13  ;;  %vm457_vm5 = vweird.f32 %v429_v11 }
 0x1ad   : > { %v432_v18 = vmul.f32 %v731_v15, %v427_v2  ;;  %vm438_vm0 = vweird.f32 %v731_v15 }
 0x1ae   : > { %734 = vrsqrt.f32 %v428_v16  ;;  %v422_v19 = vmul.f32 0.0625, %v418_v17  ;;  %vm439_vm2 = vmor %vm437_vm1, %vm438_vm0  ;;  %vm447_vm7 = vweird.f32 %v428_v16 }
 0x1af   : > { %v433_v20 = vmul.f32 %v731_v15, %v432_v18 }
 0x1b0   : > { %v426_v21 = vmax.f32 %v422_v19, 0.0 }
 0x1b1   : > { %v434_v22 = vmul.f32 0.5, %v433_v20 }
 0x1b2   : > { %v733_v23 = vpop.eup %732  ;;  %v430_v24 = vadd.f32 1e-05, %v426_v21 }
 0x1b3   : > { %v435_v25 = vsub.f32 1.5, %v434_v22  ;;  %v452_v26 = vmul.f32 %v733_v23, %v429_v11  ;;  %vm458_vm3 = vweird.f32 %v733_v23 }
 0x1b4   : > { %v735_v27 = vpop.eup %734  ;;  %736 = vrsqrt.f32 %v430_v24  ;;  %vm459_vm6 = vmor %vm457_vm5, %vm458_vm3  ;;  %vm467_vm12 = vweird.f32 %v430_v24 }
 0x1b5   : > { %v436_v28 = vmul.f32 %v731_v15, %v435_v25  ;;  %v453_v29 = vmul.f32 %v733_v23, %v452_v26  ;;  %v442_v30 = vmul.f32 %v735_v27, %v428_v16  ;;  %vm448_vm4 = vweird.f32 %v735_v27 }
 0x1b6   : > { %vm449_vm8 = vmor %vm447_vm7, %vm448_vm4 }
 0x1b7   : > { %v454_v31 = vmul.f32 0.5, %v453_v29  ;;  %v443_v32 = vmul.f32 %v735_v27, %v442_v30  ;;  %v440_v33 = vsel %vm439_vm2, %v731_v15, %v436_v28 }
 0x1b8   : > { %v471_v40 = vmul.f32 %v440_v33, %v843_v42 }
 0x1b9   : > { %v455_v34 = vsub.f32 1.5, %v454_v31  ;;  %v444_v35 = vmul.f32 0.5, %v443_v32 }
 0x1ba   : > { %v737_v36 = vpop.eup %736  ;;  %v479_v48 = vmul.f32 0.2, %v471_v40  ;;  %vm475_vm9 = vcmp.ge.f32.partialorder %v471_v40, 0.0 }
 0x1bb   : > { %v456_v37 = vmul.f32 %v733_v23, %v455_v34  ;;  %v445_v38 = vsub.f32 1.5, %v444_v35  ;;  %v462_v39 = vmul.f32 %v737_v36, %v430_v24  ;;  %vm468_vm10 = vweird.f32 %v737_v36 }
 0x1bc   : > { %v483_v55 = vsel %vm475_vm9, %v471_v40, %v479_v48  ;;  %vm469_vm13 = vmor %vm467_vm12, %vm468_vm10 }
 0x1bd   : > { %v446_v41 = vmul.f32 %v735_v27, %v445_v38  ;;  %v463_v43 = vmul.f32 %v737_v36, %v462_v39  ;;  %v460_v44 = vsel %vm459_vm6, %v733_v23, %v456_v37 }
 0x1be   : > { %v473_v52 = vmul.f32 %v460_v44, %v847_v47 }
 0x1bf   : > { %v450_v45 = vsel %vm449_vm8, %v735_v27, %v446_v41  ;;  %v464_v46 = vmul.f32 0.5, %v463_v43 }
 0x1c0   : > { %v472_v50 = vmul.f32 %v450_v45, %v849_v49  ;;  %v481_v49 = vmul.f32 0.2, %v473_v52  ;;  %vm477_vm14 = vcmp.ge.f32.partialorder %v473_v52, 0.0 }
 0x1c1   : > { %v465_v51 = vsub.f32 1.5, %v464_v46 }
 0x1c2   : > { %vm476_vm11 = vcmp.ge.f32.partialorder %v472_v50, 0.0  ;;  %v480_v42 = vmul.f32 0.2, %v472_v50  ;;  %v485_v60 = vsel %vm477_vm14, %v473_v52, %v481_v49 }
 0x1c3   : > { %v466_v53 = vmul.f32 %v737_v36, %v465_v51 }
 0x1c4   : > { %v484_v56 = vsel %vm476_vm11, %v472_v50, %v480_v42 }
 0x1c5   : > { %v682_v57 = vpack.c.bf16 %v484_v56, %v483_v55  ;;  %v470_v58 = vsel %vm469_vm13, %v737_v36, %v466_v53 }
 0x1c6   : > { %v474_v59 = vmul.f32 %v470_v58, %v855_v54 }
 0x1c7   : > { %683 = vst [vmem:[%s166_s8] sm:$0xff] %v682_v57  }
 0x1c8   : > { %vm478_vm15 = vcmp.ge.f32.partialorder %v474_v59, 0.0  ;;  %v482_v47 = vmul.f32 0.2, %v474_v59 }
 0x1ca   : > { %v486_v61 = vsel %vm478_vm15, %v474_v59, %v482_v47 }
 0x1cb   : > { %v687_v62 = vpack.c.bf16 %v486_v61, %v485_v60 }
 0x1cd   : > { %689 = vst [vmem:[%s166_s8 + $0x8] sm:$0xff] %v687_v62  }
 0x1ce PF: > { %s12_s11 = sadd.s32 1, %s760_s11   ;;  %s879_s9 = smov %s756_s10 }
 0x1cf   : > { %p9_p5 = scmp.ge.s32.totalorder %s12_s11, 4   ;;  %s880_s10 = smov %s882_s12 }
 0x1d1   :  { %11 = sbr.rel (!%p9_p5) target bundleno = 2 (0x2), region = 63 }

// kernel: discriminator_forward.8
= control target key start
LH: loop header
LB: loop body
LE: loop exit
PB: predicated region body
PF: predicated region fallthrough
CT: control target
= control target key end

     0   :  { %s1331_s9 = smov 0   ;;  %s1333_s10 = smov 0   ;;  %s1559_s0 = inlined_call_operand.vmem [shape: bf16[2,512,128], index: 0, kind: input, shape index: {}]   ;;  %s1560_s1 = inlined_call_operand.vmem [shape: bf16[64,512], index: 1, kind: input, shape index: {}]   ;;  %s1561_s2 = inlined_call_operand.vmem [shape: bf16[2,64,128], index: 2, kind: output, shape index: {}]  }
   0x1   :  { %s1335_s11 = smov 0  }
   0x2 LB: > { %s24_s12 = sadd.s32 1, %s1310_s10  ;;  %p980_p0 = scmp.ge.s32.totalorder %s1314_s11, 1  ;;  %s1314_s11 = sphi %s1335_s11, %s12_s11   ;;  %s1310_s10 = sphi %s1333_s10, %s1563_s10   ;;  %s1306_s9 = sphi %s1331_s9, %s1562_s9  }
   0x3   : > { %p26_p1 = scmp.ge.s32.totalorder %s24_s12, 2  ;;  %p129_p2 = scmp.lt.s32.totalorder %s1314_s11, 3 }
   0x5   : > { %s1565_s12 = smov (%p26_p1, %s24_s12), 0  ;;  %p130_p3 = pnand %p980_p0, %p129_p2 }
   0x6   : > { %p154_p4 = scmp.lt.s32.totalorder (!%p130_p3), %s1306_s9, 1 }
   0x7   : > { %133 = sbr.rel (%p130_p3) target bundleno = 513 (0x201), region = 28 }
   0xc   : > { %s1567_s9 = smov (!%p154_p4, %s1306_s9), 1  ;;  %v987_v28 = vld [vmem:[%s1560_s1] sm:$0xf]  ;;  %v1183_v29 = vld [vmem:[%s1560_s1 + $0xc] sm:$0xf0] }
   0xd   : > { %s1179_s13 = sshll.u32 %s1567_s9, 8  ;;  %v1181_v30 = vld [vmem:[%s1560_s1 + $0x4] sm:$0xf]  ;;  %v989_v35 = vld [vmem:[%s1560_s1 + $0x10] sm:$0xf0]  ;;  %v988_v40 = vor.u32 %v1183_v29, %v987_v28  ;;  %s1180_s5 = sshll.u32 %s1567_s9, 5 }
   0xe   : > { %s1355_s16 = scalar_lea.vmem %s1559_s0, %s1179_s13  ;;  %v995_v36 = vld [vmem:[%s1560_s1 + $0x8] sm:$0xf]  ;;  %v1184_v37 = vld [vmem:[%s1560_s1 + $0x14] sm:$0xf0]  ;;  %v1182_v38 = vld [vmem:[%s1560_s1 + $0xc] sm:$0xf]  ;;  %v992_v41 = vor.u32 %v1181_v30, %v989_v35  ;;  %s1534_s8 = scalar_lea.vmem %s1561_s2, %s1180_s5 }
   0xf   : > { %v1204_v0 = vld [vmem:[%s1355_s16 + $0x38] sm:$0xff]  ;;  %v1203_v4 = vld [vmem:[%s1355_s16 + $0x30] sm:$0xff]  ;;  %v1202_v8 = vld [vmem:[%s1355_s16 + $0x28] sm:$0xff]  ;;  %v996_v42 = vor.u32 %v1184_v37, %v995_v36 }
  0x10   : > { %v1212_v1 = vld [vmem:[%s1355_s16 + $0x78] sm:$0xff]  ;;  %519 = vmatpush.bf16.msra.mxu0 %v1204_v0  ;;  %v1211_v5 = vld [vmem:[%s1355_s16 + $0x70] sm:$0xff]  ;;  %v1210_v9 = vld [vmem:[%s1355_s16 + $0x68] sm:$0xff] }
  0x11   : > { %v1220_v2 = vld [vmem:[%s1355_s16 + $0xb8] sm:$0xff]  ;;  %548 = vmatpush.bf16.msra.mxu1 %v1212_v1  ;;  %v1219_v6 = vld [vmem:[%s1355_s16 + $0xb0] sm:$0xff]  ;;  %v1218_v10 = vld [vmem:[%s1355_s16 + $0xa8] sm:$0xff] }
  0x12   : > { %v1228_v3 = vld [vmem:[%s1355_s16 + $0xf8] sm:$0xff]  ;;  %577 = vmatpush.bf16.msra.mxu2 %v1220_v2  ;;  %v1227_v7 = vld [vmem:[%s1355_s16 + $0xf0] sm:$0xff]  ;;  %v1226_v11 = vld [vmem:[%s1355_s16 + $0xe8] sm:$0xff] }
  0x13   : > { %606 = vmatpush.bf16.msra.mxu3 %v1228_v3  ;;  %v1201_v12 = vld [vmem:[%s1355_s16 + $0x20] sm:$0xff]  ;;  %v1200_v16 = vld [vmem:[%s1355_s16 + $0x18] sm:$0xff]  ;;  %v1199_v20 = vld [vmem:[%s1355_s16 + $0x10] sm:$0xff] }
  0x14   : > { %520 = vmatpush.bf16.msra.mxu0 %v1203_v4  ;;  %v1209_v13 = vld [vmem:[%s1355_s16 + $0x60] sm:$0xff]  ;;  %v1208_v17 = vld [vmem:[%s1355_s16 + $0x58] sm:$0xff]  ;;  %v1207_v21 = vld [vmem:[%s1355_s16 + $0x50] sm:$0xff] }
  0x15   : > { %549 = vmatpush.bf16.msra.mxu1 %v1211_v5  ;;  %v1217_v14 = vld [vmem:[%s1355_s16 + $0xa0] sm:$0xff]  ;;  %v1216_v18 = vld [vmem:[%s1355_s16 + $0x98] sm:$0xff]  ;;  %v1215_v22 = vld [vmem:[%s1355_s16 + $0x90] sm:$0xff] }
  0x16   : > { %578 = vmatpush.bf16.msra.mxu2 %v1219_v6  ;;  %v1225_v15 = vld [vmem:[%s1355_s16 + $0xe0] sm:$0xff]  ;;  %v1224_v19 = vld [vmem:[%s1355_s16 + $0xd8] sm:$0xff]  ;;  %v1223_v23 = vld [vmem:[%s1355_s16 + $0xd0] sm:$0xff] }
  0x17   : > { %607 = vmatpush.bf16.msra.mxu3 %v1227_v7  ;;  %v1198_v24 = vld [vmem:[%s1355_s16 + $0x8] sm:$0xff]  ;;  %v1197_v31 = vld [vmem:[%s1355_s16] sm:$0xff]  ;;  %v997_v39 = vld [vmem:[%s1560_s1 + $0x18] sm:$0xf0] }
  0x18   : > { %521 = vmatpush.bf16.msra.mxu0 %v1202_v8  ;;  %v1206_v25 = vld [vmem:[%s1355_s16 + $0x48] sm:$0xff]  ;;  %v1205_v32 = vld [vmem:[%s1355_s16 + $0x40] sm:$0xff]  ;;  %v1000_v43 = vor.u32 %v1182_v38, %v997_v39  ;;  %v1187_v45 = vld [vmem:[%s1560_s1 + $0x2c] sm:$0xf0] }
  0x19   : > { %550 = vmatpush.bf16.msra.mxu1 %v1210_v9  ;;  %v1214_v26 = vld [vmem:[%s1355_s16 + $0x88] sm:$0xff]  ;;  %v1213_v33 = vld [vmem:[%s1355_s16 + $0x80] sm:$0xff]  ;;  %v1005_v47 = vld [vmem:[%s1560_s1 + $0x30] sm:$0xf0] }
  0x1a   : > { %579 = vmatpush.bf16.msra.mxu2 %v1218_v10  ;;  %v1222_v27 = vld [vmem:[%s1355_s16 + $0xc8] sm:$0xff]  ;;  %v1221_v34 = vld [vmem:[%s1355_s16 + $0xc0] sm:$0xff]  ;;  %v1188_v49 = vld [vmem:[%s1560_s1 + $0x34] sm:$0xf0] }
  0x1b   : > { %608 = vmatpush.bf16.msra.mxu3 %v1226_v11  ;;  %v1003_v44 = vld [vmem:[%s1560_s1 + $0x20] sm:$0xf]  ;;  %v1185_v46 = vld [vmem:[%s1560_s1 + $0x24] sm:$0xf]  ;;  %v1011_v48 = vld [vmem:[%s1560_s1 + $0x28] sm:$0xf] }
  0x1c   : > { %522 = vmatpush.bf16.msra.mxu0 %v1201_v12  ;;  %v1186_v50 = vld [vmem:[%s1560_s1 + $0x2c] sm:$0xf]  ;;  %v1013_v51 = vld [vmem:[%s1560_s1 + $0x38] sm:$0xf0]  ;;  %v1004_v52 = vor.u32 %v1187_v45, %v1003_v44  ;;  %v1008_v53 = vor.u32 %v1185_v46, %v1005_v47  ;;  %v1012_v54 = vor.u32 %v1188_v49, %v1011_v48  ;;  %v1019_v56 = vld [vmem:[%s1560_s1 + $0x40] sm:$0xf] }
  0x1d   : > { %551 = vmatpush.bf16.msra.mxu1 %v1209_v13  ;;  %v1016_v55 = vor.u32 %v1186_v50, %v1013_v51  ;;  %v1191_v57 = vld [vmem:[%s1560_s1 + $0x4c] sm:$0xf0]  ;;  %v1189_v58 = vld [vmem:[%s1560_s1 + $0x44] sm:$0xf]  ;;  %v1021_v59 = vld [vmem:[%s1560_s1 + $0x50] sm:$0xf0] }
  0x1e   : > { %580 = vmatpush.bf16.msra.mxu2 %v1217_v14  ;;  %v1027_v60 = vld [vmem:[%s1560_s1 + $0x48] sm:$0xf]  ;;  %v1192_v61 = vld [vmem:[%s1560_s1 + $0x54] sm:$0xf0]  ;;  %v1190_v62 = vld [vmem:[%s1560_s1 + $0x4c] sm:$0xf]  ;;  %v1020_v0 = vor.u32 %v1191_v57, %v1019_v56  ;;  %v1024_v1 = vor.u32 %v1189_v58, %v1021_v59 }
  0x1f   : > { %609 = vmatpush.bf16.msra.mxu3 %v1225_v15  ;;  %v1029_v63 = vld [vmem:[%s1560_s1 + $0x58] sm:$0xf0]  ;;  %v1028_v2 = vor.u32 %v1192_v61, %v1027_v60  ;;  %v1035_v4 = vld [vmem:[%s1560_s1 + $0x60] sm:$0xf]  ;;  %v1195_v5 = vld [vmem:[%s1560_s1 + $0x6c] sm:$0xf0] }
  0x20   : > { %523 = vmatpush.bf16.msra.mxu0 %v1200_v16  ;;  %v1032_v3 = vor.u32 %v1190_v62, %v1029_v63  ;;  %v1193_v6 = vld [vmem:[%s1560_s1 + $0x64] sm:$0xf]  ;;  %v1037_v7 = vld [vmem:[%s1560_s1 + $0x70] sm:$0xf0]  ;;  %v1043_v8 = vld [vmem:[%s1560_s1 + $0x68] sm:$0xf]  ;;  %v1036_v12 = vor.u32 %v1195_v5, %v1035_v4 }
  0x21   : > { %552 = vmatpush.bf16.msra.mxu1 %v1208_v17  ;;  %v1196_v9 = vld [vmem:[%s1560_s1 + $0x74] sm:$0xf0]  ;;  %v1194_v10 = vld [vmem:[%s1560_s1 + $0x6c] sm:$0xf]  ;;  %v1045_v11 = vld [vmem:[%s1560_s1 + $0x78] sm:$0xf0]  ;;  %v1040_v13 = vor.u32 %v1193_v6, %v1037_v7 }
  0x22   : > { %581 = vmatpush.bf16.msra.mxu2 %v1216_v18  ;;  %v1044_v14 = vor.u32 %v1196_v9, %v1043_v8  ;;  %v1048_v15 = vor.u32 %v1194_v10, %v1045_v11 }
  0x23   : > { %610 = vmatpush.bf16.msra.mxu3 %v1224_v19 }
  0x24   : > { %524 = vmatpush.bf16.msra.mxu0 %v1199_v20 }
  0x25   : > { %553 = vmatpush.bf16.msra.mxu1 %v1207_v21 }
  0x26   : > { %582 = vmatpush.bf16.msra.mxu2 %v1215_v22 }
  0x27   : > { %611 = vmatpush.bf16.msra.mxu3 %v1223_v23 }
  0x28   : > { %525 = vmatpush.bf16.msra.mxu0 %v1198_v24 }
  0x29   : > { %554 = vmatpush.bf16.msra.mxu1 %v1206_v25 }
  0x2a   : > { %583 = vmatpush.bf16.msra.mxu2 %v1214_v26 }
  0x2b   : > { %612 = vmatpush.bf16.msra.mxu3 %v1222_v27 }
  0x2c   : > { %526 = vmatpush.bf16.msra.mxu0 %v1197_v31 }
  0x2d   : > { %555 = vmatpush.bf16.msra.mxu1 %v1205_v32 }
  0x2e   : > { %584 = vmatpush.bf16.msra.mxu2 %v1213_v33 }
  0x2f   : > { %613 = vmatpush.bf16.msra.mxu3 %v1221_v34  ;;  %527 = vmatmul.bf16.vlgmr.msra.gmra.mxu0 %v988_v40 }
  0x30   : > { %556 = vmatmul.bf16.vlgmr.msra.gmra.mxu1 %v992_v41 }
  0x31   : > { %585 = vmatmul.bf16.vlgmr.msra.gmra.mxu2 %v996_v42 }
  0x32   : > { %614 = vmatmul.bf16.vlgmr.msra.gmra.mxu3 %v1000_v43 }
  0x3f   : > { %532 = vmatmul.bf16.gmra.mxu0 %v1004_v52 }
  0x40   : > { %561 = vmatmul.bf16.gmra.mxu1 %v1008_v53 }
  0x41   : > { %590 = vmatmul.bf16.gmra.mxu2 %v1012_v54 }
  0x42   : > { %619 = vmatmul.bf16.gmra.mxu3 %v1016_v55 }
  0x4f   : > { %537 = vmatmul.bf16.gmra.mxu0 %v1020_v0 }
  0x50   : > { %566 = vmatmul.bf16.gmra.mxu1 %v1024_v1 }
  0x51   : > { %595 = vmatmul.bf16.gmra.mxu2 %v1028_v2 }
  0x52   : > { %624 = vmatmul.bf16.gmra.mxu3 %v1032_v3 }
  0x5f   : > { %542 = vmatmul.bf16.gmra.mxu0 %v1036_v12 }
  0x60   : > { %571 = vmatmul.bf16.gmra.mxu1 %v1040_v13 }
  0x61   : > { %600 = vmatmul.bf16.gmra.mxu2 %v1044_v14 }
  0x62   : > { %629 = vmatmul.bf16.gmra.mxu3 %v1048_v15 }
  0xac   : > { %v528_v16 = vpop.f32.mrf.mxu0 }
  0xad   : > { %v557_v17 = vpop.f32.mrf.mxu1 }
  0xae   : > { %v558_v18 = vadd.f32 %v557_v17, %v528_v16 }
  0xb4   : > { %v586_v19 = vpop.f32.mrf.mxu2  ;;  %v530_v22 = vpop.f32.mrf.mxu0 }
  0xb5   : > { %v615_v20 = vpop.f32.mrf.mxu3  ;;  %v587_v21 = vadd.f32 %v586_v19, %v558_v18  ;;  %v559_v23 = vpop.f32.mrf.mxu1 }
  0xb6   : > { %v560_v25 = vadd.f32 %v559_v23, %v530_v22 }
  0xb7   : > { %v616_v24 = vadd.f32 %v615_v20, %v587_v21 }
  0xb9   : > { %657 = vadd.xlane.f32.xlu0 %v616_v24 }
  0xbc   : > { %v588_v26 = vpop.f32.mrf.mxu2  ;;  %v533_v29 = vpop.f32.mrf.mxu0 }
  0xbd   : > { %v617_v27 = vpop.f32.mrf.mxu3  ;;  %v589_v28 = vadd.f32 %v588_v26, %v560_v25  ;;  %v562_v30 = vpop.f32.mrf.mxu1 }
  0xbe   : > { %v563_v32 = vadd.f32 %v562_v30, %v533_v29 }
  0xbf   : > { %v618_v31 = vadd.f32 %v617_v27, %v589_v28 }
  0xc1   : > { %659 = vadd.xlane.f32.xlu0 %v618_v31 }
  0xc4   : > { %v591_v33 = vpop.f32.mrf.mxu2  ;;  %v535_v36 = vpop.f32.mrf.mxu0 }
  0xc5   : > { %v620_v34 = vpop.f32.mrf.mxu3  ;;  %v592_v35 = vadd.f32 %v591_v33, %v563_v32  ;;  %v564_v37 = vpop.f32.mrf.mxu1 }
  0xc6   : > { %v565_v39 = vadd.f32 %v564_v37, %v535_v36 }
  0xc7   : > { %v621_v38 = vadd.f32 %v620_v34, %v592_v35 }
  0xc9   : > { %661 = vadd.xlane.f32.xlu1 %v621_v38 }
  0xcc   : > { %v593_v40 = vpop.f32.mrf.mxu2  ;;  %v538_v43 = vpop.f32.mrf.mxu0 }
  0xcd   : > { %v622_v41 = vpop.f32.mrf.mxu3  ;;  %v594_v42 = vadd.f32 %v593_v40, %v565_v39  ;;  %v567_v44 = vpop.f32.mrf.mxu1 }
  0xce   : > { %v568_v46 = vadd.f32 %v567_v44, %v538_v43 }
  0xcf   : > { %v623_v45 = vadd.f32 %v622_v41, %v594_v42 }
  0xd1   : > { %663 = vadd.xlane.f32.xlu1 %v623_v45 }
  0xd4   : > { %v596_v47 = vpop.f32.mrf.mxu2  ;;  %v540_v50 = vpop.f32.mrf.mxu0 }
  0xd5   : > { %v625_v48 = vpop.f32.mrf.mxu3  ;;  %v597_v49 = vadd.f32 %v596_v47, %v568_v46  ;;  %v569_v51 = vpop.f32.mrf.mxu1 }
  0xd6   : > { %v570_v53 = vadd.f32 %v569_v51, %v540_v50 }
  0xd7   : > { %v626_v52 = vadd.f32 %v625_v48, %v597_v49 }
  0xd9   : > { %665 = vadd.xlane.f32.xlu2 %v626_v52 }
  0xdc   : > { %v598_v54 = vpop.f32.mrf.mxu2  ;;  %v543_v57 = vpop.f32.mrf.mxu0 }
  0xdd   : > { %v627_v55 = vpop.f32.mrf.mxu3  ;;  %v599_v56 = vadd.f32 %v598_v54, %v570_v53  ;;  %v572_v58 = vpop.f32.mrf.mxu1 }
  0xde   : > { %v573_v60 = vadd.f32 %v572_v58, %v543_v57 }
  0xdf   : > { %v628_v59 = vadd.f32 %v627_v55, %v599_v56 }
  0xe1   : > { %667 = vadd.xlane.f32.xlu2 %v628_v59 }
  0xe4   : > { %v601_v61 = vpop.f32.mrf.mxu2  ;;  %v545_v1 = vpop.f32.mrf.mxu0 }
  0xe5   : > { %v630_v62 = vpop.f32.mrf.mxu3  ;;  %v602_v63 = vadd.f32 %v601_v61, %v573_v60  ;;  %v574_v2 = vpop.f32.mrf.mxu1 }
  0xe6   : > { %v575_v3 = vadd.f32 %v574_v2, %v545_v1 }
  0xe7   : > { %v631_v0 = vadd.f32 %v630_v62, %v602_v63 }
  0xe9   : > { %669 = vadd.xlane.f32.xlu0 %v631_v0 }
  0xec   : > { %v603_v4 = vpop.f32.mrf.mxu2 }
  0xed   : > { %v604_v5 = vadd.f32 %v603_v4, %v575_v3  ;;  %v632_v6 = vpop.f32.mrf.mxu3 }
  0xef   : > { %v633_v7 = vadd.f32 %v632_v6, %v604_v5 }
  0xf1   : > { %671 = vadd.xlane.f32.xlu1 %v633_v7 }
 0x12c   : > { %v658_v8 = vpop.xlane.xlu0 %657 }
 0x12d   : > { %v681_v9 = vmul.f32 0.11111111, %v658_v8 }
 0x12f   : > { %v1485_v10 = vsub.f32 %v616_v24, %v681_v9  ;;  %v729_v40 = vmul.f32 %v681_v9, %v681_v9 }
 0x131   : > { %v697_v11 = vmul.f32 %v1485_v10, %v1485_v10  ;;  %v737_v41 = vmul.f32 119.0, %v729_v40 }
 0x133   : > { %705 = vadd.xlane.f32.xlu2 %v697_v11 }
 0x134   : > { %v660_v12 = vpop.xlane.xlu0 %659 }
 0x135   : > { %v682_v13 = vmul.f32 0.11111111, %v660_v12 }
 0x137   : > { %v1489_v14 = vsub.f32 %v618_v31, %v682_v13  ;;  %v730_v44 = vmul.f32 %v682_v13, %v682_v13 }
 0x139   : > { %v698_v15 = vmul.f32 %v1489_v14, %v1489_v14  ;;  %v738_v48 = vmul.f32 119.0, %v730_v44 }
 0x13b   : > { %707 = vadd.xlane.f32.xlu0 %v698_v15 }
 0x13c   : > { %v662_v16 = vpop.xlane.xlu1 %661 }
 0x13d   : > { %v683_v17 = vmul.f32 0.11111111, %v662_v16 }
 0x13f   : > { %v1493_v18 = vsub.f32 %v621_v38, %v683_v17  ;;  %v731_v51 = vmul.f32 %v683_v17, %v683_v17 }
 0x141   : > { %v699_v19 = vmul.f32 %v1493_v18, %v1493_v18  ;;  %v739_v56 = vmul.f32 119.0, %v731_v51 }
 0x143   : > { %709 = vadd.xlane.f32.xlu1 %v699_v19 }
 0x144   : > { %v664_v20 = vpop.xlane.xlu1 %663 }
 0x145   : > { %v684_v21 = vmul.f32 0.11111111, %v664_v20 }
 0x147   : > { %v1497_v22 = vsub.f32 %v623_v45, %v684_v21  ;;  %v732_v61 = vmul.f32 %v684_v21, %v684_v21 }
 0x149   : > { %v700_v23 = vmul.f32 %v1497_v22, %v1497_v22  ;;  %v740_v4 = vmul.f32 119.0, %v732_v61 }
 0x14b   : > { %711 = vadd.xlane.f32.xlu2 %v700_v23 }
 0x14c   : > { %v666_v24 = vpop.xlane.xlu2 %665 }
 0x14d   : > { %v685_v25 = vmul.f32 0.11111111, %v666_v24 }
 0x14f   : > { %v1501_v26 = vsub.f32 %v626_v52, %v685_v25  ;;  %v733_v11 = vmul.f32 %v685_v25, %v685_v25 }
 0x151   : > { %v701_v27 = vmul.f32 %v1501_v26, %v1501_v26  ;;  %v741_v23 = vmul.f32 119.0, %v733_v11 }
 0x153   : > { %713 = vadd.xlane.f32.xlu0 %v701_v27 }
 0x154   : > { %v668_v28 = vpop.xlane.xlu2 %667 }
 0x155   : > { %v1505_v29 = vmul.f32 0.11111111, %v668_v28 }
 0x157   : > { %v1508_v30 = vsub.f32 %v628_v59, %v1505_v29 }
 0x159   : > { %v702_v31 = vmul.f32 %v1508_v30, %v1508_v30 }
 0x15b   : > { %715 = vadd.xlane.f32.xlu1 %v702_v31 }
 0x15c   : > { %v670_v32 = vpop.xlane.xlu0 %669 }
 0x15d   : > { %v1512_v33 = vmul.f32 0.11111111, %v670_v32 }
 0x15f   : > { %v1515_v34 = vsub.f32 %v631_v0, %v1512_v33 }
 0x161   : > { %v703_v35 = vmul.f32 %v1515_v34, %v1515_v34 }
 0x163   : > { %717 = vadd.xlane.f32.xlu2 %v703_v35  ;;  %v734_v35 = vmul.f32 %v1505_v29, %v1505_v29 }
 0x164   : > { %v672_v36 = vpop.xlane.xlu1 %671 }
 0x165   : > { %v1519_v37 = vmul.f32 0.11111111, %v672_v36 }
 0x167   : > { %v1522_v38 = vsub.f32 %v633_v7, %v1519_v37 }
 0x169   : > { %v704_v39 = vmul.f32 %v1522_v38, %v1522_v38 }
 0x16b   : > { %719 = vadd.xlane.f32.xlu0 %v704_v39 }
 0x1a6   : > { %v706_v42 = vpop.xlane.xlu2 %705 }
 0x1a7   : > { %v745_v43 = vsub.f32 %v706_v42, %v737_v41 }
 0x1a9   : > { %v753_v45 = vmul.f32 0.11111111, %v745_v43 }
 0x1ab   : > { %v761_v46 = vmax.f32 %v753_v45, 0.0 }
 0x1ad   : > { %v769_v47 = vadd.f32 1e-05, %v761_v46 }
 0x1ae   : > { %v708_v49 = vpop.xlane.xlu0 %707 }
 0x1af   : > { %1276 = vrsqrt.f32 %v769_v47  ;;  %v746_v50 = vsub.f32 %v708_v49, %v738_v48  ;;  %vm783_vm1 = vweird.f32 %v769_v47 }
 0x1b1   : > { %v754_v52 = vmul.f32 0.11111111, %v746_v50 }
 0x1b3   : > { %v762_v53 = vmax.f32 %v754_v52, 0.0 }
 0x1b5   : > { %v1277_v54 = vpop.eup %1276  ;;  %v770_v55 = vadd.f32 1e-05, %v762_v53  ;;  %v735_v53 = vmul.f32 %v1512_v33, %v1512_v33 }
 0x1b6   : > { %v778_v57 = vmul.f32 %v1277_v54, %v769_v47  ;;  %v710_v58 = vpop.xlane.xlu1 %709  ;;  %vm784_vm0 = vweird.f32 %v1277_v54  ;;  %v742_v47 = vmul.f32 119.0, %v734_v35 }
 0x1b7   : > { %1278 = vrsqrt.f32 %v770_v55  ;;  %v747_v59 = vsub.f32 %v710_v58, %v739_v56  ;;  %vm785_vm2 = vmor %vm783_vm1, %vm784_vm0  ;;  %vm793_vm4 = vweird.f32 %v770_v55 }
 0x1b8   : > { %v779_v60 = vmul.f32 %v1277_v54, %v778_v57 }
 0x1b9   : > { %v755_v62 = vmul.f32 0.11111111, %v747_v59 }
 0x1ba   : > { %v780_v63 = vmul.f32 0.5, %v779_v60 }
 0x1bb   : > { %v763_v0 = vmax.f32 %v755_v62, 0.0  ;;  %v743_v62 = vmul.f32 119.0, %v735_v53 }
 0x1bc   : > { %v781_v1 = vsub.f32 1.5, %v780_v63 }
 0x1bd   : > { %v1279_v2 = vpop.eup %1278  ;;  %v771_v3 = vadd.f32 1e-05, %v763_v0 }
 0x1be   : > { %v782_v5 = vmul.f32 %v1277_v54, %v781_v1  ;;  %v788_v6 = vmul.f32 %v1279_v2, %v770_v55  ;;  %v712_v7 = vpop.xlane.xlu2 %711  ;;  %vm794_vm3 = vweird.f32 %v1279_v2 }
 0x1bf   : > { %1280 = vrsqrt.f32 %v771_v3  ;;  %v748_v8 = vsub.f32 %v712_v7, %v740_v4  ;;  %vm795_vm5 = vmor %vm793_vm4, %vm794_vm3  ;;  %vm803_vm9 = vweird.f32 %v771_v3  ;;  %v736_v4 = vmul.f32 %v1519_v37, %v1519_v37 }
 0x1c0   : > { %v789_v9 = vmul.f32 %v1279_v2, %v788_v6  ;;  %v786_v13 = vsel %vm785_vm2, %v1277_v54, %v782_v5 }
 0x1c1   : > { %v756_v12 = vmul.f32 0.11111111, %v748_v8  ;;  %v857_v20 = vmul.f32 %v786_v13, %v1485_v10 }
 0x1c2   : > { %v790_v15 = vmul.f32 0.5, %v789_v9 }
 0x1c3   : > { %v764_v16 = vmax.f32 %v756_v12, 0.0  ;;  %v873_v36 = vmul.f32 0.2, %v857_v20  ;;  %vm865_vm6 = vcmp.ge.f32.partialorder %v857_v20, 0.0 }
 0x1c4   : > { %v791_v17 = vsub.f32 1.5, %v790_v15 }
 0x1c5   : > { %v1281_v19 = vpop.eup %1280  ;;  %v772_v21 = vadd.f32 1e-05, %v764_v16  ;;  %v881_v45 = vsel %vm865_vm6, %v857_v20, %v873_v36 }
 0x1c6   : > { %v792_v24 = vmul.f32 %v1279_v2, %v791_v17  ;;  %v798_v27 = vmul.f32 %v1281_v19, %v771_v3  ;;  %v714_v28 = vpop.xlane.xlu0 %713  ;;  %vm804_vm8 = vweird.f32 %v1281_v19  ;;  %v744_v17 = vmul.f32 119.0, %v736_v4 }
 0x1c7   : > { %1282 = vrsqrt.f32 %v772_v21  ;;  %v749_v25 = vsub.f32 %v714_v28, %v741_v23  ;;  %vm805_vm10 = vmor %vm803_vm9, %vm804_vm8  ;;  %vm813_vm12 = vweird.f32 %v772_v21 }
 0x1c8   : > { %v796_v31 = vsel %vm795_vm5, %v1279_v2, %v792_v24  ;;  %v799_v32 = vmul.f32 %v1281_v19, %v798_v27 }
 0x1c9   : > { %v858_v39 = vmul.f32 %v796_v31, %v1489_v14  ;;  %v757_v40 = vmul.f32 0.11111111, %v749_v25 }
 0x1ca   : > { %v800_v10 = vmul.f32 0.5, %v799_v32 }
 0x1cb   : > { %vm866_vm7 = vcmp.ge.f32.partialorder %v858_v39, 0.0  ;;  %v874_v41 = vmul.f32 0.2, %v858_v39  ;;  %v765_v42 = vmax.f32 %v757_v40, 0.0 }
 0x1cc   : > { %v801_v43 = vsub.f32 1.5, %v800_v10 }
 0x1cd   : > { %v1283_v44 = vpop.eup %1282  ;;  %v882_v29 = vsel %vm866_vm7, %v858_v39, %v874_v41  ;;  %v773_v46 = vadd.f32 1e-05, %v765_v42 }
 0x1ce   : > { %v1232_v14 = vpack.c.bf16 %v882_v29, %v881_v45  ;;  %v802_v48 = vmul.f32 %v1281_v19, %v801_v43  ;;  %v808_v49 = vmul.f32 %v1283_v44, %v772_v21  ;;  %v716_v50 = vpop.xlane.xlu1 %715  ;;  %vm814_vm11 = vweird.f32 %v1283_v44 }
 0x1cf   : > { %1284 = vrsqrt.f32 %v773_v46  ;;  %v750_v51 = vsub.f32 %v716_v50, %v742_v47  ;;  %vm815_vm13 = vmor %vm813_vm12, %vm814_vm11  ;;  %vm823_vm1 = vweird.f32 %v773_v46 }
 0x1d0   : > { %1233 = vst [vmem:[%s1534_s8] sm:$0xff] %v1232_v14   ;;  %v809_v52 = vmul.f32 %v1283_v44, %v808_v49  ;;  %v806_v55 = vsel %vm805_vm10, %v1281_v19, %v802_v48 }
 0x1d1   : > { %v758_v54 = vmul.f32 0.11111111, %v750_v51  ;;  %v859_v60 = vmul.f32 %v806_v55, %v1493_v18 }
 0x1d2   : > { %v810_v56 = vmul.f32 0.5, %v809_v52 }
 0x1d3   : > { %v766_v57 = vmax.f32 %v758_v54, 0.0  ;;  %v875_v5 = vmul.f32 0.2, %v859_v60  ;;  %vm867_vm14 = vcmp.ge.f32.partialorder %v859_v60, 0.0 }
 0x1d4   : > { %v811_v58 = vsub.f32 1.5, %v810_v56 }
 0x1d5   : > { %v1285_v59 = vpop.eup %1284  ;;  %v774_v61 = vadd.f32 1e-05, %v766_v57  ;;  %v883_v13 = vsel %vm867_vm14, %v859_v60, %v875_v5 }
 0x1d6   : > { %v812_v63 = vmul.f32 %v1283_v44, %v811_v58  ;;  %v818_v0 = vmul.f32 %v1285_v59, %v773_v46  ;;  %v718_v1 = vpop.xlane.xlu2 %717  ;;  %vm824_vm0 = vweird.f32 %v1285_v59 }
 0x1d7   : > { %1286 = vrsqrt.f32 %v774_v61  ;;  %v751_v2 = vsub.f32 %v718_v1, %v743_v62  ;;  %vm825_vm2 = vmor %vm823_vm1, %vm824_vm0  ;;  %vm833_vm4 = vweird.f32 %v774_v61 }
 0x1d8   : > { %v816_v33 = vsel %vm815_vm13, %v1283_v44, %v812_v63  ;;  %v819_v3 = vmul.f32 %v1285_v59, %v818_v0 }
 0x1d9   : > { %v860_v6 = vmul.f32 %v816_v33, %v1497_v22  ;;  %v759_v7 = vmul.f32 0.11111111, %v751_v2 }
 0x1da   : > { %v820_v18 = vmul.f32 0.5, %v819_v3 }
 0x1db   : > { %vm868_vm15 = vcmp.ge.f32.partialorder %v860_v6, 0.0  ;;  %v876_v8 = vmul.f32 0.2, %v860_v6  ;;  %v767_v9 = vmax.f32 %v759_v7, 0.0 }
 0x1dc   : > { %v821_v11 = vsub.f32 1.5, %v820_v18 }
 0x1dd   : > { %v1287_v12 = vpop.eup %1286  ;;  %v884_v15 = vsel %vm868_vm15, %v860_v6, %v876_v8  ;;  %v775_v16 = vadd.f32 1e-05, %v767_v9 }
 0x1de   : > { %v1237_v19 = vpack.c.bf16 %v884_v15, %v883_v13  ;;  %v822_v20 = vmul.f32 %v1285_v59, %v821_v11  ;;  %v828_v37 = vmul.f32 %v1287_v12, %v774_v61  ;;  %v720_v21 = vpop.xlane.xlu0 %719  ;;  %vm834_vm3 = vweird.f32 %v1287_v12 }
 0x1df   : > { %1288 = vrsqrt.f32 %v775_v16  ;;  %v752_v22 = vsub.f32 %v720_v21, %v744_v17  ;;  %vm835_vm5 = vmor %vm833_vm4, %vm834_vm3  ;;  %vm843_vm9 = vweird.f32 %v775_v16 }
 0x1e0   : > { %1249 = vst [vmem:[%s1534_s8 + $0x8] sm:$0xff] %v1237_v19   ;;  %v829_v23 = vmul.f32 %v1287_v12, %v828_v37  ;;  %v826_v27 = vsel %vm825_vm2, %v1285_v59, %v822_v20 }
 0x1e1   : > { %v760_v24 = vmul.f32 0.11111111, %v752_v22  ;;  %v861_v35 = vmul.f32 %v826_v27, %v1501_v26 }
 0x1e2   : > { %v830_v28 = vmul.f32 0.5, %v829_v23 }
 0x1e3   : > { %v768_v25 = vmax.f32 %v760_v24, 0.0  ;;  %v877_v42 = vmul.f32 0.2, %v861_v35  ;;  %vm869_vm6 = vcmp.ge.f32.partialorder %v861_v35, 0.0 }
 0x1e4   : > { %v831_v31 = vsub.f32 1.5, %v830_v28 }
 0x1e5   : > { %v1289_v32 = vpop.eup %1288  ;;  %v776_v36 = vadd.f32 1e-05, %v768_v25  ;;  %v885_v47 = vsel %vm869_vm6, %v861_v35, %v877_v42 }
 0x1e6   : > { %v832_v39 = vmul.f32 %v1287_v12, %v831_v31  ;;  %v838_v40 = vmul.f32 %v1289_v32, %v775_v16  ;;  %vm844_vm8 = vweird.f32 %v1289_v32 }
 0x1e7   : > { %1290 = vrsqrt.f32 %v776_v36  ;;  %vm845_vm10 = vmor %vm843_vm9, %vm844_vm8  ;;  %vm853_vm12 = vweird.f32 %v776_v36 }
 0x1e8   : > { %v836_v10 = vsel %vm835_vm5, %v1287_v12, %v832_v39  ;;  %v839_v41 = vmul.f32 %v1289_v32, %v838_v40 }
 0x1e9   : > { %v862_v43 = vmul.f32 %v836_v10, %v1508_v30 }
 0x1ea   : > { %v840_v44 = vmul.f32 0.5, %v839_v41 }
 0x1eb   : > { %vm870_vm7 = vcmp.ge.f32.partialorder %v862_v43, 0.0  ;;  %v878_v45 = vmul.f32 0.2, %v862_v43 }
 0x1ec   : > { %v841_v29 = vsub.f32 1.5, %v840_v44 }
 0x1ed   : > { %v1291_v46 = vpop.eup %1290  ;;  %v886_v26 = vsel %vm870_vm7, %v862_v43, %v878_v45 }
 0x1ee   : > { %v1242_v14 = vpack.c.bf16 %v886_v26, %v885_v47  ;;  %v842_v48 = vmul.f32 %v1289_v32, %v841_v29  ;;  %v848_v49 = vmul.f32 %v1291_v46, %v776_v36  ;;  %vm854_vm11 = vweird.f32 %v1291_v46 }
 0x1ef   : > { %vm855_vm13 = vmor %vm853_vm12, %vm854_vm11 }
 0x1f0   : > { %1250 = vst [vmem:[%s1534_s8 + $0x10] sm:$0xff] %v1242_v14   ;;  %v849_v50 = vmul.f32 %v1291_v46, %v848_v49  ;;  %v846_v51 = vsel %vm845_vm10, %v1289_v32, %v842_v48 }
 0x1f1   : > { %v863_v53 = vmul.f32 %v846_v51, %v1515_v34 }
 0x1f2   : > { %v850_v52 = vmul.f32 0.5, %v849_v50 }
 0x1f3   : > { %v879_v56 = vmul.f32 0.2, %v863_v53  ;;  %vm871_vm14 = vcmp.ge.f32.partialorder %v863_v53, 0.0 }
 0x1f4   : > { %v851_v30 = vsub.f32 1.5, %v850_v52 }
 0x1f5   : > { %v887_v59 = vsel %vm871_vm14, %v863_v53, %v879_v56 }
 0x1f6   : > { %v852_v54 = vmul.f32 %v1291_v46, %v851_v30 }
 0x1f8   : > { %v856_v55 = vsel %vm855_vm13, %v1291_v46, %v852_v54 }
 0x1f9   : > { %v864_v57 = vmul.f32 %v856_v55, %v1522_v38 }
 0x1fb   : > { %vm872_vm15 = vcmp.ge.f32.partialorder %v864_v57, 0.0  ;;  %v880_v58 = vmul.f32 0.2, %v864_v57 }
 0x1fd   : > { %v888_v60 = vsel %vm872_vm15, %v864_v57, %v880_v58 }
 0x1fe   : > { %v1247_v61 = vpack.c.bf16 %v888_v60, %v887_v59 }
 0x200   : > { %1251 = vst [vmem:[%s1534_s8 + $0x18] sm:$0xff] %v1247_v61  }
 0x201 PF: > { %s12_s11 = sadd.s32 1, %s1314_s11   ;;  %s1562_s9 = smov %s1310_s10 }
 0x202   : > { %p9_p5 = scmp.ge.s32.totalorder %s12_s11, 4   ;;  %s1563_s10 = smov %s1565_s12 }
 0x204   :  { %11 = sbr.rel (!%p9_p5) target bundleno = 2 (0x2), region = 63 }

// kernel: discriminator_forward.9
= control target key start
LH: loop header
LB: loop body
LE: loop exit
PB: predicated region body
PF: predicated region fallthrough
CT: control target
= control target key end

     0   :  { %s2769_s9 = smov 0   ;;  %s2771_s10 = smov 0   ;;  %s3611_s0 = inlined_call_operand.vmem [shape: bf16[2,1024,128], index: 0, kind: input, shape index: {}]   ;;  %s3612_s1 = inlined_call_operand.vmem [shape: bf16[1024,1], index: 1, kind: input, shape index: {}]   ;;  %s3613_s2 = inlined_call_operand.vmem [shape: f32[2,1,1], index: 2, kind: output, shape index: {}]  }
   0x1   :  { %s2773_s11 = smov 0  }
   0x2 LB: > { %s24_s12 = sadd.s32 1, %s2747_s10  ;;  %p2056_p0 = scmp.ge.s32.totalorder %s2751_s11, 1  ;;  %s2751_s11 = sphi %s2773_s11, %s12_s11   ;;  %s2747_s10 = sphi %s2771_s10, %s3615_s10   ;;  %s2743_s9 = sphi %s2769_s9, %s3614_s9  }
   0x3   : > { %p26_p1 = scmp.ge.s32.totalorder %s24_s12, 2  ;;  %p129_p2 = scmp.lt.s32.totalorder %s2751_s11, 3 }
   0x5   : > { %s3617_s12 = smov (%p26_p1, %s24_s12), 0  ;;  %p130_p3 = pnand %p2056_p0, %p129_p2 }
   0x6   : > { %p152_p4 = scmp.lt.s32.totalorder (!%p130_p3), %s2743_s9, 1 }
   0x7   : > { %133 = sbr.rel (%p130_p3) target bundleno = 532 (0x214), region = 28 }
   0xc   : > { %s3619_s9 = smov (!%p152_p4, %s2743_s9), 1  ;;  %vm167_vm0 = vcmask 7168   ;;  %v2753_v49 = vmov 0.0   ;;  %vm1989_vm3 = vcmask 0  }
   0xd   : > { %s2061_s13 = sshll.u32 %s3619_s9, 9  ;;  %168 = vst.msk [vmem:[#allocation2] sm:$0xff] %vm167_vm0, %v2753_v49 }
   0xe   : > { %s2793_s16 = scalar_lea.vmem %s3611_s0, %s2061_s13  ;;  %169 = vst.msk [vmem:[#allocation2 + $0x8] sm:$0xff] %vm167_vm0, %v2753_v49 }
   0xf   : > { %v2063_v0 = vld [vmem:[%s2793_s16] sm:$0xff]   ;;  %v2574_v1 = vld [vmem:[%s2793_s16 + $0x8] sm:$0xff]   ;;  %v2575_v2 = vld [vmem:[%s2793_s16 + $0x10] sm:$0xff]   ;;  %170 = vst.msk [vmem:[#allocation2 + $0x10] sm:$0xff] %vm167_vm0, %v2753_v49 }
  0x10   : > { %v2064_v3 = vunpack.c.l.bf16 %v2063_v0  ;;  %v2068_v4 = vunpack.c.l.bf16 %v2574_v1  ;;  %v2072_v5 = vunpack.c.l.bf16 %v2575_v2  ;;  %v2065_v6 = vunpack.c.h.bf16 %v2063_v0  ;;  %v2576_v9 = vld [vmem:[%s2793_s16 + $0x18] sm:$0xff]   ;;  %v2577_v10 = vld [vmem:[%s2793_s16 + $0x20] sm:$0xff]   ;;  %v2578_v14 = vld [vmem:[%s2793_s16 + $0x28] sm:$0xff]   ;;  %171 = vst.msk [vmem:[#allocation2 + $0x18] sm:$0xff] %vm167_vm0, %v2753_v49 }
  0x11   : > { %v2069_v7 = vunpack.c.h.bf16 %v2574_v1  ;;  %v2073_v8 = vunpack.c.h.bf16 %v2575_v2  ;;  %v2076_v11 = vunpack.c.l.bf16 %v2576_v9  ;;  %v2077_v12 = vunpack.c.h.bf16 %v2576_v9  ;;  %v2579_v18 = vld [vmem:[%s2793_s16 + $0x30] sm:$0xff]   ;;  %v2580_v19 = vld [vmem:[%s2793_s16 + $0x38] sm:$0xff]   ;;  %v2581_v23 = vld [vmem:[%s2793_s16 + $0x40] sm:$0xff]   ;;  %172 = vst.msk [vmem:[#allocation2 + $0x20] sm:$0xff] %vm167_vm0, %v2753_v49 }
  0x12   : > { %680 = vadd.xlane.f32.xlu0 %v2064_v3  ;;  %684 = vadd.xlane.f32.xlu1 %v2068_v4  ;;  %v2080_v13 = vunpack.c.l.bf16 %v2577_v10  ;;  %v2081_v15 = vunpack.c.h.bf16 %v2577_v10  ;;  %v2084_v16 = vunpack.c.l.bf16 %v2578_v14  ;;  %v2085_v17 = vunpack.c.h.bf16 %v2578_v14  ;;  %v2582_v27 = vld [vmem:[%s2793_s16 + $0x48] sm:$0xff]   ;;  %v2583_v28 = vld [vmem:[%s2793_s16 + $0x50] sm:$0xff]   ;;  %v2584_v32 = vld [vmem:[%s2793_s16 + $0x58] sm:$0xff]   ;;  %173 = vst.msk [vmem:[#allocation2 + $0x28] sm:$0xff] %vm167_vm0, %v2753_v49 }
  0x13   : > { %688 = vadd.xlane.f32.xlu2 %v2072_v5  ;;  %v2088_v20 = vunpack.c.l.bf16 %v2579_v18  ;;  %v2089_v21 = vunpack.c.h.bf16 %v2579_v18  ;;  %v2092_v22 = vunpack.c.l.bf16 %v2580_v19  ;;  %v2093_v24 = vunpack.c.h.bf16 %v2580_v19  ;;  %v2585_v36 = vld [vmem:[%s2793_s16 + $0x60] sm:$0xff]   ;;  %v2586_v37 = vld [vmem:[%s2793_s16 + $0x68] sm:$0xff]   ;;  %v2587_v41 = vld [vmem:[%s2793_s16 + $0x70] sm:$0xff]   ;;  %174 = vst.msk [vmem:[#allocation2 + $0x30] sm:$0xff] %vm167_vm0, %v2753_v49 }
  0x14   : > { %v2096_v25 = vunpack.c.l.bf16 %v2581_v23  ;;  %v2097_v26 = vunpack.c.h.bf16 %v2581_v23  ;;  %v2100_v29 = vunpack.c.l.bf16 %v2582_v27  ;;  %v2101_v30 = vunpack.c.h.bf16 %v2582_v27  ;;  %v2588_v45 = vld [vmem:[%s2793_s16 + $0x78] sm:$0xff]   ;;  %v2589_v46 = vld [vmem:[%s2793_s16 + $0x80] sm:$0xff]   ;;  %v2590_v51 = vld [vmem:[%s2793_s16 + $0x88] sm:$0xff]   ;;  %175 = vst.msk [vmem:[#allocation2 + $0x38] sm:$0xff] %vm167_vm0, %v2753_v49 }
  0x15   : > { %v2104_v31 = vunpack.c.l.bf16 %v2583_v28  ;;  %v2105_v33 = vunpack.c.h.bf16 %v2583_v28  ;;  %v2108_v34 = vunpack.c.l.bf16 %v2584_v32  ;;  %v2109_v35 = vunpack.c.h.bf16 %v2584_v32  ;;  %176 = vst.msk [vmem:[#allocation2 + $0x40] sm:$0xff] %vm167_vm0, %v2753_v49  ;;  %v2591_v55 = vld [vmem:[%s2793_s16 + $0x90] sm:$0xff]   ;;  %v2592_v56 = vld [vmem:[%s2793_s16 + $0x98] sm:$0xff]   ;;  %v2593_v60 = vld [vmem:[%s2793_s16 + $0xa0] sm:$0xff]  }
  0x16   : > { %v2112_v38 = vunpack.c.l.bf16 %v2585_v36  ;;  %v2113_v39 = vunpack.c.h.bf16 %v2585_v36  ;;  %v2116_v40 = vunpack.c.l.bf16 %v2586_v37  ;;  %v2117_v42 = vunpack.c.h.bf16 %v2586_v37  ;;  %177 = vst.msk [vmem:[#allocation2 + $0x48] sm:$0xff] %vm167_vm0, %v2753_v49  ;;  %v2594_v0 = vld [vmem:[%s2793_s16 + $0xa8] sm:$0xff]   ;;  %v2880_v1 = vld [vmem:[%s2793_s16 + $0xb0] sm:$0xff]   ;;  %v552_v5 = vld [vmem:[#allocation2] sm:$0xff] }
  0x17   : > { %v2120_v43 = vunpack.c.l.bf16 %v2587_v41  ;;  %v2121_v44 = vunpack.c.h.bf16 %v2587_v41  ;;  %v2124_v47 = vunpack.c.l.bf16 %v2588_v45  ;;  %v2125_v48 = vunpack.c.h.bf16 %v2588_v45  ;;  %178 = vst.msk [vmem:[#allocation2 + $0x50] sm:$0xff] %vm167_vm0, %v2753_v49  ;;  %v2601_v36 = vld [vmem:[%s2793_s16 + $0xe0] sm:$0xff]  }
  0x18   : > { %v2128_v50 = vunpack.c.l.bf16 %v2589_v46  ;;  %v2129_v52 = vunpack.c.h.bf16 %v2589_v46  ;;  %v2132_v53 = vunpack.c.l.bf16 %v2590_v51  ;;  %v2133_v54 = vunpack.c.h.bf16 %v2590_v51  ;;  %179 = vst.msk [vmem:[#allocation2 + $0x58] sm:$0xff] %vm167_vm0, %v2753_v49  ;;  %v556_v37 = vld [vmem:[#allocation2 + $0x20] sm:$0xff] }
  0x19   : > { %180 = vst.msk [vmem:[#allocation2 + $0x60] sm:$0xff] %vm167_vm0, %v2753_v49  ;;  %v2136_v57 = vunpack.c.l.bf16 %v2591_v55  ;;  %v2137_v58 = vunpack.c.h.bf16 %v2591_v55  ;;  %v2140_v59 = vunpack.c.l.bf16 %v2592_v56  ;;  %v2141_v61 = vunpack.c.h.bf16 %v2592_v56 }
  0x1a   : > { %682 = vadd.xlane.f32.xlu0 %v2065_v6  ;;  %686 = vadd.xlane.f32.xlu1 %v2069_v7  ;;  %181 = vst.msk [vmem:[#allocation2 + $0x68] sm:$0xff] %vm167_vm0, %v2753_v49  ;;  %v2144_v62 = vunpack.c.l.bf16 %v2593_v60  ;;  %v2145_v63 = vunpack.c.h.bf16 %v2593_v60  ;;  %v2148_v2 = vunpack.c.l.bf16 %v2594_v0  ;;  %v2149_v3 = vunpack.c.h.bf16 %v2594_v0 }
  0x1b   : > { %690 = vadd.xlane.f32.xlu2 %v2073_v8  ;;  %182 = vst.msk [vmem:[#allocation2 + $0x70] sm:$0xff] %vm167_vm0, %v2753_v49  ;;  %v2152_v4 = vunpack.c.l.bf16 %v2880_v1  ;;  %v2153_v9 = vunpack.c.h.bf16 %v2880_v1  ;;  %v559_v51 = vld [vmem:[#allocation2 + $0x38] sm:$0xff] }
  0x1c   : > { %183 = vst.msk [vmem:[#allocation2 + $0x78] sm:$0xff] %vm167_vm0, %v2753_v49  ;;  %v560_v56 = vld [vmem:[#allocation2 + $0x40] sm:$0xff] }
  0x1d   : > { %184 = vst.msk [vmem:[#allocation2 + $0x80] sm:$0xff] %vm167_vm0, %v2753_v49 }
  0x1e   : > { %185 = vst.msk [vmem:[#allocation2 + $0x88] sm:$0xff] %vm167_vm0, %v2753_v49  ;;  %v562_v60 = vld [vmem:[#allocation2 + $0x50] sm:$0xff] }
  0x1f   : > { %186 = vst.msk [vmem:[#allocation2 + $0x90] sm:$0xff] %vm167_vm0, %v2753_v49  ;;  %v563_v1 = vld [vmem:[#allocation2 + $0x58] sm:$0xff] }
  0x20   : > { %187 = vst.msk [vmem:[#allocation2 + $0x98] sm:$0xff] %vm167_vm0, %v2753_v49 }
  0x21   : > { %188 = vst.msk [vmem:[#allocation2 + $0xa0] sm:$0xff] %vm167_vm0, %v2753_v49 }
  0x22   : > { %692 = vadd.xlane.f32.xlu0 %v2076_v11  ;;  %694 = vadd.xlane.f32.xlu1 %v2077_v12  ;;  %189 = vst.msk [vmem:[#allocation2 + $0xa8] sm:$0xff] %vm167_vm0, %v2753_v49  ;;  %v2596_v11 = vld [vmem:[%s2793_s16 + $0xb8] sm:$0xff]  }
  0x23   : > { %696 = vadd.xlane.f32.xlu2 %v2080_v13  ;;  %190 = vst.msk [vmem:[#allocation2 + $0xb0] sm:$0xff] %vm167_vm0, %v2753_v49  ;;  %v2156_v12 = vunpack.c.l.bf16 %v2596_v11  ;;  %v2157_v13 = vunpack.c.h.bf16 %v2596_v11  ;;  %v3128_v11 = vld [vmem:[%s3612_s1 + $0x10] sm:$0xff]  }
  0x24   : > { %191 = vst.msk [vmem:[#allocation2 + $0xb8] sm:$0xff] %vm167_vm0, %v2753_v49 }
  0x25   : > { %192 = vst.msk [vmem:[#allocation2 + $0xc0] sm:$0xff] %vm167_vm0, %v2753_v49 }
  0x26   : > { %193 = vst.msk [vmem:[#allocation2 + $0xc8] sm:$0xff] %vm167_vm0, %v2753_v49 }
  0x27   : > { %194 = vst.msk [vmem:[#allocation2 + $0xd0] sm:$0xff] %vm167_vm0, %v2753_v49 }
  0x28   : > { %195 = vst.msk [vmem:[#allocation2 + $0xd8] sm:$0xff] %vm167_vm0, %v2753_v49 }
  0x29   : > { %196 = vst.msk [vmem:[#allocation2 + $0xe0] sm:$0xff] %vm167_vm0, %v2753_v49 }
  0x2a   : > { %698 = vadd.xlane.f32.xlu0 %v2081_v15  ;;  %700 = vadd.xlane.f32.xlu1 %v2084_v16  ;;  %197 = vst.msk [vmem:[#allocation2 + $0xe8] sm:$0xff] %vm167_vm0, %v2753_v49  ;;  %v2597_v16 = vld [vmem:[%s2793_s16 + $0xc0] sm:$0xff]  }
  0x2b   : > { %702 = vadd.xlane.f32.xlu2 %v2085_v17  ;;  %198 = vst.msk [vmem:[#allocation2 + $0xf0] sm:$0xff] %vm167_vm0, %v2753_v49  ;;  %v2160_v17 = vunpack.c.l.bf16 %v2597_v16  ;;  %v2161_v19 = vunpack.c.h.bf16 %v2597_v16 }
  0x2c   : > { %199 = vst.msk [vmem:[#allocation2 + $0xf8] sm:$0xff] %vm167_vm0, %v2753_v49 }
  0x2d   : > { %200 = vst.msk [vmem:[#allocation2 + $0x100] sm:$0xff] %vm167_vm0, %v2753_v49 }
  0x2e   : > { %201 = vst.msk [vmem:[#allocation2 + $0x108] sm:$0xff] %vm167_vm0, %v2753_v49 }
  0x2f   : > { %202 = vst.msk [vmem:[#allocation2 + $0x110] sm:$0xff] %vm167_vm0, %v2753_v49 }
  0x30   : > { %203 = vst.msk [vmem:[#allocation2 + $0x118] sm:$0xff] %vm167_vm0, %v2753_v49 }
  0x31   : > { %204 = vst.msk [vmem:[#allocation2 + $0x120] sm:$0xff] %vm167_vm0, %v2753_v49 }
  0x32   : > { %704 = vadd.xlane.f32.xlu0 %v2088_v20  ;;  %706 = vadd.xlane.f32.xlu1 %v2089_v21  ;;  %205 = vst.msk [vmem:[#allocation2 + $0x128] sm:$0xff] %vm167_vm0, %v2753_v49  ;;  %v2598_v20 = vld [vmem:[%s2793_s16 + $0xc8] sm:$0xff]  }
  0x33   : > { %708 = vadd.xlane.f32.xlu2 %v2092_v22  ;;  %206 = vst.msk [vmem:[#allocation2 + $0x130] sm:$0xff] %vm167_vm0, %v2753_v49  ;;  %v2164_v21 = vunpack.c.l.bf16 %v2598_v20 }
  0x34   : > { %207 = vst.msk [vmem:[#allocation2 + $0x138] sm:$0xff] %vm167_vm0, %v2753_v49 }
  0x35   : > { %208 = vst.msk [vmem:[#allocation2 + $0x140] sm:$0xff] %vm167_vm0, %v2753_v49 }
  0x36   : > { %209 = vst.msk [vmem:[#allocation2 + $0x148] sm:$0xff] %vm167_vm0, %v2753_v49 }
  0x37   : > { %210 = vst.msk [vmem:[#allocation2 + $0x150] sm:$0xff] %vm167_vm0, %v2753_v49 }
  0x38   : > { %211 = vst.msk [vmem:[#allocation2 + $0x158] sm:$0xff] %vm167_vm0, %v2753_v49 }
  0x39   : > { %212 = vst.msk [vmem:[#allocation2 + $0x160] sm:$0xff] %vm167_vm0, %v2753_v49 }
  0x3a   : > { %710 = vadd.xlane.f32.xlu0 %v2093_v24  ;;  %712 = vadd.xlane.f32.xlu1 %v2096_v25  ;;  %213 = vst.msk [vmem:[#allocation2 + $0x168] sm:$0xff] %vm167_vm0, %v2753_v49  ;;  %v2165_v24 = vunpack.c.h.bf16 %v2598_v20 }
  0x3b   : > { %714 = vadd.xlane.f32.xlu2 %v2097_v26  ;;  %214 = vst.msk [vmem:[#allocation2 + $0x170] sm:$0xff] %vm167_vm0, %v2753_v49  ;;  %v2599_v26 = vld [vmem:[%s2793_s16 + $0xd0] sm:$0xff]  }
  0x3c   : > { %215 = vst.msk [vmem:[#allocation2 + $0x178] sm:$0xff] %vm167_vm0, %v2753_v49  ;;  %v2168_v27 = vunpack.c.l.bf16 %v2599_v26  ;;  %v2169_v28 = vunpack.c.h.bf16 %v2599_v26 }
  0x3d   : > { %216 = vst.msk [vmem:[#allocation2 + $0x180] sm:$0xff] %vm167_vm0, %v2753_v49 }
  0x3e   : > { %217 = vst.msk [vmem:[#allocation2 + $0x188] sm:$0xff] %vm167_vm0, %v2753_v49 }
  0x3f   : > { %218 = vst.msk [vmem:[#allocation2 + $0x190] sm:$0xff] %vm167_vm0, %v2753_v49 }
  0x40   : > { %219 = vst.msk [vmem:[#allocation2 + $0x198] sm:$0xff] %vm167_vm0, %v2753_v49 }
  0x41   : > { %220 = vst.msk [vmem:[#allocation2 + $0x1a0] sm:$0xff] %vm167_vm0, %v2753_v49 }
  0x42   : > { %716 = vadd.xlane.f32.xlu0 %v2100_v29  ;;  %718 = vadd.xlane.f32.xlu1 %v2101_v30  ;;  %221 = vst.msk [vmem:[#allocation2 + $0x1a8] sm:$0xff] %vm167_vm0, %v2753_v49 }
  0x43   : > { %720 = vadd.xlane.f32.xlu2 %v2104_v31  ;;  %222 = vst.msk [vmem:[#allocation2 + $0x1b0] sm:$0xff] %vm167_vm0, %v2753_v49  ;;  %v2600_v31 = vld [vmem:[%s2793_s16 + $0xd8] sm:$0xff]  }
  0x44   : > { %223 = vst.msk [vmem:[#allocation2 + $0x1b8] sm:$0xff] %vm167_vm0, %v2753_v49  ;;  %v2172_v32 = vunpack.c.l.bf16 %v2600_v31 }
  0x45   : > { %224 = vst.msk [vmem:[#allocation2 + $0x1c0] sm:$0xff] %vm167_vm0, %v2753_v49 }
  0x46   : > { %225 = vst.msk [vmem:[#allocation2 + $0x1c8] sm:$0xff] %vm167_vm0, %v2753_v49 }
  0x47   : > { %226 = vst.msk [vmem:[#allocation2 + $0x1d0] sm:$0xff] %vm167_vm0, %v2753_v49 }
  0x48   : > { %227 = vst.msk [vmem:[#allocation2 + $0x1d8] sm:$0xff] %vm167_vm0, %v2753_v49 }
  0x49   : > { %228 = vst.msk [vmem:[#allocation2 + $0x1e0] sm:$0xff] %vm167_vm0, %v2753_v49 }
  0x4a   : > { %722 = vadd.xlane.f32.xlu0 %v2105_v33  ;;  %724 = vadd.xlane.f32.xlu1 %v2108_v34  ;;  %229 = vst.msk [vmem:[#allocation2 + $0x1e8] sm:$0xff] %vm167_vm0, %v2753_v49  ;;  %v2173_v34 = vunpack.c.h.bf16 %v2600_v31 }
  0x4b   : > { %726 = vadd.xlane.f32.xlu2 %v2109_v35  ;;  %230 = vst.msk [vmem:[#allocation2 + $0x1f0] sm:$0xff] %vm167_vm0, %v2753_v49  ;;  %v554_v35 = vld [vmem:[#allocation2 + $0x10] sm:$0xff] }
  0x4c   : > { %231 = vst.msk [vmem:[#allocation2 + $0x1f8] sm:$0xff] %vm167_vm0, %v2753_v49 }
  0x4d   : > { %232 = vst.msk [vmem:[#allocation2 + $0x200] sm:$0xff] %vm167_vm0, %v2753_v49 }
  0x4e   : > { %233 = vst.msk [vmem:[#allocation2 + $0x208] sm:$0xff] %vm167_vm0, %v2753_v49 }
  0x4f   : > { %234 = vst.msk [vmem:[#allocation2 + $0x210] sm:$0xff] %vm167_vm0, %v2753_v49 }
  0x50   : > { %235 = vst.msk [vmem:[#allocation2 + $0x218] sm:$0xff] %vm167_vm0, %v2753_v49 }
  0x51   : > { %236 = vst.msk [vmem:[#allocation2 + $0x220] sm:$0xff] %vm167_vm0, %v2753_v49 }
  0x52   : > { %728 = vadd.xlane.f32.xlu0 %v2112_v38  ;;  %730 = vadd.xlane.f32.xlu1 %v2113_v39  ;;  %237 = vst.msk [vmem:[#allocation2 + $0x228] sm:$0xff] %vm167_vm0, %v2753_v49  ;;  %v2176_v38 = vunpack.c.l.bf16 %v2601_v36  ;;  %v553_v39 = vld [vmem:[#allocation2 + $0x8] sm:$0xff] }
  0x53   : > { %732 = vadd.xlane.f32.xlu2 %v2116_v40  ;;  %238 = vst.msk [vmem:[#allocation2 + $0x230] sm:$0xff] %vm167_vm0, %v2753_v49 }
  0x54   : > { %239 = vst.msk [vmem:[#allocation2 + $0x238] sm:$0xff] %vm167_vm0, %v2753_v49 }
  0x55   : > { %240 = vst.msk [vmem:[#allocation2 + $0x240] sm:$0xff] %vm167_vm0, %v2753_v49 }
  0x56   : > { %241 = vst.msk [vmem:[#allocation2 + $0x248] sm:$0xff] %vm167_vm0, %v2753_v49 }
  0x57   : > { %242 = vst.msk [vmem:[#allocation2 + $0x250] sm:$0xff] %vm167_vm0, %v2753_v49 }
  0x58   : > { %243 = vst.msk [vmem:[#allocation2 + $0x258] sm:$0xff] %vm167_vm0, %v2753_v49 }
  0x59   : > { %244 = vst.msk [vmem:[#allocation2 + $0x260] sm:$0xff] %vm167_vm0, %v2753_v49 }
  0x5a   : > { %734 = vadd.xlane.f32.xlu0 %v2117_v42  ;;  %736 = vadd.xlane.f32.xlu1 %v2120_v43  ;;  %245 = vst.msk [vmem:[#allocation2 + $0x268] sm:$0xff] %vm167_vm0, %v2753_v49  ;;  %v555_v42 = vld [vmem:[#allocation2 + $0x18] sm:$0xff] }
  0x5b   : > { %738 = vadd.xlane.f32.xlu2 %v2121_v44  ;;  %246 = vst.msk [vmem:[#allocation2 + $0x270] sm:$0xff] %vm167_vm0, %v2753_v49  ;;  %v557_v44 = vld [vmem:[#allocation2 + $0x28] sm:$0xff] }
  0x5c   : > { %247 = vst.msk [vmem:[#allocation2 + $0x278] sm:$0xff] %vm167_vm0, %v2753_v49 }
  0x5d   : > { %248 = vst.msk [vmem:[#allocation2 + $0x280] sm:$0xff] %vm167_vm0, %v2753_v49 }
  0x5e   : > { %249 = vst.msk [vmem:[#allocation2 + $0x288] sm:$0xff] %vm167_vm0, %v2753_v49 }
  0x5f   : > { %250 = vst.msk [vmem:[#allocation2 + $0x290] sm:$0xff] %vm167_vm0, %v2753_v49 }
  0x60   : > { %251 = vst.msk [vmem:[#allocation2 + $0x298] sm:$0xff] %vm167_vm0, %v2753_v49 }
  0x61   : > { %252 = vst.msk [vmem:[#allocation2 + $0x2a0] sm:$0xff] %vm167_vm0, %v2753_v49 }
  0x62   : > { %740 = vadd.xlane.f32.xlu0 %v2124_v47  ;;  %742 = vadd.xlane.f32.xlu1 %v2125_v48  ;;  %253 = vst.msk [vmem:[#allocation2 + $0x2a8] sm:$0xff] %vm167_vm0, %v2753_v49  ;;  %v558_v47 = vld [vmem:[#allocation2 + $0x30] sm:$0xff]  ;;  %v2177_v48 = vunpack.c.h.bf16 %v2601_v36 }
  0x63   : > { %744 = vadd.xlane.f32.xlu2 %v2128_v50  ;;  %254 = vst.msk [vmem:[#allocation2 + $0x2b0] sm:$0xff] %vm167_vm0, %v2753_v49 }
  0x64   : > { %255 = vst.msk [vmem:[#allocation2 + $0x2b8] sm:$0xff] %vm167_vm0, %v2753_v49 }
  0x65   : > { %256 = vst.msk [vmem:[#allocation2 + $0x2c0] sm:$0xff] %vm167_vm0, %v2753_v49 }
  0x66   : > { %257 = vst.msk [vmem:[#allocation2 + $0x2c8] sm:$0xff] %vm167_vm0, %v2753_v49 }
  0x67   : > { %258 = vst.msk [vmem:[#allocation2 + $0x2d0] sm:$0xff] %vm167_vm0, %v2753_v49 }
  0x68   : > { %259 = vst.msk [vmem:[#allocation2 + $0x2d8] sm:$0xff] %vm167_vm0, %v2753_v49 }
  0x69   : > { %260 = vst.msk [vmem:[#allocation2 + $0x2e0] sm:$0xff] %vm167_vm0, %v2753_v49 }
  0x6a   : > { %746 = vadd.xlane.f32.xlu0 %v2129_v52  ;;  %748 = vadd.xlane.f32.xlu1 %v2132_v53  ;;  %261 = vst.msk [vmem:[#allocation2 + $0x2e8] sm:$0xff] %vm167_vm0, %v2753_v49  ;;  %v2602_v53 = vld [vmem:[%s2793_s16 + $0xe8] sm:$0xff]  }
  0x6b   : > { %750 = vadd.xlane.f32.xlu2 %v2133_v54  ;;  %262 = vst.msk [vmem:[#allocation2 + $0x2f0] sm:$0xff] %vm167_vm0, %v2753_v49  ;;  %v2319_v54 = vld [vmem:[%s3612_s1] sm:$0xff]  }
  0x6c   : > { %263 = vst.msk [vmem:[#allocation2 + $0x2f8] sm:$0xff] %vm167_vm0, %v2753_v49 }
  0x6d   : > { %264 = vst.msk [vmem:[#allocation2 + $0x300] sm:$0xff] %vm167_vm0, %v2753_v49 }
  0x6e   : > { %265 = vst.msk [vmem:[#allocation2 + $0x308] sm:$0xff] %vm167_vm0, %v2753_v49 }
  0x6f   : > { %266 = vst.msk [vmem:[#allocation2 + $0x310] sm:$0xff] %vm167_vm0, %v2753_v49 }
  0x70   : > { %267 = vst.msk [vmem:[#allocation2 + $0x318] sm:$0xff] %vm167_vm0, %v2753_v49 }
  0x71   : > { %268 = vst.msk [vmem:[#allocation2 + $0x320] sm:$0xff] %vm167_vm0, %v2753_v49 }
  0x72   : > { %752 = vadd.xlane.f32.xlu0 %v2136_v57  ;;  %754 = vadd.xlane.f32.xlu1 %v2137_v58  ;;  %269 = vst.msk [vmem:[#allocation2 + $0x328] sm:$0xff] %vm167_vm0, %v2753_v49  ;;  %v2180_v57 = vunpack.c.l.bf16 %v2602_v53  ;;  %v561_v58 = vld [vmem:[#allocation2 + $0x48] sm:$0xff] }
  0x73   : > { %756 = vadd.xlane.f32.xlu2 %v2140_v59  ;;  %270 = vst.msk [vmem:[#allocation2 + $0x330] sm:$0xff] %vm167_vm0, %v2753_v49 }
  0x74   : > { %271 = vst.msk [vmem:[#allocation2 + $0x338] sm:$0xff] %vm167_vm0, %v2753_v49 }
  0x75   : > { %272 = vst.msk [vmem:[#allocation2 + $0x340] sm:$0xff] %vm167_vm0, %v2753_v49 }
  0x76   : > { %273 = vst.msk [vmem:[#allocation2 + $0x348] sm:$0xff] %vm167_vm0, %v2753_v49 }
  0x77   : > { %274 = vst.msk [vmem:[#allocation2 + $0x350] sm:$0xff] %vm167_vm0, %v2753_v49 }
  0x78   : > { %275 = vst.msk [vmem:[#allocation2 + $0x358] sm:$0xff] %vm167_vm0, %v2753_v49 }
  0x79   : > { %276 = vst.msk [vmem:[#allocation2 + $0x360] sm:$0xff] %vm167_vm0, %v2753_v49 }
  0x7a   : > { %758 = vadd.xlane.f32.xlu0 %v2141_v61  ;;  %760 = vadd.xlane.f32.xlu1 %v2144_v62  ;;  %277 = vst.msk [vmem:[#allocation2 + $0x368] sm:$0xff] %vm167_vm0, %v2753_v49  ;;  %v2181_v61 = vunpack.c.h.bf16 %v2602_v53  ;;  %v2320_v62 = vunpack.c.l.bf16 %v2319_v54 }
  0x7b   : > { %762 = vadd.xlane.f32.xlu2 %v2145_v63  ;;  %278 = vst.msk [vmem:[#allocation2 + $0x370] sm:$0xff] %vm167_vm0, %v2753_v49  ;;  %v2637_v63 = vld [vmem:[%s3612_s1 + $0x8] sm:$0xff]  }
  0x7c   : > { %279 = vst.msk [vmem:[#allocation2 + $0x378] sm:$0xff] %vm167_vm0, %v2753_v49 }
  0x7d   : > { %280 = vst.msk [vmem:[#allocation2 + $0x380] sm:$0xff] %vm167_vm0, %v2753_v49 }
  0x7e   : > { %281 = vst.msk [vmem:[#allocation2 + $0x388] sm:$0xff] %vm167_vm0, %v2753_v49 }
  0x7f   : > { %282 = vst.msk [vmem:[#allocation2 + $0x390] sm:$0xff] %vm167_vm0, %v2753_v49 }
  0x80   : > { %283 = vst.msk [vmem:[#allocation2 + $0x398] sm:$0xff] %vm167_vm0, %v2753_v49 }
  0x81   : > { %284 = vst.msk [vmem:[#allocation2 + $0x3a0] sm:$0xff] %vm167_vm0, %v2753_v49 }
  0x82   : > { %764 = vadd.xlane.f32.xlu0 %v2148_v2  ;;  %766 = vadd.xlane.f32.xlu1 %v2149_v3  ;;  %285 = vst.msk [vmem:[#allocation2 + $0x3a8] sm:$0xff] %vm167_vm0, %v2753_v49 }
  0x83   : > { %768 = vadd.xlane.f32.xlu2 %v2152_v4  ;;  %286 = vst.msk [vmem:[#allocation2 + $0x3b0] sm:$0xff] %vm167_vm0, %v2753_v49 }
  0x84   : > { %287 = vst.msk [vmem:[#allocation2 + $0x3b8] sm:$0xff] %vm167_vm0, %v2753_v49 }
  0x85   : > { %v681_v6 = vpop.xlane.xlu0 %680  ;;  %v3006_v8 = vpop.xlane.xlu1 %684  ;;  %288 = vst.msk [vmem:[#allocation2 + $0x3c0] sm:$0xff] %vm167_vm0, %v2753_v49 }
  0x86   : > { %v936_v7 = vadd.f32 %v681_v6, %v552_v5  ;;  %v3017_v10 = vpop.xlane.xlu2 %688  ;;  %289 = vst.msk [vmem:[#allocation2 + $0x3c8] sm:$0xff] %vm167_vm0, %v2753_v49  ;;  %v938_v41 = vadd.f32 %v3006_v8, %v554_v35  ;;  %v564_v5 = vld [vmem:[#allocation2 + $0x60] sm:$0xff] }
  0x87   : > { %290 = vst.msk [vmem:[#allocation2 + $0x3d0] sm:$0xff] %vm167_vm0, %v2753_v49  ;;  %v940_v43 = vadd.f32 %v3017_v10, %v556_v37  ;;  %v2324_v10 = vunpack.c.l.bf16 %v2637_v63  ;;  %v2639_v37 = vld [vmem:[%s3612_s1 + $0x18] sm:$0xff]  }
  0x88   : > { %1065 = vst.msk [vmem:[#allocation2] sm:$0xff] %vm167_vm0, %v936_v7  ;;  %v565_v7 = vld [vmem:[#allocation2 + $0x68] sm:$0xff] }
  0x89   : > { %291 = vst.msk [vmem:[#allocation2 + $0x3d8] sm:$0xff] %vm167_vm0, %v2753_v49 }
  0x8a   : > { %770 = vadd.xlane.f32.xlu0 %v2153_v9  ;;  %772 = vadd.xlane.f32.xlu1 %v2156_v12  ;;  %292 = vst.msk [vmem:[#allocation2 + $0x3e0] sm:$0xff] %vm167_vm0, %v2753_v49  ;;  %v2603_v9 = vld [vmem:[%s2793_s16 + $0xf0] sm:$0xff]   ;;  %v2321_v12 = vunpack.c.h.bf16 %v2319_v54  ;;  %v2332_v54 = vunpack.c.l.bf16 %v2639_v37 }
  0x8b   : > { %774 = vadd.xlane.f32.xlu2 %v2157_v13  ;;  %293 = vst.msk [vmem:[#allocation2 + $0x3e8] sm:$0xff] %vm167_vm0, %v2753_v49 }
  0x8c   : > { %294 = vst.msk [vmem:[#allocation2 + $0x3f0] sm:$0xff] %vm167_vm0, %v2753_v49 }
  0x8d   : > { %v3028_v14 = vpop.xlane.xlu0 %682  ;;  %v3034_v15 = vpop.xlane.xlu1 %686  ;;  %295 = vst.msk [vmem:[#allocation2 + $0x3f8] sm:$0xff] %vm167_vm0, %v2753_v49 }
  0x8e   : > { %v3041_v18 = vpop.xlane.xlu2 %690  ;;  %v937_v46 = vadd.f32 %v3028_v14, %v553_v39  ;;  %v939_v50 = vadd.f32 %v3034_v15, %v555_v42  ;;  %1067 = vst.msk [vmem:[#allocation2 + $0x10] sm:$0xff] %vm167_vm0, %v938_v41  ;;  %v566_v14 = vld [vmem:[#allocation2 + $0x70] sm:$0xff]  ;;  %v2184_v15 = vunpack.c.l.bf16 %v2603_v9 }
  0x8f   : > { %v941_v55 = vadd.f32 %v3041_v18, %v557_v44  ;;  %1069 = vst.msk [vmem:[#allocation2 + $0x20] sm:$0xff] %vm167_vm0, %v940_v43  ;;  %v1452_v3 = vld [vmem:[#allocation2] sm:$0xff]  ;;  %v570_v39 = vld [vmem:[#allocation2 + $0x90] sm:$0xff]  ;;  %v2329_v43 = vunpack.c.h.bf16 %v3128_v11 }
  0x90   : > { %1066 = vst.msk [vmem:[#allocation2 + $0x8] sm:$0xff] %vm167_vm0, %v937_v46  ;;  %v1580_v16 = vmul.f32 %v2320_v62, %v1452_v3  ;;  %v2640_v44 = vld [vmem:[%s3612_s1 + $0x20] sm:$0xff]  }
  0x91   : > { %1068 = vst.msk [vmem:[#allocation2 + $0x18] sm:$0xff] %vm167_vm0, %v939_v50  ;;  %v571_v50 = vld [vmem:[#allocation2 + $0x98] sm:$0xff] }
  0x92   : > { %776 = vadd.xlane.f32.xlu0 %v2160_v17  ;;  %778 = vadd.xlane.f32.xlu1 %v2161_v19  ;;  %1070 = vst.msk [vmem:[#allocation2 + $0x28] sm:$0xff] %vm167_vm0, %v941_v55  ;;  %v567_v19 = vld [vmem:[#allocation2 + $0x78] sm:$0xff]  ;;  %v1708_v35 = vsel %vm167_vm0, %v1580_v16, 0.0 }
  0x93   : > { %780 = vadd.xlane.f32.xlu2 %v2164_v21  ;;  %v2325_v21 = vunpack.c.h.bf16 %v2637_v63 }
  0x95   : > { %v3052_v22 = vpop.xlane.xlu0 %692  ;;  %v3058_v23 = vpop.xlane.xlu1 %694  ;;  %v1454_v17 = vld [vmem:[#allocation2 + $0x10] sm:$0xff] }
  0x96   : > { %v3064_v25 = vpop.xlane.xlu2 %696  ;;  %v942_v49 = vadd.f32 %v3052_v22, %v558_v47  ;;  %v943_v59 = vadd.f32 %v3058_v23, %v559_v51  ;;  %v568_v23 = vld [vmem:[#allocation2 + $0x80] sm:$0xff] }
  0x97   : > { %v944_v0 = vadd.f32 %v3064_v25, %v560_v56  ;;  %v2328_v25 = vunpack.c.l.bf16 %v3128_v11  ;;  %v1453_v26 = vld [vmem:[#allocation2 + $0x8] sm:$0xff]  ;;  %v1456_v36 = vld [vmem:[#allocation2 + $0x20] sm:$0xff] }
  0x98   : > { %1071 = vst.msk [vmem:[#allocation2 + $0x30] sm:$0xff] %vm167_vm0, %v942_v49  ;;  %v1581_v31 = vmul.f32 %v2321_v12, %v1453_v26  ;;  %v2333_v49 = vunpack.c.h.bf16 %v2639_v37 }
  0x99   : > { %1072 = vst.msk [vmem:[#allocation2 + $0x38] sm:$0xff] %vm167_vm0, %v943_v59  ;;  %v1457_v47 = vld [vmem:[#allocation2 + $0x28] sm:$0xff]  ;;  %v1584_v53 = vmul.f32 %v2328_v25, %v1456_v36  ;;  %v572_v59 = vld [vmem:[#allocation2 + $0xa0] sm:$0xff] }
  0x9a   : > { %782 = vadd.xlane.f32.xlu0 %v2165_v24  ;;  %784 = vadd.xlane.f32.xlu1 %v2168_v27  ;;  %1073 = vst.msk [vmem:[#allocation2 + $0x40] sm:$0xff] %vm167_vm0, %v944_v0  ;;  %v2185_v24 = vunpack.c.h.bf16 %v2603_v9  ;;  %v1709_v41 = vsel %vm167_vm0, %v1581_v31, 0.0  ;;  %v1585_v63 = vmul.f32 %v2329_v43, %v1457_v47  ;;  %v2337_v9 = vunpack.c.h.bf16 %v2640_v44 }
  0x9b   : > { %786 = vadd.xlane.f32.xlu2 %v2169_v28  ;;  %v569_v28 = vld [vmem:[#allocation2 + $0x88] sm:$0xff]  ;;  %v1710_v46 = vadd.f32 %v1709_v41, %v1708_v35 }
  0x9c   : > { %v1717_v16 = vsel %vm167_vm0, %v1585_v63, 0.0  ;;  %v578_v63 = vld [vmem:[#allocation2 + $0xd0] sm:$0xff] }
  0x9d   : > { %v699_v29 = vpop.xlane.xlu0 %698  ;;  %v701_v30 = vpop.xlane.xlu1 %700 }
  0x9e   : > { %v3084_v33 = vpop.xlane.xlu2 %702  ;;  %v945_v4 = vadd.f32 %v699_v29, %v561_v58  ;;  %v946_v6 = vadd.f32 %v701_v30, %v562_v60  ;;  %v2604_v29 = vld [vmem:[%s2793_s16 + $0xf8] sm:$0xff]   ;;  %v1582_v30 = vmul.f32 %v2324_v10, %v1454_v17  ;;  %v2336_v58 = vunpack.c.l.bf16 %v2640_v44  ;;  %v576_v44 = vld [vmem:[#allocation2 + $0xc0] sm:$0xff] }
  0x9f   : > { %v947_v13 = vadd.f32 %v3084_v33, %v563_v1 }
  0xa0   : > { %1074 = vst.msk [vmem:[#allocation2 + $0x48] sm:$0xff] %vm167_vm0, %v945_v4  ;;  %v1459_v0 = vld [vmem:[#allocation2 + $0x38] sm:$0xff] }
  0xa1   : > { %1075 = vst.msk [vmem:[#allocation2 + $0x50] sm:$0xff] %vm167_vm0, %v946_v6  ;;  %v1460_v4 = vld [vmem:[#allocation2 + $0x40] sm:$0xff]  ;;  %v1587_v12 = vmul.f32 %v2333_v49, %v1459_v0 }
  0xa2   : > { %788 = vadd.xlane.f32.xlu0 %v2172_v32  ;;  %790 = vadd.xlane.f32.xlu1 %v2173_v34  ;;  %v1455_v32 = vld [vmem:[#allocation2 + $0x18] sm:$0xff]  ;;  %1076 = vst.msk [vmem:[#allocation2 + $0x58] sm:$0xff] %vm167_vm0, %v947_v13  ;;  %v2188_v34 = vunpack.c.l.bf16 %v2604_v29  ;;  %v1588_v17 = vmul.f32 %v2336_v58, %v1460_v4  ;;  %v2644_v49 = vld [vmem:[%s3612_s1 + $0x40] sm:$0xff]  }
  0xa3   : > { %792 = vadd.xlane.f32.xlu2 %v2176_v38  ;;  %v1583_v42 = vmul.f32 %v2325_v21, %v1455_v32  ;;  %v1721_v31 = vsel %vm167_vm0, %v1587_v12, 0.0 }
  0xa4   : > { %v1723_v36 = vsel %vm167_vm0, %v1588_v17, 0.0 }
  0xa5   : > { %v705_v40 = vpop.xlane.xlu0 %704  ;;  %v707_v45 = vpop.xlane.xlu1 %706  ;;  %v1713_v62 = vsel %vm167_vm0, %v1583_v42, 0.0  ;;  %v2643_v42 = vld [vmem:[%s3612_s1 + $0x38] sm:$0xff]  }
  0xa6   : > { %v709_v52 = vpop.xlane.xlu2 %708  ;;  %v948_v18 = vadd.f32 %v705_v40, %v564_v5  ;;  %v949_v22 = vadd.f32 %v707_v45, %v565_v7  ;;  %v2641_v5 = vld [vmem:[%s3612_s1 + $0x28] sm:$0xff]   ;;  %v1715_v7 = vsel %vm167_vm0, %v1584_v53, 0.0 }
  0xa7   : > { %v950_v27 = vadd.f32 %v709_v52, %v566_v14  ;;  %v1711_v52 = vsel %vm167_vm0, %v1582_v30, 0.0  ;;  %v1461_v13 = vld [vmem:[#allocation2 + $0x48] sm:$0xff] }
  0xa8   : > { %1077 = vst.msk [vmem:[#allocation2 + $0x60] sm:$0xff] %vm167_vm0, %v948_v18  ;;  %v1712_v56 = vadd.f32 %v1711_v52, %v1710_v46  ;;  %v573_v14 = vld [vmem:[#allocation2 + $0xa8] sm:$0xff]  ;;  %v2340_v18 = vunpack.c.l.bf16 %v2641_v5  ;;  %v1589_v26 = vmul.f32 %v2337_v9, %v1461_v13 }
  0xa9   : > { %1078 = vst.msk [vmem:[#allocation2 + $0x68] sm:$0xff] %vm167_vm0, %v949_v22  ;;  %v1462_v22 = vld [vmem:[#allocation2 + $0x50] sm:$0xff]  ;;  %v1463_v32 = vld [vmem:[#allocation2 + $0x58] sm:$0xff] }
  0xaa   : > { %794 = vadd.xlane.f32.xlu0 %v2177_v48  ;;  %796 = vadd.xlane.f32.xlu1 %v2180_v57  ;;  %1079 = vst.msk [vmem:[#allocation2 + $0x70] sm:$0xff] %vm167_vm0, %v950_v27  ;;  %v1458_v57 = vld [vmem:[#allocation2 + $0x30] sm:$0xff]  ;;  %v1714_v3 = vadd.f32 %v1713_v62, %v1712_v56  ;;  %v2341_v27 = vunpack.c.h.bf16 %v2641_v5  ;;  %v1590_v37 = vmul.f32 %v2340_v18, %v1462_v22 }
  0xab   : > { %798 = vadd.xlane.f32.xlu2 %v2181_v61  ;;  %v2605_v61 = vld [vmem:[%s2793_s16 + $0x100] sm:$0xff]  }
  0xac   : > { %v2192_v6 = vunpack.c.l.bf16 %v2605_v61  ;;  %v2193_v10 = vunpack.c.h.bf16 %v2605_v61  ;;  %v1716_v11 = vadd.f32 %v1715_v7, %v1714_v3  ;;  %v1591_v46 = vmul.f32 %v2341_v27, %v1463_v32 }
  0xad   : > { %v711_v2 = vpop.xlane.xlu0 %710  ;;  %v713_v8 = vpop.xlane.xlu1 %712  ;;  %v2349_v61 = vunpack.c.h.bf16 %v2643_v42 }
  0xae   : > { %v715_v20 = vpop.xlane.xlu2 %714  ;;  %v951_v33 = vadd.f32 %v711_v2, %v567_v19  ;;  %v952_v38 = vadd.f32 %v713_v8, %v568_v23  ;;  %v2189_v2 = vunpack.c.h.bf16 %v2604_v29  ;;  %v1586_v8 = vmul.f32 %v2332_v54, %v1458_v57  ;;  %v2642_v19 = vld [vmem:[%s3612_s1 + $0x30] sm:$0xff]   ;;  %v2606_v29 = vld [vmem:[%s2793_s16 + $0x108] sm:$0xff]  }
  0xaf   : > { %v953_v45 = vadd.f32 %v715_v20, %v569_v28  ;;  %v1718_v21 = vadd.f32 %v1717_v16, %v1716_v11  ;;  %v574_v23 = vld [vmem:[#allocation2 + $0xb0] sm:$0xff]  ;;  %v1464_v41 = vld [vmem:[#allocation2 + $0x60] sm:$0xff]  ;;  %v2197_v43 = vunpack.c.h.bf16 %v2606_v29  ;;  %v2345_v47 = vunpack.c.h.bf16 %v2642_v19  ;;  %v577_v54 = vld [vmem:[#allocation2 + $0xc8] sm:$0xff] }
  0xb0   : > { %1080 = vst.msk [vmem:[#allocation2 + $0x78] sm:$0xff] %vm167_vm0, %v951_v33  ;;  %v1719_v25 = vsel %vm167_vm0, %v1586_v8, 0.0  ;;  %v2344_v33 = vunpack.c.l.bf16 %v2642_v19  ;;  %v2348_v57 = vunpack.c.l.bf16 %v2643_v42  ;;  %v1729_v0 = vsel %vm167_vm0, %v1591_v46, 0.0  ;;  %v2608_v8 = vld [vmem:[%s2793_s16 + $0x118] sm:$0xff]  }
  0xb1   : > { %1081 = vst.msk [vmem:[#allocation2 + $0x80] sm:$0xff] %vm167_vm0, %v952_v38  ;;  %v1720_v30 = vadd.f32 %v1719_v25, %v1718_v21  ;;  %v2204_v12 = vunpack.c.l.bf16 %v2608_v8  ;;  %v579_v16 = vld [vmem:[#allocation2 + $0xd8] sm:$0xff]  ;;  %v2205_v17 = vunpack.c.h.bf16 %v2608_v8 }
  0xb2   : > { %800 = vadd.xlane.f32.xlu0 %v2184_v15  ;;  %802 = vadd.xlane.f32.xlu1 %v2185_v24  ;;  %1082 = vst.msk [vmem:[#allocation2 + $0x88] sm:$0xff] %vm167_vm0, %v953_v45  ;;  %v1725_v45 = vsel %vm167_vm0, %v1589_v26, 0.0  ;;  %v1592_v56 = vmul.f32 %v2344_v33, %v1464_v41 }
  0xb3   : > { %804 = vadd.xlane.f32.xlu2 %v2188_v34  ;;  %v575_v34 = vld [vmem:[#allocation2 + $0xb8] sm:$0xff] }
  0xb4   : > { %v1731_v9 = vsel %vm167_vm0, %v1592_v56, 0.0 }
  0xb5   : > { %v717_v40 = vpop.xlane.xlu0 %716  ;;  %v719_v51 = vpop.xlane.xlu1 %718 }
  0xb6   : > { %v954_v48 = vadd.f32 %v717_v40, %v570_v39  ;;  %v955_v55 = vadd.f32 %v719_v51, %v571_v50  ;;  %v721_v60 = vpop.xlane.xlu2 %720  ;;  %v2196_v39 = vunpack.c.l.bf16 %v2606_v29  ;;  %v1722_v40 = vadd.f32 %v1721_v31, %v1720_v30  ;;  %v1465_v51 = vld [vmem:[#allocation2 + $0x68] sm:$0xff] }
  0xb7   : > { %v956_v1 = vadd.f32 %v721_v60, %v572_v59  ;;  %v1466_v60 = vld [vmem:[#allocation2 + $0x70] sm:$0xff]  ;;  %v1467_v5 = vld [vmem:[#allocation2 + $0x78] sm:$0xff] }
  0xb8   : > { %1083 = vst.msk [vmem:[#allocation2 + $0x90] sm:$0xff] %vm167_vm0, %v954_v48  ;;  %v2607_v48 = vld [vmem:[%s2793_s16 + $0x110] sm:$0xff]   ;;  %v1724_v50 = vadd.f32 %v1723_v36, %v1722_v40  ;;  %v1595_v19 = vmul.f32 %v2349_v61, %v1467_v5  ;;  %v2648_v5 = vld [vmem:[%s3612_s1 + $0x60] sm:$0xff]  }
  0xb9   : > { %1084 = vst.msk [vmem:[#allocation2 + $0x98] sm:$0xff] %vm167_vm0, %v955_v55  ;;  %v2200_v53 = vunpack.c.l.bf16 %v2607_v48  ;;  %v1727_v55 = vsel %vm167_vm0, %v1590_v37, 0.0  ;;  %v2201_v3 = vunpack.c.h.bf16 %v2607_v48  ;;  %v1469_v22 = vld [vmem:[#allocation2 + $0x88] sm:$0xff] }
  0xba   : > { %806 = vadd.xlane.f32.xlu0 %v2189_v2  ;;  %1085 = vst.msk [vmem:[#allocation2 + $0xa0] sm:$0xff] %vm167_vm0, %v956_v1  ;;  %808 = vadd.xlane.f32.xlu1 %v2192_v6  ;;  %v1726_v59 = vadd.f32 %v1725_v45, %v1724_v50  ;;  %v1593_v1 = vmul.f32 %v2345_v47, %v1465_v51  ;;  %v2352_v6 = vunpack.c.l.bf16 %v2644_v49  ;;  %v1737_v36 = vsel %vm167_vm0, %v1595_v19, 0.0 }
  0xbb   : > { %810 = vadd.xlane.f32.xlu2 %v2193_v10  ;;  %v1594_v10 = vmul.f32 %v2348_v57, %v1466_v60  ;;  %v583_v60 = vld [vmem:[#allocation2 + $0xf8] sm:$0xff] }
  0xbc   : > { %v1728_v4 = vadd.f32 %v1727_v55, %v1726_v59  ;;  %v1733_v18 = vsel %vm167_vm0, %v1593_v1, 0.0  ;;  %v2611_v1 = vld [vmem:[%s2793_s16 + $0x130] sm:$0xff]  }
  0xbd   : > { %v723_v15 = vpop.xlane.xlu0 %722  ;;  %v725_v24 = vpop.xlane.xlu1 %724  ;;  %v1735_v25 = vsel %vm167_vm0, %v1594_v10, 0.0 }
  0xbe   : > { %v957_v20 = vadd.f32 %v723_v15, %v573_v14  ;;  %v958_v28 = vadd.f32 %v725_v24, %v574_v23  ;;  %v727_v35 = vpop.xlane.xlu2 %726  ;;  %v1730_v13 = vadd.f32 %v1729_v0, %v1728_v4  ;;  %v1468_v14 = vld [vmem:[#allocation2 + $0x80] sm:$0xff]  ;;  %v2645_v15 = vld [vmem:[%s3612_s1 + $0x48] sm:$0xff]  }
  0xbf   : > { %v959_v38 = vadd.f32 %v727_v35, %v575_v34  ;;  %v580_v24 = vld [vmem:[#allocation2 + $0xe0] sm:$0xff]  ;;  %v1596_v26 = vmul.f32 %v2352_v6, %v1468_v14  ;;  %v2356_v27 = vunpack.c.l.bf16 %v2645_v15  ;;  %v1470_v31 = vld [vmem:[#allocation2 + $0x90] sm:$0xff]  ;;  %v2357_v32 = vunpack.c.h.bf16 %v2645_v15  ;;  %v581_v34 = vld [vmem:[#allocation2 + $0xe8] sm:$0xff] }
  0xc0   : > { %1086 = vst.msk [vmem:[#allocation2 + $0xa8] sm:$0xff] %vm167_vm0, %v957_v20  ;;  %v2353_v20 = vunpack.c.h.bf16 %v2644_v49  ;;  %v1732_v21 = vadd.f32 %v1731_v9, %v1730_v13  ;;  %v2609_v35 = vld [vmem:[%s2793_s16 + $0x120] sm:$0xff]   ;;  %v1471_v41 = vld [vmem:[#allocation2 + $0x98] sm:$0xff]  ;;  %v2216_v15 = vunpack.c.l.bf16 %v2611_v1 }
  0xc1   : > { %1087 = vst.msk [vmem:[#allocation2 + $0xb0] sm:$0xff] %vm167_vm0, %v958_v28  ;;  %v2646_v28 = vld [vmem:[%s3612_s1 + $0x50] sm:$0xff]   ;;  %v1739_v45 = vsel %vm167_vm0, %v1596_v26, 0.0  ;;  %v1598_v46 = vmul.f32 %v2356_v27, %v1470_v31  ;;  %v1472_v51 = vld [vmem:[#allocation2 + $0xa0] sm:$0xff]  ;;  %v1599_v56 = vmul.f32 %v2357_v32, %v1471_v41  ;;  %v2369_v27 = vunpack.c.h.bf16 %v2648_v5  ;;  %v2612_v32 = vld [vmem:[%s2793_s16 + $0x138] sm:$0xff]  }
  0xc2   : > { %1088 = vst.msk [vmem:[#allocation2 + $0xb8] sm:$0xff] %vm167_vm0, %v959_v38  ;;  %812 = vadd.xlane.f32.xlu0 %v2196_v39  ;;  %814 = vadd.xlane.f32.xlu1 %v2197_v43  ;;  %v1734_v30 = vadd.f32 %v1733_v18, %v1732_v21  ;;  %v1597_v37 = vmul.f32 %v2353_v20, %v1469_v22  ;;  %v2208_v39 = vunpack.c.l.bf16 %v2609_v35  ;;  %v2209_v43 = vunpack.c.h.bf16 %v2609_v35  ;;  %v2649_v22 = vld [vmem:[%s3612_s1 + $0x68] sm:$0xff]   ;;  %v586_v31 = vld [vmem:[#allocation2 + $0x110] sm:$0xff] }
  0xc3   : > { %816 = vadd.xlane.f32.xlu2 %v2200_v53  ;;  %v2360_v47 = vunpack.c.l.bf16 %v2646_v28  ;;  %v582_v53 = vld [vmem:[#allocation2 + $0xf0] sm:$0xff]  ;;  %v2361_v57 = vunpack.c.h.bf16 %v2646_v28  ;;  %v1743_v61 = vsel %vm167_vm0, %v1598_v46, 0.0  ;;  %v1745_v8 = vsel %vm167_vm0, %v1599_v56, 0.0 }
  0xc4   : > { %v1736_v40 = vadd.f32 %v1735_v25, %v1734_v30  ;;  %v1741_v55 = vsel %vm167_vm0, %v1597_v37, 0.0  ;;  %v2368_v18 = vunpack.c.l.bf16 %v2648_v5  ;;  %v2372_v35 = vunpack.c.l.bf16 %v2649_v22 }
  0xc5   : > { %v729_v52 = vpop.xlane.xlu0 %728  ;;  %v731_v62 = vpop.xlane.xlu1 %730  ;;  %v2220_v46 = vunpack.c.l.bf16 %v2612_v32 }
  0xc6   : > { %v960_v58 = vadd.f32 %v729_v52, %v576_v44  ;;  %v961_v2 = vadd.f32 %v731_v62, %v577_v54  ;;  %v733_v7 = vpop.xlane.xlu2 %732  ;;  %v2610_v44 = vld [vmem:[%s2793_s16 + $0x128] sm:$0xff]   ;;  %v1738_v50 = vadd.f32 %v1737_v36, %v1736_v40  ;;  %v2647_v52 = vld [vmem:[%s3612_s1 + $0x58] sm:$0xff]   ;;  %v1600_v62 = vmul.f32 %v2360_v47, %v1472_v51  ;;  %v2650_v40 = vld [vmem:[%s3612_s1 + $0x70] sm:$0xff]  }
  0xc7   : > { %v962_v11 = vadd.f32 %v733_v7, %v578_v63  ;;  %v2212_v54 = vunpack.c.l.bf16 %v2610_v44  ;;  %v2364_v63 = vunpack.c.l.bf16 %v2647_v52  ;;  %v2365_v4 = vunpack.c.h.bf16 %v2647_v52  ;;  %v584_v7 = vld [vmem:[#allocation2 + $0x100] sm:$0xff] }
  0xc8   : > { %1089 = vst.msk [vmem:[#allocation2 + $0xc0] sm:$0xff] %vm167_vm0, %v960_v58  ;;  %v1740_v49 = vadd.f32 %v1739_v45, %v1738_v50  ;;  %v1473_v58 = vld [vmem:[#allocation2 + $0xa8] sm:$0xff]  ;;  %v2613_v47 = vld [vmem:[%s2793_s16 + $0x140] sm:$0xff]   ;;  %v2221_v52 = vunpack.c.h.bf16 %v2612_v32 }
  0xc9   : > { %1090 = vst.msk [vmem:[#allocation2 + $0xc8] sm:$0xff] %vm167_vm0, %v961_v2  ;;  %v1601_v9 = vmul.f32 %v2361_v57, %v1473_v58  ;;  %v1475_v13 = vld [vmem:[#allocation2 + $0xb8] sm:$0xff] }
  0xca   : > { %1091 = vst.msk [vmem:[#allocation2 + $0xd0] sm:$0xff] %vm167_vm0, %v962_v11  ;;  %818 = vadd.xlane.f32.xlu0 %v2201_v3  ;;  %820 = vadd.xlane.f32.xlu1 %v2204_v12  ;;  %v1742_v2 = vadd.f32 %v1741_v55, %v1740_v49  ;;  %v1474_v3 = vld [vmem:[#allocation2 + $0xb0] sm:$0xff]  ;;  %v2213_v11 = vunpack.c.h.bf16 %v2610_v44  ;;  %v1603_v26 = vmul.f32 %v2365_v4, %v1475_v13  ;;  %v2376_v55 = vunpack.c.l.bf16 %v2650_v40  ;;  %v2651_v58 = vld [vmem:[%s3612_s1 + $0x78] sm:$0xff]  }
  0xcb   : > { %822 = vadd.xlane.f32.xlu2 %v2205_v17  ;;  %v1602_v17 = vmul.f32 %v2364_v63, %v1474_v3  ;;  %v1749_v25 = vsel %vm167_vm0, %v1601_v9, 0.0  ;;  %v2377_v63 = vunpack.c.h.bf16 %v2650_v40  ;;  %v589_v3 = vld [vmem:[#allocation2 + $0x128] sm:$0xff] }
  0xcc   : > { %v1744_v12 = vadd.f32 %v1743_v61, %v1742_v2 }
  0xcd   : > { %v735_v23 = vpop.xlane.xlu0 %734  ;;  %v737_v33 = vpop.xlane.xlu1 %736 }
  0xce   : > { %v963_v29 = vadd.f32 %v735_v23, %v579_v16  ;;  %v964_v38 = vadd.f32 %v737_v33, %v580_v24  ;;  %v739_v42 = vpop.xlane.xlu2 %738  ;;  %v1747_v16 = vsel %vm167_vm0, %v1600_v62, 0.0  ;;  %v1746_v20 = vadd.f32 %v1745_v8, %v1744_v12  ;;  %v585_v23 = vld [vmem:[#allocation2 + $0x108] sm:$0xff]  ;;  %v2652_v12 = vld [vmem:[%s3612_s1 + $0x80] sm:$0xff]  }
  0xcf   : > { %v965_v48 = vadd.f32 %v739_v42, %v581_v34  ;;  %v1476_v21 = vld [vmem:[#allocation2 + $0xc0] sm:$0xff]  ;;  %v2217_v24 = vunpack.c.h.bf16 %v2611_v1  ;;  %v1751_v33 = vsel %vm167_vm0, %v1602_v17, 0.0  ;;  %v587_v42 = vld [vmem:[#allocation2 + $0x118] sm:$0xff]  ;;  %v2614_v8 = vld [vmem:[%s2793_s16 + $0x148] sm:$0xff]  }
  0xd0   : > { %1092 = vst.msk [vmem:[#allocation2 + $0xd8] sm:$0xff] %vm167_vm0, %v963_v29  ;;  %v1748_v28 = vadd.f32 %v1747_v16, %v1746_v20  ;;  %v1477_v29 = vld [vmem:[#allocation2 + $0xc8] sm:$0xff]  ;;  %v1604_v34 = vmul.f32 %v2368_v18, %v1476_v21  ;;  %v2225_v18 = vunpack.c.h.bf16 %v2613_v47 }
  0xd1   : > { %1093 = vst.msk [vmem:[#allocation2 + $0xe0] sm:$0xff] %vm167_vm0, %v964_v38  ;;  %v1478_v38 = vld [vmem:[#allocation2 + $0xd0] sm:$0xff]  ;;  %v1605_v44 = vmul.f32 %v2369_v27, %v1477_v29  ;;  %v2653_v29 = vld [vmem:[%s3612_s1 + $0x88] sm:$0xff]  }
  0xd2   : > { %1094 = vst.msk [vmem:[#allocation2 + $0xe8] sm:$0xff] %vm167_vm0, %v965_v48  ;;  %824 = vadd.xlane.f32.xlu0 %v2208_v39  ;;  %826 = vadd.xlane.f32.xlu1 %v2209_v43  ;;  %v1750_v37 = vadd.f32 %v1749_v25, %v1748_v28  ;;  %v2373_v39 = vunpack.c.h.bf16 %v2649_v22  ;;  %v1753_v43 = vsel %vm167_vm0, %v1603_v26, 0.0  ;;  %v2228_v22 = vunpack.c.l.bf16 %v2614_v8 }
  0xd3   : > { %828 = vadd.xlane.f32.xlu2 %v2212_v54  ;;  %v1606_v54 = vmul.f32 %v2372_v35, %v1478_v38  ;;  %v1757_v61 = vsel %vm167_vm0, %v1605_v44, 0.0  ;;  %v2384_v25 = vunpack.c.l.bf16 %v2652_v12  ;;  %v592_v38 = vld [vmem:[#allocation2 + $0x140] sm:$0xff] }
  0xd4   : > { %v1752_v48 = vadd.f32 %v1751_v33, %v1750_v37 }
  0xd5   : > { %v741_v59 = vpop.xlane.xlu0 %740  ;;  %v743_v6 = vpop.xlane.xlu1 %742  ;;  %v1759_v4 = vsel %vm167_vm0, %v1606_v54, 0.0 }
  0xd6   : > { %v966_v0 = vadd.f32 %v741_v59, %v582_v53  ;;  %v967_v10 = vadd.f32 %v743_v6, %v583_v60  ;;  %v745_v14 = vpop.xlane.xlu2 %744  ;;  %v1755_v53 = vsel %vm167_vm0, %v1604_v34, 0.0  ;;  %v1754_v57 = vadd.f32 %v1753_v43, %v1752_v48  ;;  %v588_v59 = vld [vmem:[#allocation2 + $0x120] sm:$0xff] }
  0xd7   : > { %v968_v19 = vadd.f32 %v745_v14, %v584_v7  ;;  %v1479_v50 = vld [vmem:[#allocation2 + $0xd8] sm:$0xff]  ;;  %v2224_v60 = vunpack.c.l.bf16 %v2613_v47  ;;  %v2380_v6 = vunpack.c.l.bf16 %v2651_v58  ;;  %v590_v14 = vld [vmem:[#allocation2 + $0x130] sm:$0xff]  ;;  %v2385_v34 = vunpack.c.h.bf16 %v2652_v12 }
  0xd8   : > { %1095 = vst.msk [vmem:[#allocation2 + $0xf0] sm:$0xff] %vm167_vm0, %v966_v0  ;;  %v1480_v49 = vld [vmem:[#allocation2 + $0xe0] sm:$0xff]  ;;  %v1607_v62 = vmul.f32 %v2373_v39, %v1479_v50  ;;  %v1756_v0 = vadd.f32 %v1755_v53, %v1754_v57  ;;  %v2615_v39 = vld [vmem:[%s2793_s16 + $0x150] sm:$0xff]   ;;  %v593_v50 = vld [vmem:[#allocation2 + $0x148] sm:$0xff] }
  0xd9   : > { %1096 = vst.msk [vmem:[#allocation2 + $0xf8] sm:$0xff] %vm167_vm0, %v967_v10  ;;  %v1481_v1 = vld [vmem:[#allocation2 + $0xe8] sm:$0xff]  ;;  %v1608_v5 = vmul.f32 %v2376_v55, %v1480_v49  ;;  %v2654_v47 = vld [vmem:[%s3612_s1 + $0x90] sm:$0xff]   ;;  %v2232_v54 = vunpack.c.l.bf16 %v2615_v39  ;;  %v2616_v55 = vld [vmem:[%s2793_s16 + $0x158] sm:$0xff]  }
  0xda   : > { %1097 = vst.msk [vmem:[#allocation2 + $0x100] sm:$0xff] %vm167_vm0, %v968_v19  ;;  %830 = vadd.xlane.f32.xlu0 %v2213_v11  ;;  %832 = vadd.xlane.f32.xlu1 %v2216_v15  ;;  %v1758_v9 = vadd.f32 %v1757_v61, %v1756_v0  ;;  %v2381_v11 = vunpack.c.h.bf16 %v2651_v58  ;;  %v1761_v15 = vsel %vm167_vm0, %v1607_v62, 0.0  ;;  %v1609_v16 = vmul.f32 %v2377_v63, %v1481_v1  ;;  %v2655_v1 = vld [vmem:[%s3612_s1 + $0x98] sm:$0xff]  }
  0xdb   : > { %834 = vadd.xlane.f32.xlu2 %v2217_v24  ;;  %v2233_v58 = vunpack.c.h.bf16 %v2615_v39  ;;  %v2392_v61 = vunpack.c.l.bf16 %v2654_v47 }
  0xdc   : > { %v1760_v19 = vadd.f32 %v1759_v4, %v1758_v9  ;;  %v1765_v32 = vsel %vm167_vm0, %v1609_v16, 0.0 }
  0xdd   : > { %v747_v30 = vpop.xlane.xlu0 %746  ;;  %v749_v41 = vpop.xlane.xlu1 %748 }
  0xde   : > { %v969_v36 = vadd.f32 %v747_v30, %v585_v23  ;;  %v970_v45 = vadd.f32 %v749_v41, %v586_v31  ;;  %v751_v51 = vpop.xlane.xlu2 %750  ;;  %v1763_v23 = vsel %vm167_vm0, %v1608_v5, 0.0  ;;  %v1762_v27 = vadd.f32 %v1761_v15, %v1760_v19  ;;  %v591_v30 = vld [vmem:[#allocation2 + $0x138] sm:$0xff]  ;;  %v2617_v15 = vld [vmem:[%s2793_s16 + $0x160] sm:$0xff]  }
  0xdf   : > { %v971_v56 = vadd.f32 %v751_v51, %v587_v42  ;;  %v1482_v10 = vld [vmem:[#allocation2 + $0xf0] sm:$0xff]  ;;  %v2229_v31 = vunpack.c.h.bf16 %v2614_v8  ;;  %v2388_v42 = vunpack.c.l.bf16 %v2653_v29  ;;  %v2656_v19 = vld [vmem:[%s3612_s1 + $0xa0] sm:$0xff]  }
  0xe0   : > { %1098 = vst.msk [vmem:[#allocation2 + $0x108] sm:$0xff] %vm167_vm0, %v969_v36  ;;  %v1483_v20 = vld [vmem:[#allocation2 + $0xf8] sm:$0xff]  ;;  %v1610_v24 = vmul.f32 %v2380_v6, %v1482_v10  ;;  %v1764_v35 = vadd.f32 %v1763_v23, %v1762_v27  ;;  %v2393_v6 = vunpack.c.h.bf16 %v2654_v47 }
  0xe1   : > { %1099 = vst.msk [vmem:[#allocation2 + $0x110] sm:$0xff] %vm167_vm0, %v970_v45  ;;  %v1484_v28 = vld [vmem:[#allocation2 + $0x100] sm:$0xff]  ;;  %v1611_v33 = vmul.f32 %v2381_v11, %v1483_v20  ;;  %v595_v10 = vld [vmem:[#allocation2 + $0x158] sm:$0xff] }
  0xe2   : > { %1100 = vst.msk [vmem:[#allocation2 + $0x118] sm:$0xff] %vm167_vm0, %v971_v56  ;;  %836 = vadd.xlane.f32.xlu0 %v2220_v46  ;;  %838 = vadd.xlane.f32.xlu1 %v2221_v52  ;;  %v1767_v40 = vsel %vm167_vm0, %v1610_v24, 0.0  ;;  %v1612_v41 = vmul.f32 %v2384_v25, %v1484_v28  ;;  %v1766_v44 = vadd.f32 %v1765_v32, %v1764_v35  ;;  %v2389_v46 = vunpack.c.h.bf16 %v2653_v29 }
  0xe3   : > { %840 = vadd.xlane.f32.xlu2 %v2224_v60  ;;  %v1769_v51 = vsel %vm167_vm0, %v1611_v33, 0.0  ;;  %v2237_v25 = vunpack.c.h.bf16 %v2616_v55  ;;  %v2240_v29 = vunpack.c.l.bf16 %v2617_v15  ;;  %v2400_v32 = vunpack.c.l.bf16 %v2656_v19 }
  0xe4   : > { %v1768_v56 = vadd.f32 %v1767_v40, %v1766_v44 }
  0xe5   : > { %v753_v2 = vpop.xlane.xlu0 %752  ;;  %v755_v13 = vpop.xlane.xlu1 %754 }
  0xe6   : > { %v972_v7 = vadd.f32 %v753_v2, %v588_v59  ;;  %v973_v17 = vadd.f32 %v755_v13, %v589_v3  ;;  %v757_v21 = vpop.xlane.xlu2 %756  ;;  %v1771_v59 = vsel %vm167_vm0, %v1612_v41, 0.0  ;;  %v1770_v63 = vadd.f32 %v1769_v51, %v1768_v56  ;;  %v594_v2 = vld [vmem:[#allocation2 + $0x150] sm:$0xff] }
  0xe7   : > { %v974_v26 = vadd.f32 %v757_v21, %v590_v14  ;;  %v1485_v36 = vld [vmem:[#allocation2 + $0x108] sm:$0xff]  ;;  %v2236_v3 = vunpack.c.l.bf16 %v2616_v55  ;;  %v2396_v13 = vunpack.c.l.bf16 %v2655_v1  ;;  %v596_v21 = vld [vmem:[#allocation2 + $0x160] sm:$0xff]  ;;  %v2401_v41 = vunpack.c.h.bf16 %v2656_v19  ;;  %v2658_v55 = vld [vmem:[%s3612_s1 + $0xb0] sm:$0xff]  }
  0xe8   : > { %1101 = vst.msk [vmem:[#allocation2 + $0x120] sm:$0xff] %vm167_vm0, %v972_v7  ;;  %v1486_v45 = vld [vmem:[#allocation2 + $0x110] sm:$0xff]  ;;  %v1613_v52 = vmul.f32 %v2385_v34, %v1485_v36  ;;  %v1772_v7 = vadd.f32 %v1771_v59, %v1770_v63  ;;  %v2657_v36 = vld [vmem:[%s3612_s1 + $0xa8] sm:$0xff]  }
  0xe9   : > { %1102 = vst.msk [vmem:[#allocation2 + $0x128] sm:$0xff] %vm167_vm0, %v973_v17  ;;  %v1487_v57 = vld [vmem:[#allocation2 + $0x118] sm:$0xff]  ;;  %v1614_v60 = vmul.f32 %v2388_v42, %v1486_v45  ;;  %v598_v45 = vld [vmem:[#allocation2 + $0x170] sm:$0xff] }
  0xea   : > { %1103 = vst.msk [vmem:[#allocation2 + $0x130] sm:$0xff] %vm167_vm0, %v974_v26  ;;  %842 = vadd.xlane.f32.xlu0 %v2225_v18  ;;  %844 = vadd.xlane.f32.xlu1 %v2228_v22  ;;  %v1773_v4 = vsel %vm167_vm0, %v1613_v52, 0.0  ;;  %v1615_v5 = vmul.f32 %v2389_v46, %v1487_v57  ;;  %v2397_v18 = vunpack.c.h.bf16 %v2655_v1  ;;  %v2618_v46 = vld [vmem:[%s2793_s16 + $0x168] sm:$0xff]   ;;  %v599_v57 = vld [vmem:[#allocation2 + $0x178] sm:$0xff] }
  0xeb   : > { %846 = vadd.xlane.f32.xlu2 %v2229_v31  ;;  %v1775_v11 = vsel %vm167_vm0, %v1614_v60, 0.0  ;;  %v1774_v16 = vadd.f32 %v1773_v4, %v1772_v7  ;;  %v2244_v60 = vunpack.c.l.bf16 %v2618_v46  ;;  %v2245_v1 = vunpack.c.h.bf16 %v2618_v46  ;;  %v2661_v46 = vld [vmem:[%s3612_s1 + $0xc8] sm:$0xff]  }
  0xec   : > { %v1777_v22 = vsel %vm167_vm0, %v1615_v5, 0.0  ;;  %v2408_v4 = vunpack.c.l.bf16 %v2658_v55 }
  0xed   : > { %v759_v37 = vpop.xlane.xlu0 %758  ;;  %v761_v48 = vpop.xlane.xlu1 %760  ;;  %v1776_v26 = vadd.f32 %v1775_v11, %v1774_v16  ;;  %v601_v16 = vld [vmem:[#allocation2 + $0x188] sm:$0xff] }
  0xee   : > { %v975_v43 = vadd.f32 %v759_v37, %v591_v30  ;;  %v976_v53 = vadd.f32 %v761_v48, %v592_v38  ;;  %v763_v49 = vpop.xlane.xlu2 %762  ;;  %v597_v37 = vld [vmem:[#allocation2 + $0x168] sm:$0xff]  ;;  %v2241_v38 = vunpack.c.h.bf16 %v2617_v15 }
  0xef   : > { %v977_v62 = vadd.f32 %v763_v49, %v593_v50  ;;  %v1488_v0 = vld [vmem:[#allocation2 + $0x120] sm:$0xff]  ;;  %v1778_v34 = vadd.f32 %v1777_v22, %v1776_v26  ;;  %v2404_v50 = vunpack.c.l.bf16 %v2657_v36  ;;  %v602_v26 = vld [vmem:[#allocation2 + $0x190] sm:$0xff] }
  0xf0   : > { %1104 = vst.msk [vmem:[#allocation2 + $0x138] sm:$0xff] %vm167_vm0, %v975_v43  ;;  %v1489_v8 = vld [vmem:[#allocation2 + $0x128] sm:$0xff]  ;;  %v1616_v12 = vmul.f32 %v2392_v61, %v1488_v0  ;;  %v2619_v61 = vld [vmem:[%s2793_s16 + $0x170] sm:$0xff]  }
  0xf1   : > { %1105 = vst.msk [vmem:[#allocation2 + $0x140] sm:$0xff] %vm167_vm0, %v976_v53  ;;  %v1490_v17 = vld [vmem:[#allocation2 + $0x130] sm:$0xff]  ;;  %v1617_v23 = vmul.f32 %v2393_v6, %v1489_v8  ;;  %v2659_v8 = vld [vmem:[%s3612_s1 + $0xb8] sm:$0xff]  }
  0xf2   : > { %1106 = vst.msk [vmem:[#allocation2 + $0x148] sm:$0xff] %vm167_vm0, %v977_v62  ;;  %848 = vadd.xlane.f32.xlu0 %v2232_v54  ;;  %850 = vadd.xlane.f32.xlu1 %v2233_v58  ;;  %v1779_v30 = vsel %vm167_vm0, %v1616_v12, 0.0  ;;  %v1618_v31 = vmul.f32 %v2396_v13, %v1490_v17  ;;  %v2405_v54 = vunpack.c.h.bf16 %v2657_v36  ;;  %v2409_v13 = vunpack.c.h.bf16 %v2658_v55 }
  0xf3   : > { %852 = vadd.xlane.f32.xlu2 %v2236_v3  ;;  %v1781_v39 = vsel %vm167_vm0, %v1617_v23, 0.0  ;;  %v1780_v42 = vadd.f32 %v1779_v30, %v1778_v34  ;;  %v2412_v19 = vunpack.c.l.bf16 %v2659_v8  ;;  %v2249_v30 = vunpack.c.h.bf16 %v2619_v61 }
  0xf4   : > { %v1783_v47 = vsel %vm167_vm0, %v1618_v31, 0.0 }
  0xf5   : > { %v765_v9 = vpop.xlane.xlu0 %764  ;;  %v767_v20 = vpop.xlane.xlu1 %766  ;;  %v1782_v52 = vadd.f32 %v1781_v39, %v1780_v42 }
  0xf6   : > { %v978_v14 = vadd.f32 %v765_v9, %v594_v2  ;;  %v979_v24 = vadd.f32 %v767_v20, %v595_v10  ;;  %v769_v28 = vpop.xlane.xlu2 %768  ;;  %v600_v9 = vld [vmem:[#allocation2 + $0x180] sm:$0xff]  ;;  %v2248_v10 = vunpack.c.l.bf16 %v2619_v61 }
  0xf7   : > { %v1491_v27 = vld [vmem:[#allocation2 + $0x138] sm:$0xff]  ;;  %v980_v33 = vadd.f32 %v769_v28, %v596_v21  ;;  %v1784_v62 = vadd.f32 %v1783_v47, %v1782_v52 }
  0xf8   : > { %1107 = vst.msk [vmem:[#allocation2 + $0x150] sm:$0xff] %vm167_vm0, %v978_v14  ;;  %v1492_v35 = vld [vmem:[#allocation2 + $0x140] sm:$0xff]  ;;  %v1619_v40 = vmul.f32 %v2397_v18, %v1491_v27  ;;  %v2620_v21 = vld [vmem:[%s2793_s16 + $0x178] sm:$0xff]  }
  0xf9   : > { %1108 = vst.msk [vmem:[#allocation2 + $0x158] sm:$0xff] %vm167_vm0, %v979_v24  ;;  %v1493_v43 = vld [vmem:[#allocation2 + $0x148] sm:$0xff]  ;;  %v1620_v48 = vmul.f32 %v2400_v32, %v1492_v35  ;;  %v2413_v24 = vunpack.c.h.bf16 %v2659_v8  ;;  %v2252_v35 = vunpack.c.l.bf16 %v2620_v21  ;;  %v2253_v42 = vunpack.c.h.bf16 %v2620_v21  ;;  %v2623_v21 = vld [vmem:[%s2793_s16 + $0x190] sm:$0xff]  }
  0xfa   : > { %1109 = vst.msk [vmem:[#allocation2 + $0x160] sm:$0xff] %vm167_vm0, %v980_v33  ;;  %854 = vadd.xlane.f32.xlu0 %v2237_v25  ;;  %856 = vadd.xlane.f32.xlu1 %v2240_v29  ;;  %v1785_v49 = vsel %vm167_vm0, %v1619_v40, 0.0  ;;  %v1621_v58 = vmul.f32 %v2401_v41, %v1493_v43  ;;  %v2660_v33 = vld [vmem:[%s3612_s1 + $0xc0] sm:$0xff]   ;;  %v603_v41 = vld [vmem:[#allocation2 + $0x198] sm:$0xff] }
  0xfb   : > { %858 = vadd.xlane.f32.xlu2 %v2241_v38  ;;  %v1787_v2 = vsel %vm167_vm0, %v1620_v48, 0.0  ;;  %v1786_v6 = vadd.f32 %v1785_v49, %v1784_v62 }
  0xfc   : > { %v1789_v11 = vsel %vm167_vm0, %v1621_v58, 0.0  ;;  %v605_v58 = vld [vmem:[#allocation2 + $0x1a8] sm:$0xff] }
  0xfd   : > { %v771_v44 = vpop.xlane.xlu0 %770  ;;  %v773_v56 = vpop.xlane.xlu1 %772  ;;  %v1788_v14 = vadd.f32 %v1787_v2, %v1786_v6 }
  0xfe   : > { %v981_v51 = vadd.f32 %v771_v44, %v597_v37  ;;  %v982_v59 = vadd.f32 %v773_v56, %v598_v45  ;;  %v775_v0 = vpop.xlane.xlu2 %774  ;;  %v2416_v45 = vunpack.c.l.bf16 %v2660_v33 }
  0xff   : > { %v1494_v53 = vld [vmem:[#allocation2 + $0x150] sm:$0xff]  ;;  %v983_v5 = vadd.f32 %v775_v0, %v599_v57  ;;  %v1790_v22 = vadd.f32 %v1789_v11, %v1788_v14  ;;  %v2420_v57 = vunpack.c.l.bf16 %v2661_v46  ;;  %v2421_v14 = vunpack.c.h.bf16 %v2661_v46  ;;  %v2664_v46 = vld [vmem:[%s3612_s1 + $0xe0] sm:$0xff]  }
 0x100   : > { %1110 = vst.msk [vmem:[#allocation2 + $0x168] sm:$0xff] %vm167_vm0, %v981_v51  ;;  %v1495_v63 = vld [vmem:[#allocation2 + $0x158] sm:$0xff]  ;;  %v1622_v3 = vmul.f32 %v2404_v50, %v1494_v53  ;;  %v604_v50 = vld [vmem:[#allocation2 + $0x1a0] sm:$0xff]  ;;  %v2417_v53 = vunpack.c.h.bf16 %v2660_v33 }
 0x101   : > { %1111 = vst.msk [vmem:[#allocation2 + $0x170] sm:$0xff] %vm167_vm0, %v982_v59  ;;  %v1496_v7 = vld [vmem:[#allocation2 + $0x160] sm:$0xff]  ;;  %v1623_v12 = vmul.f32 %v2405_v54, %v1495_v63  ;;  %v2622_v63 = vld [vmem:[%s2793_s16 + $0x188] sm:$0xff]  }
 0x102   : > { %1112 = vst.msk [vmem:[#allocation2 + $0x178] sm:$0xff] %vm167_vm0, %v983_v5  ;;  %860 = vadd.xlane.f32.xlu0 %v2244_v60  ;;  %862 = vadd.xlane.f32.xlu1 %v2245_v1  ;;  %v1791_v17 = vsel %vm167_vm0, %v1622_v3, 0.0  ;;  %v1624_v18 = vmul.f32 %v2408_v4, %v1496_v7  ;;  %v2621_v51 = vld [vmem:[%s2793_s16 + $0x180] sm:$0xff]   ;;  %v2260_v11 = vunpack.c.l.bf16 %v2622_v63 }
 0x103   : > { %864 = vadd.xlane.f32.xlu2 %v2248_v10  ;;  %v1793_v27 = vsel %vm167_vm0, %v1623_v12, 0.0  ;;  %v1792_v31 = vadd.f32 %v1791_v17, %v1790_v22  ;;  %v2256_v62 = vunpack.c.l.bf16 %v2621_v51  ;;  %v2257_v3 = vunpack.c.h.bf16 %v2621_v51  ;;  %v606_v10 = vld [vmem:[#allocation2 + $0x1b0] sm:$0xff]  ;;  %v607_v17 = vld [vmem:[#allocation2 + $0x1b8] sm:$0xff] }
 0x104   : > { %v1795_v36 = vsel %vm167_vm0, %v1624_v18, 0.0 }
 0x105   : > { %v777_v15 = vpop.xlane.xlu0 %776  ;;  %v779_v25 = vpop.xlane.xlu1 %778  ;;  %v1794_v39 = vadd.f32 %v1793_v27, %v1792_v31 }
 0x106   : > { %v984_v20 = vadd.f32 %v777_v15, %v600_v9  ;;  %v985_v29 = vadd.f32 %v779_v25, %v601_v16  ;;  %v781_v34 = vpop.xlane.xlu2 %780  ;;  %v2662_v9 = vld [vmem:[%s3612_s1 + $0xd0] sm:$0xff]   ;;  %v608_v25 = vld [vmem:[#allocation2 + $0x1c0] sm:$0xff] }
 0x107   : > { %v1497_v23 = vld [vmem:[#allocation2 + $0x168] sm:$0xff]  ;;  %v986_v38 = vadd.f32 %v781_v34, %v602_v26  ;;  %v1796_v47 = vadd.f32 %v1795_v36, %v1794_v39  ;;  %v2425_v27 = vunpack.c.h.bf16 %v2662_v9  ;;  %v2264_v34 = vunpack.c.l.bf16 %v2623_v21 }
 0x108   : > { %v1625_v28 = vmul.f32 %v2409_v13, %v1497_v23  ;;  %1113 = vst.msk [vmem:[#allocation2 + $0x180] sm:$0xff] %vm167_vm0, %v984_v20  ;;  %v1498_v32 = vld [vmem:[#allocation2 + $0x170] sm:$0xff] }
 0x109   : > { %v1626_v37 = vmul.f32 %v2412_v19, %v1498_v32  ;;  %1114 = vst.msk [vmem:[#allocation2 + $0x188] sm:$0xff] %vm167_vm0, %v985_v29  ;;  %v1499_v40 = vld [vmem:[#allocation2 + $0x178] sm:$0xff]  ;;  %v2424_v19 = vunpack.c.l.bf16 %v2662_v9  ;;  %v2261_v29 = vunpack.c.h.bf16 %v2622_v63 }
 0x10a   : > { %v1797_v43 = vsel %vm167_vm0, %v1625_v28, 0.0  ;;  %v1627_v44 = vmul.f32 %v2413_v24, %v1499_v40  ;;  %1115 = vst.msk [vmem:[#allocation2 + $0x190] sm:$0xff] %vm167_vm0, %v986_v38  ;;  %866 = vadd.xlane.f32.xlu0 %v2249_v30  ;;  %868 = vadd.xlane.f32.xlu1 %v2252_v35  ;;  %v2663_v32 = vld [vmem:[%s3612_s1 + $0xd8] sm:$0xff]   ;;  %v609_v40 = vld [vmem:[#allocation2 + $0x1c8] sm:$0xff] }
 0x10b   : > { %v1799_v52 = vsel %vm167_vm0, %v1626_v37, 0.0  ;;  %v1798_v55 = vadd.f32 %v1797_v43, %v1796_v47  ;;  %870 = vadd.xlane.f32.xlu2 %v2253_v42 }
 0x10c   : > { %v1801_v59 = vsel %vm167_vm0, %v1627_v44, 0.0  ;;  %v2428_v44 = vunpack.c.l.bf16 %v2663_v32 }
 0x10d   : > { %v783_v48 = vpop.xlane.xlu0 %782  ;;  %v785_v49 = vpop.xlane.xlu1 %784  ;;  %v1800_v0 = vadd.f32 %v1799_v52, %v1798_v55  ;;  %v2429_v52 = vunpack.c.h.bf16 %v2663_v32 }
 0x10e   : > { %v987_v54 = vadd.f32 %v783_v48, %v603_v41  ;;  %v988_v61 = vadd.f32 %v785_v49, %v604_v50  ;;  %v787_v2 = vpop.xlane.xlu2 %786  ;;  %v2265_v41 = vunpack.c.h.bf16 %v2623_v21  ;;  %v610_v48 = vld [vmem:[#allocation2 + $0x1d0] sm:$0xff]  ;;  %v2624_v50 = vld [vmem:[%s2793_s16 + $0x198] sm:$0xff]   ;;  %v2432_v49 = vunpack.c.l.bf16 %v2664_v46 }
 0x10f   : > { %v1500_v56 = vld [vmem:[#allocation2 + $0x180] sm:$0xff]  ;;  %v989_v6 = vadd.f32 %v787_v2, %v605_v58  ;;  %v1802_v7 = vadd.f32 %v1801_v59, %v1800_v0  ;;  %v2268_v59 = vunpack.c.l.bf16 %v2624_v50  ;;  %v2269_v0 = vunpack.c.h.bf16 %v2624_v50  ;;  %v614_v21 = vld [vmem:[#allocation2 + $0x1f0] sm:$0xff]  ;;  %v617_v50 = vld [vmem:[#allocation2 + $0x208] sm:$0xff] }
 0x110   : > { %v1628_v60 = vmul.f32 %v2416_v45, %v1500_v56  ;;  %1116 = vst.msk [vmem:[#allocation2 + $0x198] sm:$0xff] %vm167_vm0, %v987_v54  ;;  %v1501_v1 = vld [vmem:[#allocation2 + $0x188] sm:$0xff]  ;;  %v611_v56 = vld [vmem:[#allocation2 + $0x1d8] sm:$0xff] }
 0x111   : > { %v1629_v5 = vmul.f32 %v2417_v53, %v1501_v1  ;;  %1117 = vst.msk [vmem:[#allocation2 + $0x1a0] sm:$0xff] %vm167_vm0, %v988_v61  ;;  %v1502_v8 = vld [vmem:[#allocation2 + $0x190] sm:$0xff] }
 0x112   : > { %v1803_v4 = vsel %vm167_vm0, %v1628_v60, 0.0  ;;  %v1630_v13 = vmul.f32 %v2420_v57, %v1502_v8  ;;  %1118 = vst.msk [vmem:[#allocation2 + $0x1a8] sm:$0xff] %vm167_vm0, %v989_v6  ;;  %872 = vadd.xlane.f32.xlu0 %v2256_v62  ;;  %874 = vadd.xlane.f32.xlu1 %v2257_v3  ;;  %v2625_v60 = vld [vmem:[%s2793_s16 + $0x1a0] sm:$0xff]   ;;  %v2665_v6 = vld [vmem:[%s3612_s1 + $0xe8] sm:$0xff]  }
 0x113   : > { %v1805_v12 = vsel %vm167_vm0, %v1629_v5, 0.0  ;;  %v1804_v15 = vadd.f32 %v1803_v4, %v1802_v7  ;;  %876 = vadd.xlane.f32.xlu2 %v2260_v11  ;;  %v612_v7 = vld [vmem:[#allocation2 + $0x1e0] sm:$0xff]  ;;  %v2272_v8 = vunpack.c.l.bf16 %v2625_v60  ;;  %v2433_v11 = vunpack.c.h.bf16 %v2664_v46 }
 0x114   : > { %v1807_v18 = vsel %vm167_vm0, %v1630_v13, 0.0  ;;  %v616_v46 = vld [vmem:[#allocation2 + $0x200] sm:$0xff] }
 0x115   : > { %v789_v16 = vpop.xlane.xlu0 %788  ;;  %v1806_v22 = vadd.f32 %v1805_v12, %v1804_v15  ;;  %v791_v24 = vpop.xlane.xlu1 %790 }
 0x116   : > { %v990_v20 = vadd.f32 %v789_v16, %v606_v10  ;;  %v991_v28 = vadd.f32 %v791_v24, %v607_v17  ;;  %v793_v33 = vpop.xlane.xlu2 %792  ;;  %v2436_v16 = vunpack.c.l.bf16 %v2665_v6 }
 0x117   : > { %v1503_v23 = vld [vmem:[#allocation2 + $0x198] sm:$0xff]  ;;  %v1808_v30 = vadd.f32 %v1807_v18, %v1806_v22  ;;  %v992_v37 = vadd.f32 %v793_v33, %v608_v25  ;;  %v2626_v18 = vld [vmem:[%s2793_s16 + $0x1a8] sm:$0xff]   ;;  %v2273_v25 = vunpack.c.h.bf16 %v2625_v60 }
 0x118   : > { %v1631_v26 = vmul.f32 %v2421_v14, %v1503_v23  ;;  %1119 = vst.msk [vmem:[#allocation2 + $0x1b0] sm:$0xff] %vm167_vm0, %v990_v20  ;;  %v1504_v31 = vld [vmem:[#allocation2 + $0x1a0] sm:$0xff]  ;;  %v613_v14 = vld [vmem:[#allocation2 + $0x1e8] sm:$0xff]  ;;  %v2437_v23 = vunpack.c.h.bf16 %v2665_v6  ;;  %v618_v6 = vld [vmem:[#allocation2 + $0x210] sm:$0xff] }
 0x119   : > { %v1632_v36 = vmul.f32 %v2424_v19, %v1504_v31  ;;  %1120 = vst.msk [vmem:[#allocation2 + $0x1b8] sm:$0xff] %vm167_vm0, %v991_v28  ;;  %v1505_v39 = vld [vmem:[#allocation2 + $0x1a8] sm:$0xff]  ;;  %v2666_v28 = vld [vmem:[%s3612_s1 + $0xf0] sm:$0xff]  }
 0x11a   : > { %v1809_v35 = vsel %vm167_vm0, %v1631_v26, 0.0  ;;  %v1633_v43 = vmul.f32 %v2425_v27, %v1505_v39  ;;  %1121 = vst.msk [vmem:[#allocation2 + $0x1c0] sm:$0xff] %vm167_vm0, %v992_v37  ;;  %878 = vadd.xlane.f32.xlu0 %v2261_v29  ;;  %880 = vadd.xlane.f32.xlu1 %v2264_v34  ;;  %v2440_v39 = vunpack.c.l.bf16 %v2666_v28 }
 0x11b   : > { %v1810_v38 = vadd.f32 %v1809_v35, %v1808_v30  ;;  %v1811_v42 = vsel %vm167_vm0, %v1632_v36, 0.0  ;;  %882 = vadd.xlane.f32.xlu2 %v2265_v41  ;;  %v2276_v30 = vunpack.c.l.bf16 %v2626_v18  ;;  %v2277_v36 = vunpack.c.h.bf16 %v2626_v18  ;;  %v2667_v41 = vld [vmem:[%s3612_s1 + $0xf8] sm:$0xff]  }
 0x11c   : > { %v1813_v51 = vsel %vm167_vm0, %v1633_v43, 0.0  ;;  %v2627_v43 = vld [vmem:[%s2793_s16 + $0x1b0] sm:$0xff]  }
 0x11d   : > { %v1812_v45 = vadd.f32 %v1811_v42, %v1810_v38  ;;  %v795_v47 = vpop.xlane.xlu0 %794  ;;  %v797_v55 = vpop.xlane.xlu1 %796  ;;  %v615_v42 = vld [vmem:[#allocation2 + $0x1f8] sm:$0xff]  ;;  %v2281_v60 = vunpack.c.h.bf16 %v2627_v43 }
 0x11e   : > { %v993_v53 = vadd.f32 %v795_v47, %v609_v40  ;;  %v994_v58 = vadd.f32 %v797_v55, %v610_v48  ;;  %v799_v63 = vpop.xlane.xlu2 %798  ;;  %v2280_v55 = vunpack.c.l.bf16 %v2627_v43 }
 0x11f   : > { %v1506_v54 = vld [vmem:[#allocation2 + $0x1b0] sm:$0xff]  ;;  %v1814_v61 = vadd.f32 %v1813_v51, %v1812_v45  ;;  %v995_v3 = vadd.f32 %v799_v63, %v611_v56  ;;  %v2441_v45 = vunpack.c.h.bf16 %v2666_v28  ;;  %v2628_v56 = vld [vmem:[%s2793_s16 + $0x1b8] sm:$0xff]   ;;  %v2669_v28 = vld [vmem:[%s3612_s1 + $0x108] sm:$0xff]  }
 0x120   : > { %v1634_v57 = vmul.f32 %v2428_v44, %v1506_v54  ;;  %1122 = vst.msk [vmem:[#allocation2 + $0x1c8] sm:$0xff] %vm167_vm0, %v993_v53  ;;  %v1507_v62 = vld [vmem:[#allocation2 + $0x1b8] sm:$0xff]  ;;  %v2285_v18 = vunpack.c.h.bf16 %v2628_v56 }
 0x121   : > { %v1635_v2 = vmul.f32 %v2429_v52, %v1507_v62  ;;  %1123 = vst.msk [vmem:[#allocation2 + $0x1d0] sm:$0xff] %vm167_vm0, %v994_v58  ;;  %v1508_v5 = vld [vmem:[#allocation2 + $0x1c0] sm:$0xff]  ;;  %v2444_v52 = vunpack.c.l.bf16 %v2667_v41 }
 0x122   : > { %v1815_v1 = vsel %vm167_vm0, %v1634_v57, 0.0  ;;  %v1636_v10 = vmul.f32 %v2432_v49, %v1508_v5  ;;  %1124 = vst.msk [vmem:[#allocation2 + $0x1d8] sm:$0xff] %vm167_vm0, %v995_v3  ;;  %884 = vadd.xlane.f32.xlu0 %v2268_v59  ;;  %886 = vadd.xlane.f32.xlu1 %v2269_v0  ;;  %v2668_v5 = vld [vmem:[%s3612_s1 + $0x100] sm:$0xff]  }
 0x123   : > { %v1816_v4 = vadd.f32 %v1815_v1, %v1814_v61  ;;  %v1817_v9 = vsel %vm167_vm0, %v1635_v2, 0.0  ;;  %888 = vadd.xlane.f32.xlu2 %v2272_v8  ;;  %v2284_v2 = vunpack.c.l.bf16 %v2628_v56  ;;  %v619_v8 = vld [vmem:[#allocation2 + $0x218] sm:$0xff] }
 0x124   : > { %v1819_v15 = vsel %vm167_vm0, %v1636_v10, 0.0 }
 0x125   : > { %v1818_v12 = vadd.f32 %v1817_v9, %v1816_v4  ;;  %v801_v13 = vpop.xlane.xlu0 %800  ;;  %v803_v20 = vpop.xlane.xlu1 %802  ;;  %v2629_v9 = vld [vmem:[%s2793_s16 + $0x1c0] sm:$0xff]  }
 0x126   : > { %v996_v17 = vadd.f32 %v801_v13, %v612_v7  ;;  %v997_v24 = vadd.f32 %v803_v20, %v613_v14  ;;  %v805_v29 = vpop.xlane.xlu2 %804  ;;  %v2445_v7 = vunpack.c.h.bf16 %v2667_v41  ;;  %v2449_v14 = vunpack.c.h.bf16 %v2668_v5 }
 0x127   : > { %v1509_v19 = vld [vmem:[#allocation2 + $0x1c8] sm:$0xff]  ;;  %v1820_v26 = vadd.f32 %v1819_v15, %v1818_v12  ;;  %v998_v33 = vadd.f32 %v805_v29, %v614_v21  ;;  %v2288_v21 = vunpack.c.l.bf16 %v2629_v9  ;;  %v2453_v41 = vunpack.c.h.bf16 %v2669_v28 }
 0x128   : > { %v1637_v22 = vmul.f32 %v2433_v11, %v1509_v19  ;;  %1125 = vst.msk [vmem:[#allocation2 + $0x1e0] sm:$0xff] %vm167_vm0, %v996_v17  ;;  %v1510_v27 = vld [vmem:[#allocation2 + $0x1d0] sm:$0xff]  ;;  %v2448_v11 = vunpack.c.l.bf16 %v2668_v5  ;;  %v620_v17 = vld [vmem:[#allocation2 + $0x220] sm:$0xff]  ;;  %v2632_v5 = vld [vmem:[%s2793_s16 + $0x1d8] sm:$0xff]  }
 0x129   : > { %v1638_v32 = vmul.f32 %v2436_v16, %v1510_v27  ;;  %1126 = vst.msk [vmem:[#allocation2 + $0x1e8] sm:$0xff] %vm167_vm0, %v997_v24  ;;  %v1511_v35 = vld [vmem:[#allocation2 + $0x1d8] sm:$0xff] }
 0x12a   : > { %v1821_v31 = vsel %vm167_vm0, %v1637_v22, 0.0  ;;  %v1639_v38 = vmul.f32 %v2437_v23, %v1511_v35  ;;  %1127 = vst.msk [vmem:[#allocation2 + $0x1f0] sm:$0xff] %vm167_vm0, %v998_v33  ;;  %890 = vadd.xlane.f32.xlu0 %v2273_v25  ;;  %892 = vadd.xlane.f32.xlu1 %v2276_v30  ;;  %v2289_v30 = vunpack.c.h.bf16 %v2629_v9  ;;  %v621_v35 = vld [vmem:[#allocation2 + $0x228] sm:$0xff] }
 0x12b   : > { %v1822_v34 = vadd.f32 %v1821_v31, %v1820_v26  ;;  %v1823_v37 = vsel %vm167_vm0, %v1638_v32, 0.0  ;;  %894 = vadd.xlane.f32.xlu2 %v2277_v36  ;;  %v2630_v36 = vld [vmem:[%s2793_s16 + $0x1c8] sm:$0xff]  }
 0x12c   : > { %v1825_v44 = vsel %vm167_vm0, %v1639_v38, 0.0  ;;  %v2670_v38 = vld [vmem:[%s3612_s1 + $0x110] sm:$0xff]  }
 0x12d   : > { %v1824_v40 = vadd.f32 %v1823_v37, %v1822_v34  ;;  %v807_v48 = vpop.xlane.xlu0 %806  ;;  %v809_v54 = vpop.xlane.xlu1 %808  ;;  %v2452_v37 = vunpack.c.l.bf16 %v2669_v28 }
 0x12e   : > { %v999_v53 = vadd.f32 %v807_v48, %v615_v42  ;;  %v1000_v58 = vadd.f32 %v809_v54, %v616_v46  ;;  %v811_v59 = vpop.xlane.xlu2 %810  ;;  %v623_v46 = vld [vmem:[#allocation2 + $0x238] sm:$0xff]  ;;  %v2631_v48 = vld [vmem:[%s2793_s16 + $0x1d0] sm:$0xff]  }
 0x12f   : > { %v1512_v47 = vld [vmem:[#allocation2 + $0x1e0] sm:$0xff]  ;;  %v1826_v57 = vadd.f32 %v1825_v44, %v1824_v40  ;;  %v1001_v63 = vadd.f32 %v811_v59, %v617_v50  ;;  %v2296_v59 = vunpack.c.l.bf16 %v2631_v48 }
 0x130   : > { %v1640_v51 = vmul.f32 %v2440_v39, %v1512_v47  ;;  %v1513_v49 = vld [vmem:[#allocation2 + $0x1e8] sm:$0xff]  ;;  %1128 = vst.msk [vmem:[#allocation2 + $0x1f8] sm:$0xff] %vm167_vm0, %v999_v53  ;;  %v622_v39 = vld [vmem:[#allocation2 + $0x230] sm:$0xff]  ;;  %v2292_v47 = vunpack.c.l.bf16 %v2630_v36  ;;  %v2293_v53 = vunpack.c.h.bf16 %v2630_v36 }
 0x131   : > { %v1641_v62 = vmul.f32 %v2441_v45, %v1513_v49  ;;  %v1514_v1 = vld [vmem:[#allocation2 + $0x1f0] sm:$0xff]  ;;  %1129 = vst.msk [vmem:[#allocation2 + $0x200] sm:$0xff] %vm167_vm0, %v1000_v58 }
 0x132   : > { %v1827_v61 = vsel %vm167_vm0, %v1640_v51, 0.0  ;;  %v1642_v4 = vmul.f32 %v2444_v52, %v1514_v1  ;;  %1130 = vst.msk [vmem:[#allocation2 + $0x208] sm:$0xff] %vm167_vm0, %v1001_v63  ;;  %896 = vadd.xlane.f32.xlu0 %v2280_v55  ;;  %898 = vadd.xlane.f32.xlu1 %v2281_v60  ;;  %v2456_v51 = vunpack.c.l.bf16 %v2670_v38 }
 0x133   : > { %v1828_v0 = vadd.f32 %v1827_v61, %v1826_v57  ;;  %v1829_v3 = vsel %vm167_vm0, %v1641_v62, 0.0  ;;  %900 = vadd.xlane.f32.xlu2 %v2284_v2  ;;  %v2671_v62 = vld [vmem:[%s3612_s1 + $0x118] sm:$0xff]   ;;  %v624_v2 = vld [vmem:[#allocation2 + $0x240] sm:$0xff] }
 0x134   : > { %v1831_v13 = vsel %vm167_vm0, %v1642_v4, 0.0  ;;  %v625_v4 = vld [vmem:[#allocation2 + $0x248] sm:$0xff] }
 0x135   : > { %v1830_v10 = vadd.f32 %v1829_v3, %v1828_v0  ;;  %v813_v12 = vpop.xlane.xlu0 %812  ;;  %v815_v16 = vpop.xlane.xlu1 %814  ;;  %v2457_v3 = vunpack.c.h.bf16 %v2670_v38 }
 0x136   : > { %v1002_v15 = vadd.f32 %v813_v12, %v618_v6  ;;  %v1003_v20 = vadd.f32 %v815_v16, %v619_v8  ;;  %v817_v24 = vpop.xlane.xlu2 %816  ;;  %v626_v12 = vld [vmem:[#allocation2 + $0x250] sm:$0xff] }
 0x137   : > { %v1515_v19 = vld [vmem:[#allocation2 + $0x1f8] sm:$0xff]  ;;  %v1832_v25 = vadd.f32 %v1831_v13, %v1830_v10  ;;  %v1004_v29 = vadd.f32 %v817_v24, %v620_v17  ;;  %v2297_v13 = vunpack.c.h.bf16 %v2631_v48  ;;  %v2300_v17 = vunpack.c.l.bf16 %v2632_v5 }
 0x138   : > { %v1643_v22 = vmul.f32 %v2445_v7, %v1515_v19  ;;  %v1516_v23 = vld [vmem:[#allocation2 + $0x200] sm:$0xff]  ;;  %1131 = vst.msk [vmem:[#allocation2 + $0x210] sm:$0xff] %vm167_vm0, %v1002_v15  ;;  %v2460_v7 = vunpack.c.l.bf16 %v2671_v62  ;;  %v2461_v15 = vunpack.c.h.bf16 %v2671_v62  ;;  %v630_v62 = vld [vmem:[#allocation2 + $0x270] sm:$0xff] }
 0x139   : > { %v1644_v26 = vmul.f32 %v2448_v11, %v1516_v23  ;;  %v1517_v27 = vld [vmem:[#allocation2 + $0x208] sm:$0xff]  ;;  %1132 = vst.msk [vmem:[#allocation2 + $0x218] sm:$0xff] %vm167_vm0, %v1003_v20  ;;  %v2672_v23 = vld [vmem:[%s3612_s1 + $0x120] sm:$0xff]  }
 0x13a   : > { %v1833_v31 = vsel %vm167_vm0, %v1643_v22, 0.0  ;;  %v1645_v32 = vmul.f32 %v2449_v14, %v1517_v27  ;;  %902 = vadd.xlane.f32.xlu0 %v2285_v18  ;;  %1133 = vst.msk [vmem:[#allocation2 + $0x220] sm:$0xff] %vm167_vm0, %v1004_v29  ;;  %904 = vadd.xlane.f32.xlu1 %v2288_v21 }
 0x13b   : > { %v1834_v33 = vadd.f32 %v1833_v31, %v1832_v25  ;;  %v1835_v34 = vsel %vm167_vm0, %v1644_v26, 0.0  ;;  %906 = vadd.xlane.f32.xlu2 %v2289_v30  ;;  %v2301_v25 = vunpack.c.h.bf16 %v2632_v5  ;;  %v627_v31 = vld [vmem:[#allocation2 + $0x258] sm:$0xff] }
 0x13c   : > { %v1837_v43 = vsel %vm167_vm0, %v1645_v32, 0.0  ;;  %v2633_v32 = vld [vmem:[%s2793_s16 + $0x1e0] sm:$0xff]  }
 0x13d   : > { %v1836_v40 = vadd.f32 %v1835_v34, %v1834_v33  ;;  %v819_v42 = vpop.xlane.xlu0 %818  ;;  %v821_v45 = vpop.xlane.xlu1 %820  ;;  %v2464_v33 = vunpack.c.l.bf16 %v2672_v23  ;;  %v2673_v34 = vld [vmem:[%s3612_s1 + $0x128] sm:$0xff]   ;;  %v2305_v48 = vunpack.c.h.bf16 %v2633_v32 }
 0x13e   : > { %v1005_v44 = vadd.f32 %v819_v42, %v621_v35  ;;  %v1006_v52 = vadd.f32 %v821_v45, %v622_v39  ;;  %v823_v56 = vpop.xlane.xlu2 %822  ;;  %v628_v35 = vld [vmem:[#allocation2 + $0x260] sm:$0xff]  ;;  %v629_v42 = vld [vmem:[#allocation2 + $0x268] sm:$0xff] }
 0x13f   : > { %v1518_v50 = vld [vmem:[#allocation2 + $0x210] sm:$0xff]  ;;  %v1838_v57 = vadd.f32 %v1837_v43, %v1836_v40  ;;  %v1007_v58 = vadd.f32 %v823_v56, %v623_v46  ;;  %v2304_v43 = vunpack.c.l.bf16 %v2633_v32  ;;  %v2468_v46 = vunpack.c.l.bf16 %v2673_v34 }
 0x140   : > { %v1646_v54 = vmul.f32 %v2452_v37, %v1518_v50  ;;  %v1519_v55 = vld [vmem:[#allocation2 + $0x218] sm:$0xff]  ;;  %1134 = vst.msk [vmem:[#allocation2 + $0x228] sm:$0xff] %vm167_vm0, %v1005_v44  ;;  %v2465_v37 = vunpack.c.h.bf16 %v2672_v23  ;;  %v2634_v44 = vld [vmem:[%s2793_s16 + $0x1e8] sm:$0xff]  }
 0x141   : > { %v1647_v49 = vmul.f32 %v2453_v41, %v1519_v55  ;;  %1135 = vst.msk [vmem:[#allocation2 + $0x230] sm:$0xff] %vm167_vm0, %v1006_v52  ;;  %v1520_v61 = vld [vmem:[#allocation2 + $0x220] sm:$0xff]  ;;  %v2308_v56 = vunpack.c.l.bf16 %v2634_v44 }
 0x142   : > { %v1839_v60 = vsel %vm167_vm0, %v1646_v54, 0.0  ;;  %908 = vadd.xlane.f32.xlu0 %v2292_v47  ;;  %v1648_v1 = vmul.f32 %v2456_v51, %v1520_v61  ;;  %1136 = vst.msk [vmem:[#allocation2 + $0x238] sm:$0xff] %vm167_vm0, %v1007_v58  ;;  %910 = vadd.xlane.f32.xlu1 %v2293_v53  ;;  %v2674_v58 = vld [vmem:[%s3612_s1 + $0x130] sm:$0xff]  }
 0x143   : > { %v1840_v63 = vadd.f32 %v1839_v60, %v1838_v57  ;;  %v1841_v0 = vsel %vm167_vm0, %v1647_v49, 0.0  ;;  %912 = vadd.xlane.f32.xlu2 %v2296_v59 }
 0x144   : > { %v1843_v9 = vsel %vm167_vm0, %v1648_v1, 0.0  ;;  %v2635_v1 = vld [vmem:[%s2793_s16 + $0x1f0] sm:$0xff]  }
 0x145   : > { %v1842_v6 = vadd.f32 %v1841_v0, %v1840_v63  ;;  %v825_v8 = vpop.xlane.xlu0 %824  ;;  %v827_v11 = vpop.xlane.xlu1 %826  ;;  %v2469_v63 = vunpack.c.h.bf16 %v2673_v34  ;;  %v631_v0 = vld [vmem:[#allocation2 + $0x278] sm:$0xff] }
 0x146   : > { %v1008_v10 = vadd.f32 %v825_v8, %v624_v2  ;;  %v1009_v16 = vadd.f32 %v827_v11, %v625_v4  ;;  %v829_v20 = vpop.xlane.xlu2 %828  ;;  %v632_v8 = vld [vmem:[#allocation2 + $0x280] sm:$0xff]  ;;  %v2473_v11 = vunpack.c.h.bf16 %v2674_v58 }
 0x147   : > { %v1521_v14 = vld [vmem:[#allocation2 + $0x228] sm:$0xff]  ;;  %v1844_v21 = vadd.f32 %v1843_v9, %v1842_v6  ;;  %v1010_v24 = vadd.f32 %v829_v20, %v626_v12  ;;  %v2309_v9 = vunpack.c.h.bf16 %v2634_v44 }
 0x148   : > { %v1649_v18 = vmul.f32 %v2457_v3, %v1521_v14  ;;  %v1522_v19 = vld [vmem:[#allocation2 + $0x230] sm:$0xff]  ;;  %1137 = vst.msk [vmem:[#allocation2 + $0x240] sm:$0xff] %vm167_vm0, %v1008_v10  ;;  %v2472_v3 = vunpack.c.l.bf16 %v2674_v58  ;;  %v637_v58 = vld [vmem:[#allocation2 + $0x2a8] sm:$0xff] }
 0x149   : > { %v1650_v22 = vmul.f32 %v2460_v7, %v1522_v19  ;;  %1138 = vst.msk [vmem:[#allocation2 + $0x248] sm:$0xff] %vm167_vm0, %v1009_v16  ;;  %v1523_v27 = vld [vmem:[#allocation2 + $0x238] sm:$0xff] }
 0x14a   : > { %v1845_v26 = vsel %vm167_vm0, %v1649_v18, 0.0  ;;  %914 = vadd.xlane.f32.xlu0 %v2297_v13  ;;  %v1651_v30 = vmul.f32 %v2461_v15, %v1523_v27  ;;  %1139 = vst.msk [vmem:[#allocation2 + $0x250] sm:$0xff] %vm167_vm0, %v1010_v24  ;;  %916 = vadd.xlane.f32.xlu1 %v2300_v17  ;;  %v2312_v13 = vunpack.c.l.bf16 %v2635_v1  ;;  %v2675_v19 = vld [vmem:[%s3612_s1 + $0x138] sm:$0xff]   ;;  %v633_v27 = vld [vmem:[#allocation2 + $0x288] sm:$0xff] }
 0x14b   : > { %v1846_v28 = vadd.f32 %v1845_v26, %v1844_v21  ;;  %v1847_v29 = vsel %vm167_vm0, %v1650_v22, 0.0  ;;  %918 = vadd.xlane.f32.xlu2 %v2301_v25  ;;  %v2313_v21 = vunpack.c.h.bf16 %v2635_v1  ;;  %v638_v1 = vld [vmem:[#allocation2 + $0x2b0] sm:$0xff] }
 0x14c   : > { %v1849_v39 = vsel %vm167_vm0, %v1651_v30, 0.0  ;;  %v2676_v30 = vld [vmem:[%s3612_s1 + $0x140] sm:$0xff]  }
 0x14d   : > { %v1848_v36 = vadd.f32 %v1847_v29, %v1846_v28  ;;  %v831_v38 = vpop.xlane.xlu0 %830  ;;  %v833_v41 = vpop.xlane.xlu1 %832  ;;  %v2636_v28 = vld [vmem:[%s2793_s16 + $0x1f8] sm:$0xff]   ;;  %v2476_v29 = vunpack.c.l.bf16 %v2675_v19  ;;  %s162_s16 = scalar_lea.vmem %s3613_s2, %s3619_s9 }
 0x14e   : > { %v1011_v40 = vadd.f32 %v831_v38, %v627_v31  ;;  %v1012_v47 = vadd.f32 %v833_v41, %v628_v35  ;;  %v835_v52 = vpop.xlane.xlu2 %834  ;;  %v634_v31 = vld [vmem:[#allocation2 + $0x290] sm:$0xff]  ;;  %v635_v38 = vld [vmem:[#allocation2 + $0x298] sm:$0xff]  ;;  %v2480_v41 = vunpack.c.l.bf16 %v2676_v30 }
 0x14f   : > { %v1524_v45 = vld [vmem:[#allocation2 + $0x240] sm:$0xff]  ;;  %v1850_v53 = vadd.f32 %v1849_v39, %v1848_v36  ;;  %v1013_v55 = vadd.f32 %v835_v52, %v629_v42  ;;  %v2316_v39 = vunpack.c.l.bf16 %v2636_v28 }
 0x150   : > { %v1652_v50 = vmul.f32 %v2464_v33, %v1524_v45  ;;  %v1525_v51 = vld [vmem:[#allocation2 + $0x248] sm:$0xff]  ;;  %1140 = vst.msk [vmem:[#allocation2 + $0x258] sm:$0xff] %vm167_vm0, %v1011_v40  ;;  %v2477_v33 = vunpack.c.h.bf16 %v2675_v19  ;;  %v2679_v19 = vld [vmem:[%s3612_s1 + $0x158] sm:$0xff]  }
 0x151   : > { %v1653_v54 = vmul.f32 %v2465_v37, %v1525_v51  ;;  %1141 = vst.msk [vmem:[#allocation2 + $0x260] sm:$0xff] %vm167_vm0, %v1012_v47  ;;  %v1526_v49 = vld [vmem:[#allocation2 + $0x250] sm:$0xff] }
 0x152   : > { %v1851_v57 = vsel %vm167_vm0, %v1652_v50, 0.0  ;;  %920 = vadd.xlane.f32.xlu0 %v2304_v43  ;;  %v1654_v61 = vmul.f32 %v2468_v46, %v1526_v49  ;;  %1142 = vst.msk [vmem:[#allocation2 + $0x268] sm:$0xff] %vm167_vm0, %v1013_v55  ;;  %922 = vadd.xlane.f32.xlu1 %v2305_v48  ;;  %v2317_v43 = vunpack.c.h.bf16 %v2636_v28  ;;  %v2481_v49 = vunpack.c.h.bf16 %v2676_v30 }
 0x153   : > { %v1852_v59 = vadd.f32 %v1851_v57, %v1850_v53  ;;  %v1853_v60 = vsel %vm167_vm0, %v1653_v54, 0.0  ;;  %924 = vadd.xlane.f32.xlu2 %v2308_v56  ;;  %v2677_v53 = vld [vmem:[%s3612_s1 + $0x148] sm:$0xff]   ;;  %v636_v57 = vld [vmem:[#allocation2 + $0x2a0] sm:$0xff] }
 0x154   : > { %v1855_v5 = vsel %vm167_vm0, %v1654_v61, 0.0 }
 0x155   : > { %v1854_v2 = vadd.f32 %v1853_v60, %v1852_v59  ;;  %v837_v4 = vpop.xlane.xlu0 %836  ;;  %v839_v7 = vpop.xlane.xlu1 %838  ;;  %v2484_v60 = vunpack.c.l.bf16 %v2677_v53 }
 0x156   : > { %v1014_v6 = vadd.f32 %v837_v4, %v630_v62  ;;  %v1015_v12 = vadd.f32 %v839_v7, %v631_v0  ;;  %v841_v16 = vpop.xlane.xlu2 %840 }
 0x157   : > { %v1527_v10 = vld [vmem:[#allocation2 + $0x258] sm:$0xff]  ;;  %v1856_v17 = vadd.f32 %v1855_v5, %v1854_v2  ;;  %v1016_v20 = vadd.f32 %v841_v16, %v632_v8 }
 0x158   : > { %v1655_v14 = vmul.f32 %v2469_v63, %v1527_v10  ;;  %v1528_v15 = vld [vmem:[#allocation2 + $0x260] sm:$0xff]  ;;  %1143 = vst.msk [vmem:[#allocation2 + $0x270] sm:$0xff] %vm167_vm0, %v1014_v6  ;;  %v2678_v10 = vld [vmem:[%s3612_s1 + $0x150] sm:$0xff]  }
 0x159   : > { %v1656_v18 = vmul.f32 %v2472_v3, %v1528_v15  ;;  %1144 = vst.msk [vmem:[#allocation2 + $0x278] sm:$0xff] %vm167_vm0, %v1015_v12  ;;  %v1529_v23 = vld [vmem:[#allocation2 + $0x268] sm:$0xff]  ;;  %v2485_v3 = vunpack.c.h.bf16 %v2677_v53  ;;  %v644_v53 = vld [vmem:[#allocation2 + $0x2e0] sm:$0xff] }
 0x15a   : > { %v1857_v22 = vsel %vm167_vm0, %v1655_v14, 0.0  ;;  %926 = vadd.xlane.f32.xlu0 %v2309_v9  ;;  %v1657_v26 = vmul.f32 %v2473_v11, %v1529_v23  ;;  %1145 = vst.msk [vmem:[#allocation2 + $0x280] sm:$0xff] %vm167_vm0, %v1016_v20  ;;  %928 = vadd.xlane.f32.xlu1 %v2312_v13  ;;  %v640_v20 = vld [vmem:[#allocation2 + $0x2c0] sm:$0xff] }
 0x15b   : > { %v1858_v24 = vadd.f32 %v1857_v22, %v1856_v17  ;;  %v1859_v25 = vsel %vm167_vm0, %v1656_v18, 0.0  ;;  %930 = vadd.xlane.f32.xlu2 %v2313_v21  ;;  %v639_v17 = vld [vmem:[#allocation2 + $0x2b8] sm:$0xff]  ;;  %v2488_v18 = vunpack.c.l.bf16 %v2678_v10  ;;  %v2489_v22 = vunpack.c.h.bf16 %v2678_v10 }
 0x15c   : > { %v1861_v35 = vsel %vm167_vm0, %v1657_v26, 0.0 }
 0x15d   : > { %v1860_v32 = vadd.f32 %v1859_v25, %v1858_v24  ;;  %v843_v34 = vpop.xlane.xlu0 %842  ;;  %v845_v37 = vpop.xlane.xlu1 %844 }
 0x15e   : > { %v1017_v36 = vadd.f32 %v843_v34, %v633_v27  ;;  %v1018_v42 = vadd.f32 %v845_v37, %v634_v31  ;;  %v847_v46 = vpop.xlane.xlu2 %846  ;;  %v641_v27 = vld [vmem:[#allocation2 + $0x2c8] sm:$0xff] }
 0x15f   : > { %v1530_v40 = vld [vmem:[#allocation2 + $0x270] sm:$0xff]  ;;  %v1862_v47 = vadd.f32 %v1861_v35, %v1860_v32  ;;  %v1019_v50 = vadd.f32 %v847_v46, %v635_v38 }
 0x160   : > { %v1658_v44 = vmul.f32 %v2476_v29, %v1530_v40  ;;  %v1531_v45 = vld [vmem:[#allocation2 + $0x278] sm:$0xff]  ;;  %1146 = vst.msk [vmem:[#allocation2 + $0x288] sm:$0xff] %vm167_vm0, %v1017_v36  ;;  %v2492_v29 = vunpack.c.l.bf16 %v2679_v19 }
 0x161   : > { %v1659_v48 = vmul.f32 %v2477_v33, %v1531_v45  ;;  %1147 = vst.msk [vmem:[#allocation2 + $0x290] sm:$0xff] %vm167_vm0, %v1018_v42  ;;  %v1532_v52 = vld [vmem:[#allocation2 + $0x280] sm:$0xff]  ;;  %v643_v45 = vld [vmem:[#allocation2 + $0x2d8] sm:$0xff] }
 0x162   : > { %v1863_v51 = vsel %vm167_vm0, %v1658_v44, 0.0  ;;  %932 = vadd.xlane.f32.xlu0 %v2316_v39  ;;  %v1660_v56 = vmul.f32 %v2480_v41, %v1532_v52  ;;  %1148 = vst.msk [vmem:[#allocation2 + $0x298] sm:$0xff] %vm167_vm0, %v1019_v50  ;;  %934 = vadd.xlane.f32.xlu1 %v2317_v43  ;;  %v2680_v39 = vld [vmem:[%s3612_s1 + $0x160] sm:$0xff]   ;;  %v642_v43 = vld [vmem:[#allocation2 + $0x2d0] sm:$0xff]  ;;  %v2493_v44 = vunpack.c.h.bf16 %v2679_v19 }
 0x163   : > { %v1864_v54 = vadd.f32 %v1863_v51, %v1862_v47  ;;  %v1865_v55 = vsel %vm167_vm0, %v1659_v48, 0.0  ;;  %v2496_v47 = vunpack.c.l.bf16 %v2680_v39 }
 0x164   : > { %v1867_v62 = vsel %vm167_vm0, %v1660_v56, 0.0 }
 0x165   : > { %v1866_v59 = vadd.f32 %v1865_v55, %v1864_v54  ;;  %v849_v61 = vpop.xlane.xlu0 %848  ;;  %v851_v0 = vpop.xlane.xlu1 %850  ;;  %v2497_v55 = vunpack.c.h.bf16 %v2680_v39  ;;  %v650_v39 = vld [vmem:[#allocation2 + $0x310] sm:$0xff] }
 0x166   : > { %v1020_v63 = vadd.f32 %v849_v61, %v636_v57  ;;  %v1021_v4 = vadd.f32 %v851_v0, %v637_v58  ;;  %v853_v7 = vpop.xlane.xlu2 %852  ;;  %v2681_v61 = vld [vmem:[%s3612_s1 + $0x168] sm:$0xff]  }
 0x167   : > { %v1533_v2 = vld [vmem:[#allocation2 + $0x288] sm:$0xff]  ;;  %v1868_v8 = vadd.f32 %v1867_v62, %v1866_v59  ;;  %v1022_v11 = vadd.f32 %v853_v7, %v638_v1  ;;  %v646_v7 = vld [vmem:[#allocation2 + $0x2f0] sm:$0xff] }
 0x168   : > { %v1661_v5 = vmul.f32 %v2481_v49, %v1533_v2  ;;  %v1534_v6 = vld [vmem:[#allocation2 + $0x290] sm:$0xff]  ;;  %1149 = vst.msk [vmem:[#allocation2 + $0x2a0] sm:$0xff] %vm167_vm0, %v1020_v63 }
 0x169   : > { %v1662_v9 = vmul.f32 %v2484_v60, %v1534_v6  ;;  %1150 = vst.msk [vmem:[#allocation2 + $0x2a8] sm:$0xff] %vm167_vm0, %v1021_v4  ;;  %v1535_v13 = vld [vmem:[#allocation2 + $0x298] sm:$0xff]  ;;  %v645_v4 = vld [vmem:[#allocation2 + $0x2e8] sm:$0xff]  ;;  %v2682_v6 = vld [vmem:[%s3612_s1 + $0x170] sm:$0xff]  }
 0x16a   : > { %v1869_v12 = vsel %vm167_vm0, %v1661_v5, 0.0  ;;  %v1663_v16 = vmul.f32 %v2485_v3, %v1535_v13  ;;  %1151 = vst.msk [vmem:[#allocation2 + $0x2b0] sm:$0xff] %vm167_vm0, %v1022_v11  ;;  %v2500_v5 = vunpack.c.l.bf16 %v2681_v61 }
 0x16b   : > { %v1870_v14 = vadd.f32 %v1869_v12, %v1868_v8  ;;  %v1871_v15 = vsel %vm167_vm0, %v1662_v9, 0.0  ;;  %v2501_v9 = vunpack.c.h.bf16 %v2681_v61 }
 0x16c   : > { %v1873_v24 = vsel %vm167_vm0, %v1663_v16, 0.0  ;;  %v2504_v16 = vunpack.c.l.bf16 %v2682_v6 }
 0x16d   : > { %v1872_v21 = vadd.f32 %v1871_v15, %v1870_v14  ;;  %v855_v23 = vpop.xlane.xlu0 %854  ;;  %v857_v26 = vpop.xlane.xlu1 %856  ;;  %v647_v14 = vld [vmem:[#allocation2 + $0x2f8] sm:$0xff] }
 0x16e   : > { %v1023_v25 = vadd.f32 %v855_v23, %v639_v17  ;;  %v1024_v30 = vadd.f32 %v857_v26, %v640_v20  ;;  %v859_v33 = vpop.xlane.xlu2 %858  ;;  %v2683_v26 = vld [vmem:[%s3612_s1 + $0x178] sm:$0xff]  }
 0x16f   : > { %v1536_v28 = vld [vmem:[#allocation2 + $0x2a0] sm:$0xff]  ;;  %v1874_v34 = vadd.f32 %v1873_v24, %v1872_v21  ;;  %v1025_v36 = vadd.f32 %v859_v33, %v641_v27 }
 0x170   : > { %v1664_v31 = vmul.f32 %v2488_v18, %v1536_v28  ;;  %v1537_v32 = vld [vmem:[#allocation2 + $0x2a8] sm:$0xff]  ;;  %1152 = vst.msk [vmem:[#allocation2 + $0x2b8] sm:$0xff] %vm167_vm0, %v1023_v25 }
 0x171   : > { %v1665_v35 = vmul.f32 %v2489_v22, %v1537_v32  ;;  %1153 = vst.msk [vmem:[#allocation2 + $0x2c0] sm:$0xff] %vm167_vm0, %v1024_v30  ;;  %v1538_v38 = vld [vmem:[#allocation2 + $0x2b0] sm:$0xff]  ;;  %v648_v30 = vld [vmem:[#allocation2 + $0x300] sm:$0xff]  ;;  %v649_v32 = vld [vmem:[#allocation2 + $0x308] sm:$0xff] }
 0x172   : > { %v1875_v37 = vsel %vm167_vm0, %v1664_v31, 0.0  ;;  %v1666_v42 = vmul.f32 %v2492_v29, %v1538_v38  ;;  %1154 = vst.msk [vmem:[#allocation2 + $0x2c8] sm:$0xff] %vm167_vm0, %v1025_v36  ;;  %v2505_v31 = vunpack.c.h.bf16 %v2682_v6 }
 0x173   : > { %v1876_v40 = vadd.f32 %v1875_v37, %v1874_v34  ;;  %v1877_v41 = vsel %vm167_vm0, %v1665_v35, 0.0  ;;  %v2508_v34 = vunpack.c.l.bf16 %v2683_v26 }
 0x174   : > { %v1879_v50 = vsel %vm167_vm0, %v1666_v42, 0.0 }
 0x175   : > { %v1878_v46 = vadd.f32 %v1877_v41, %v1876_v40  ;;  %v861_v48 = vpop.xlane.xlu0 %860  ;;  %v863_v52 = vpop.xlane.xlu1 %862  ;;  %v2509_v41 = vunpack.c.h.bf16 %v2683_v26  ;;  %v656_v26 = vld [vmem:[#allocation2 + $0x340] sm:$0xff] }
 0x176   : > { %v1026_v51 = vadd.f32 %v861_v48, %v642_v43  ;;  %v1027_v56 = vadd.f32 %v863_v52, %v643_v45  ;;  %v865_v58 = vpop.xlane.xlu2 %864  ;;  %v2684_v48 = vld [vmem:[%s3612_s1 + $0x180] sm:$0xff]  }
 0x177   : > { %v1539_v54 = vld [vmem:[#allocation2 + $0x2b8] sm:$0xff]  ;;  %v1880_v59 = vadd.f32 %v1879_v50, %v1878_v46  ;;  %v1028_v62 = vadd.f32 %v865_v58, %v644_v53  ;;  %v652_v58 = vld [vmem:[#allocation2 + $0x320] sm:$0xff] }
 0x178   : > { %v1667_v57 = vmul.f32 %v2493_v44, %v1539_v54  ;;  %v1540_v49 = vld [vmem:[#allocation2 + $0x2c0] sm:$0xff]  ;;  %1155 = vst.msk [vmem:[#allocation2 + $0x2d0] sm:$0xff] %vm167_vm0, %v1026_v51 }
 0x179   : > { %v1668_v60 = vmul.f32 %v2496_v47, %v1540_v49  ;;  %1156 = vst.msk [vmem:[#allocation2 + $0x2d8] sm:$0xff] %vm167_vm0, %v1027_v56  ;;  %v1541_v0 = vld [vmem:[#allocation2 + $0x2c8] sm:$0xff]  ;;  %v651_v56 = vld [vmem:[#allocation2 + $0x318] sm:$0xff] }
 0x17a   : > { %v1881_v63 = vsel %vm167_vm0, %v1667_v57, 0.0  ;;  %v1669_v3 = vmul.f32 %v2497_v55, %v1541_v0  ;;  %1157 = vst.msk [vmem:[#allocation2 + $0x2e0] sm:$0xff] %vm167_vm0, %v1028_v62  ;;  %v2512_v57 = vunpack.c.l.bf16 %v2684_v48  ;;  %v2685_v49 = vld [vmem:[%s3612_s1 + $0x188] sm:$0xff]  }
 0x17b   : > { %v1882_v1 = vadd.f32 %v1881_v63, %v1880_v59  ;;  %v1883_v2 = vsel %vm167_vm0, %v1668_v60, 0.0  ;;  %v2513_v60 = vunpack.c.h.bf16 %v2684_v48 }
 0x17c   : > { %v1885_v11 = vsel %vm167_vm0, %v1669_v3, 0.0  ;;  %v2516_v3 = vunpack.c.l.bf16 %v2685_v49 }
 0x17d   : > { %v1884_v8 = vadd.f32 %v1883_v2, %v1882_v1  ;;  %v867_v10 = vpop.xlane.xlu0 %866  ;;  %v869_v13 = vpop.xlane.xlu1 %868  ;;  %v653_v1 = vld [vmem:[#allocation2 + $0x328] sm:$0xff] }
 0x17e   : > { %v1029_v12 = vadd.f32 %v867_v10, %v645_v4  ;;  %v1030_v17 = vadd.f32 %v869_v13, %v646_v7  ;;  %v871_v20 = vpop.xlane.xlu2 %870  ;;  %v2686_v13 = vld [vmem:[%s3612_s1 + $0x190] sm:$0xff]  }
 0x17f   : > { %v1542_v15 = vld [vmem:[#allocation2 + $0x2d0] sm:$0xff]  ;;  %v1886_v21 = vadd.f32 %v1885_v11, %v1884_v8  ;;  %v1031_v23 = vadd.f32 %v871_v20, %v647_v14 }
 0x180   : > { %v1670_v18 = vmul.f32 %v2500_v5, %v1542_v15  ;;  %v1543_v19 = vld [vmem:[#allocation2 + $0x2d8] sm:$0xff]  ;;  %1158 = vst.msk [vmem:[#allocation2 + $0x2e8] sm:$0xff] %vm167_vm0, %v1029_v12 }
 0x181   : > { %v1671_v22 = vmul.f32 %v2501_v9, %v1543_v19  ;;  %1159 = vst.msk [vmem:[#allocation2 + $0x2f0] sm:$0xff] %vm167_vm0, %v1030_v17  ;;  %v1544_v25 = vld [vmem:[#allocation2 + $0x2e0] sm:$0xff]  ;;  %v654_v17 = vld [vmem:[#allocation2 + $0x330] sm:$0xff]  ;;  %v655_v19 = vld [vmem:[#allocation2 + $0x338] sm:$0xff] }
 0x182   : > { %v1887_v24 = vsel %vm167_vm0, %v1670_v18, 0.0  ;;  %v1672_v29 = vmul.f32 %v2504_v16, %v1544_v25  ;;  %1160 = vst.msk [vmem:[#allocation2 + $0x2f8] sm:$0xff] %vm167_vm0, %v1031_v23  ;;  %v2517_v18 = vunpack.c.h.bf16 %v2685_v49 }
 0x183   : > { %v1888_v27 = vadd.f32 %v1887_v24, %v1886_v21  ;;  %v1889_v28 = vsel %vm167_vm0, %v1671_v22, 0.0  ;;  %v2520_v21 = vunpack.c.l.bf16 %v2686_v13 }
 0x184   : > { %v1891_v36 = vsel %vm167_vm0, %v1672_v29, 0.0 }
 0x185   : > { %v1890_v33 = vadd.f32 %v1889_v28, %v1888_v27  ;;  %v873_v35 = vpop.xlane.xlu0 %872  ;;  %v875_v38 = vpop.xlane.xlu1 %874  ;;  %v2521_v28 = vunpack.c.h.bf16 %v2686_v13  ;;  %v662_v13 = vld [vmem:[#allocation2 + $0x370] sm:$0xff] }
 0x186   : > { %v1032_v37 = vadd.f32 %v873_v35, %v648_v30  ;;  %v1033_v42 = vadd.f32 %v875_v38, %v649_v32  ;;  %v877_v45 = vpop.xlane.xlu2 %876  ;;  %v2687_v35 = vld [vmem:[%s3612_s1 + $0x198] sm:$0xff]  }
 0x187   : > { %v1545_v40 = vld [vmem:[#allocation2 + $0x2e8] sm:$0xff]  ;;  %v1892_v46 = vadd.f32 %v1891_v36, %v1890_v33  ;;  %v1034_v50 = vadd.f32 %v877_v45, %v650_v39  ;;  %v658_v45 = vld [vmem:[#allocation2 + $0x350] sm:$0xff] }
 0x188   : > { %v1673_v43 = vmul.f32 %v2505_v31, %v1545_v40  ;;  %v1546_v44 = vld [vmem:[#allocation2 + $0x2f0] sm:$0xff]  ;;  %1161 = vst.msk [vmem:[#allocation2 + $0x300] sm:$0xff] %vm167_vm0, %v1032_v37 }
 0x189   : > { %v1674_v47 = vmul.f32 %v2508_v34, %v1546_v44  ;;  %1162 = vst.msk [vmem:[#allocation2 + $0x308] sm:$0xff] %vm167_vm0, %v1033_v42  ;;  %v1547_v52 = vld [vmem:[#allocation2 + $0x2f8] sm:$0xff]  ;;  %v657_v42 = vld [vmem:[#allocation2 + $0x348] sm:$0xff]  ;;  %v2688_v44 = vld [vmem:[%s3612_s1 + $0x1a0] sm:$0xff]  }
 0x18a   : > { %v1893_v51 = vsel %vm167_vm0, %v1673_v43, 0.0  ;;  %v1675_v55 = vmul.f32 %v2509_v41, %v1547_v52  ;;  %1163 = vst.msk [vmem:[#allocation2 + $0x310] sm:$0xff] %vm167_vm0, %v1034_v50  ;;  %v2524_v43 = vunpack.c.l.bf16 %v2687_v35 }
 0x18b   : > { %v1894_v53 = vadd.f32 %v1893_v51, %v1892_v46  ;;  %v1895_v54 = vsel %vm167_vm0, %v1674_v47, 0.0  ;;  %v2525_v47 = vunpack.c.h.bf16 %v2687_v35 }
 0x18c   : > { %v1897_v62 = vsel %vm167_vm0, %v1675_v55, 0.0  ;;  %v2528_v55 = vunpack.c.l.bf16 %v2688_v44 }
 0x18d   : > { %v1896_v59 = vadd.f32 %v1895_v54, %v1894_v53  ;;  %v879_v61 = vpop.xlane.xlu0 %878  ;;  %v881_v0 = vpop.xlane.xlu1 %880  ;;  %v659_v53 = vld [vmem:[#allocation2 + $0x358] sm:$0xff] }
 0x18e   : > { %v1035_v63 = vadd.f32 %v879_v61, %v651_v56  ;;  %v1036_v4 = vadd.f32 %v881_v0, %v652_v58  ;;  %v883_v7 = vpop.xlane.xlu2 %882  ;;  %v2689_v0 = vld [vmem:[%s3612_s1 + $0x1a8] sm:$0xff]  }
 0x18f   : > { %v1548_v2 = vld [vmem:[#allocation2 + $0x300] sm:$0xff]  ;;  %v1898_v8 = vadd.f32 %v1897_v62, %v1896_v59  ;;  %v1037_v10 = vadd.f32 %v883_v7, %v653_v1 }
 0x190   : > { %v1676_v5 = vmul.f32 %v2512_v57, %v1548_v2  ;;  %v1549_v6 = vld [vmem:[#allocation2 + $0x308] sm:$0xff]  ;;  %1164 = vst.msk [vmem:[#allocation2 + $0x318] sm:$0xff] %vm167_vm0, %v1035_v63 }
 0x191   : > { %v1677_v9 = vmul.f32 %v2513_v60, %v1549_v6  ;;  %1165 = vst.msk [vmem:[#allocation2 + $0x320] sm:$0xff] %vm167_vm0, %v1036_v4  ;;  %v1550_v12 = vld [vmem:[#allocation2 + $0x310] sm:$0xff]  ;;  %v660_v4 = vld [vmem:[#allocation2 + $0x360] sm:$0xff]  ;;  %v661_v6 = vld [vmem:[#allocation2 + $0x368] sm:$0xff] }
 0x192   : > { %v1899_v11 = vsel %vm167_vm0, %v1676_v5, 0.0  ;;  %v1678_v16 = vmul.f32 %v2516_v3, %v1550_v12  ;;  %1166 = vst.msk [vmem:[#allocation2 + $0x328] sm:$0xff] %vm167_vm0, %v1037_v10  ;;  %v2529_v5 = vunpack.c.h.bf16 %v2688_v44 }
 0x193   : > { %v1900_v14 = vadd.f32 %v1899_v11, %v1898_v8  ;;  %v1901_v15 = vsel %vm167_vm0, %v1677_v9, 0.0  ;;  %v2532_v8 = vunpack.c.l.bf16 %v2689_v0 }
 0x194   : > { %v1903_v23 = vsel %vm167_vm0, %v1678_v16, 0.0 }
 0x195   : > { %v1902_v20 = vadd.f32 %v1901_v15, %v1900_v14  ;;  %v885_v22 = vpop.xlane.xlu0 %884  ;;  %v887_v25 = vpop.xlane.xlu1 %886  ;;  %v2533_v15 = vunpack.c.h.bf16 %v2689_v0  ;;  %v668_v0 = vld [vmem:[#allocation2 + $0x3a0] sm:$0xff] }
 0x196   : > { %v1038_v24 = vadd.f32 %v885_v22, %v654_v17  ;;  %v1039_v29 = vadd.f32 %v887_v25, %v655_v19  ;;  %v889_v32 = vpop.xlane.xlu2 %888  ;;  %v2690_v22 = vld [vmem:[%s3612_s1 + $0x1b0] sm:$0xff]  }
 0x197   : > { %v1551_v27 = vld [vmem:[#allocation2 + $0x318] sm:$0xff]  ;;  %v1904_v33 = vadd.f32 %v1903_v23, %v1902_v20  ;;  %v1040_v36 = vadd.f32 %v889_v32, %v656_v26  ;;  %v664_v32 = vld [vmem:[#allocation2 + $0x380] sm:$0xff] }
 0x198   : > { %v1679_v30 = vmul.f32 %v2517_v18, %v1551_v27  ;;  %v1552_v31 = vld [vmem:[#allocation2 + $0x320] sm:$0xff]  ;;  %1167 = vst.msk [vmem:[#allocation2 + $0x330] sm:$0xff] %vm167_vm0, %v1038_v24 }
 0x199   : > { %v1680_v34 = vmul.f32 %v2520_v21, %v1552_v31  ;;  %1168 = vst.msk [vmem:[#allocation2 + $0x338] sm:$0xff] %vm167_vm0, %v1039_v29  ;;  %v1553_v38 = vld [vmem:[#allocation2 + $0x328] sm:$0xff]  ;;  %v663_v29 = vld [vmem:[#allocation2 + $0x378] sm:$0xff] }
 0x19a   : > { %v1905_v37 = vsel %vm167_vm0, %v1679_v30, 0.0  ;;  %v1681_v41 = vmul.f32 %v2521_v28, %v1553_v38  ;;  %1169 = vst.msk [vmem:[#allocation2 + $0x340] sm:$0xff] %vm167_vm0, %v1040_v36  ;;  %v2536_v30 = vunpack.c.l.bf16 %v2690_v22  ;;  %v2691_v31 = vld [vmem:[%s3612_s1 + $0x1b8] sm:$0xff]  }
 0x19b   : > { %v1906_v39 = vadd.f32 %v1905_v37, %v1904_v33  ;;  %v1907_v40 = vsel %vm167_vm0, %v1680_v34, 0.0  ;;  %v2537_v34 = vunpack.c.h.bf16 %v2690_v22 }
 0x19c   : > { %v1909_v50 = vsel %vm167_vm0, %v1681_v41, 0.0  ;;  %v2540_v41 = vunpack.c.l.bf16 %v2691_v31 }
 0x19d   : > { %v1908_v46 = vadd.f32 %v1907_v40, %v1906_v39  ;;  %v891_v48 = vpop.xlane.xlu0 %890  ;;  %v893_v52 = vpop.xlane.xlu1 %892  ;;  %v665_v39 = vld [vmem:[#allocation2 + $0x388] sm:$0xff] }
 0x19e   : > { %v1041_v51 = vadd.f32 %v891_v48, %v657_v42  ;;  %v1042_v56 = vadd.f32 %v893_v52, %v658_v45  ;;  %v895_v58 = vpop.xlane.xlu2 %894  ;;  %v2692_v52 = vld [vmem:[%s3612_s1 + $0x1c0] sm:$0xff]  }
 0x19f   : > { %v1554_v54 = vld [vmem:[#allocation2 + $0x330] sm:$0xff]  ;;  %v1910_v59 = vadd.f32 %v1909_v50, %v1908_v46  ;;  %v1043_v61 = vadd.f32 %v895_v58, %v659_v53 }
 0x1a0   : > { %v1682_v57 = vmul.f32 %v2524_v43, %v1554_v54  ;;  %v1555_v49 = vld [vmem:[#allocation2 + $0x338] sm:$0xff]  ;;  %1170 = vst.msk [vmem:[#allocation2 + $0x348] sm:$0xff] %vm167_vm0, %v1041_v51 }
 0x1a1   : > { %v1683_v60 = vmul.f32 %v2525_v47, %v1555_v49  ;;  %1171 = vst.msk [vmem:[#allocation2 + $0x350] sm:$0xff] %vm167_vm0, %v1042_v56  ;;  %v1556_v63 = vld [vmem:[#allocation2 + $0x340] sm:$0xff]  ;;  %v666_v56 = vld [vmem:[#allocation2 + $0x390] sm:$0xff]  ;;  %v667_v49 = vld [vmem:[#allocation2 + $0x398] sm:$0xff] }
 0x1a2   : > { %v1911_v62 = vsel %vm167_vm0, %v1682_v57, 0.0  ;;  %v1684_v3 = vmul.f32 %v2528_v55, %v1556_v63  ;;  %1172 = vst.msk [vmem:[#allocation2 + $0x358] sm:$0xff] %vm167_vm0, %v1043_v61  ;;  %v2541_v57 = vunpack.c.h.bf16 %v2691_v31 }
 0x1a3   : > { %v1912_v1 = vadd.f32 %v1911_v62, %v1910_v59  ;;  %v1913_v2 = vsel %vm167_vm0, %v1683_v60, 0.0  ;;  %v2544_v59 = vunpack.c.l.bf16 %v2692_v52 }
 0x1a4   : > { %v1915_v10 = vsel %vm167_vm0, %v1684_v3, 0.0 }
 0x1a5   : > { %v1914_v7 = vadd.f32 %v1913_v2, %v1912_v1  ;;  %v897_v9 = vpop.xlane.xlu0 %896  ;;  %v899_v12 = vpop.xlane.xlu1 %898  ;;  %v2545_v2 = vunpack.c.h.bf16 %v2692_v52  ;;  %v674_v52 = vld [vmem:[#allocation2 + $0x3d0] sm:$0xff] }
 0x1a6   : > { %v1044_v11 = vadd.f32 %v897_v9, %v660_v4  ;;  %v1045_v16 = vadd.f32 %v899_v12, %v661_v6  ;;  %v901_v19 = vpop.xlane.xlu2 %900  ;;  %v2693_v9 = vld [vmem:[%s3612_s1 + $0x1c8] sm:$0xff]  }
 0x1a7   : > { %v1557_v14 = vld [vmem:[#allocation2 + $0x348] sm:$0xff]  ;;  %v1916_v20 = vadd.f32 %v1915_v10, %v1914_v7  ;;  %v1046_v23 = vadd.f32 %v901_v19, %v662_v13  ;;  %v670_v19 = vld [vmem:[#allocation2 + $0x3b0] sm:$0xff] }
 0x1a8   : > { %v1685_v17 = vmul.f32 %v2529_v5, %v1557_v14  ;;  %v1558_v18 = vld [vmem:[#allocation2 + $0x350] sm:$0xff]  ;;  %1173 = vst.msk [vmem:[#allocation2 + $0x360] sm:$0xff] %vm167_vm0, %v1044_v11 }
 0x1a9   : > { %v1686_v21 = vmul.f32 %v2532_v8, %v1558_v18  ;;  %1174 = vst.msk [vmem:[#allocation2 + $0x368] sm:$0xff] %vm167_vm0, %v1045_v16  ;;  %v1559_v25 = vld [vmem:[#allocation2 + $0x358] sm:$0xff]  ;;  %v669_v16 = vld [vmem:[#allocation2 + $0x3a8] sm:$0xff]  ;;  %v2694_v18 = vld [vmem:[%s3612_s1 + $0x1d0] sm:$0xff]  }
 0x1aa   : > { %v1917_v24 = vsel %vm167_vm0, %v1685_v17, 0.0  ;;  %v1687_v28 = vmul.f32 %v2533_v15, %v1559_v25  ;;  %1175 = vst.msk [vmem:[#allocation2 + $0x370] sm:$0xff] %vm167_vm0, %v1046_v23  ;;  %v2548_v17 = vunpack.c.l.bf16 %v2693_v9 }
 0x1ab   : > { %v1918_v26 = vadd.f32 %v1917_v24, %v1916_v20  ;;  %v1919_v27 = vsel %vm167_vm0, %v1686_v21, 0.0  ;;  %v2549_v21 = vunpack.c.h.bf16 %v2693_v9 }
 0x1ac   : > { %v1921_v36 = vsel %vm167_vm0, %v1687_v28, 0.0  ;;  %v2552_v28 = vunpack.c.l.bf16 %v2694_v18 }
 0x1ad   : > { %v1920_v33 = vadd.f32 %v1919_v27, %v1918_v26  ;;  %v903_v35 = vpop.xlane.xlu0 %902  ;;  %v905_v38 = vpop.xlane.xlu1 %904  ;;  %v671_v26 = vld [vmem:[#allocation2 + $0x3b8] sm:$0xff] }
 0x1ae   : > { %v1047_v37 = vadd.f32 %v903_v35, %v663_v29  ;;  %v1048_v42 = vadd.f32 %v905_v38, %v664_v32  ;;  %v907_v45 = vpop.xlane.xlu2 %906  ;;  %v2695_v38 = vld [vmem:[%s3612_s1 + $0x1d8] sm:$0xff]  }
 0x1af   : > { %v1560_v40 = vld [vmem:[#allocation2 + $0x360] sm:$0xff]  ;;  %v1922_v46 = vadd.f32 %v1921_v36, %v1920_v33  ;;  %v1049_v48 = vadd.f32 %v907_v45, %v665_v39 }
 0x1b0   : > { %v1688_v43 = vmul.f32 %v2536_v30, %v1560_v40  ;;  %v1561_v44 = vld [vmem:[#allocation2 + $0x368] sm:$0xff]  ;;  %1176 = vst.msk [vmem:[#allocation2 + $0x378] sm:$0xff] %vm167_vm0, %v1047_v37 }
 0x1b1   : > { %v1689_v47 = vmul.f32 %v2537_v34, %v1561_v44  ;;  %1177 = vst.msk [vmem:[#allocation2 + $0x380] sm:$0xff] %vm167_vm0, %v1048_v42  ;;  %v1562_v51 = vld [vmem:[#allocation2 + $0x370] sm:$0xff]  ;;  %v672_v42 = vld [vmem:[#allocation2 + $0x3c0] sm:$0xff]  ;;  %v673_v44 = vld [vmem:[#allocation2 + $0x3c8] sm:$0xff] }
 0x1b2   : > { %v1923_v50 = vsel %vm167_vm0, %v1688_v43, 0.0  ;;  %v1690_v55 = vmul.f32 %v2540_v41, %v1562_v51  ;;  %1178 = vst.msk [vmem:[#allocation2 + $0x388] sm:$0xff] %vm167_vm0, %v1049_v48  ;;  %v2553_v43 = vunpack.c.h.bf16 %v2694_v18 }
 0x1b3   : > { %v1924_v53 = vadd.f32 %v1923_v50, %v1922_v46  ;;  %v1925_v54 = vsel %vm167_vm0, %v1689_v47, 0.0  ;;  %v2556_v46 = vunpack.c.l.bf16 %v2695_v38 }
 0x1b4   : > { %v1927_v61 = vsel %vm167_vm0, %v1690_v55, 0.0 }
 0x1b5   : > { %v1926_v58 = vadd.f32 %v1925_v54, %v1924_v53  ;;  %v909_v60 = vpop.xlane.xlu0 %908  ;;  %v911_v63 = vpop.xlane.xlu1 %910  ;;  %v2557_v54 = vunpack.c.h.bf16 %v2695_v38 }
 0x1b6   : > { %v1050_v62 = vadd.f32 %v909_v60, %v666_v56  ;;  %v1051_v3 = vadd.f32 %v911_v63, %v667_v49  ;;  %v913_v6 = vpop.xlane.xlu2 %912  ;;  %v2696_v60 = vld [vmem:[%s3612_s1 + $0x1e0] sm:$0xff]  }
 0x1b7   : > { %v1563_v1 = vld [vmem:[#allocation2 + $0x378] sm:$0xff]  ;;  %v1928_v7 = vadd.f32 %v1927_v61, %v1926_v58  ;;  %v1052_v10 = vadd.f32 %v913_v6, %v668_v0  ;;  %v676_v6 = vld [vmem:[#allocation2 + $0x3e0] sm:$0xff] }
 0x1b8   : > { %v1691_v4 = vmul.f32 %v2541_v57, %v1563_v1  ;;  %v1564_v5 = vld [vmem:[#allocation2 + $0x380] sm:$0xff]  ;;  %1179 = vst.msk [vmem:[#allocation2 + $0x390] sm:$0xff] %vm167_vm0, %v1050_v62 }
 0x1b9   : > { %v1692_v8 = vmul.f32 %v2544_v59, %v1564_v5  ;;  %1180 = vst.msk [vmem:[#allocation2 + $0x398] sm:$0xff] %vm167_vm0, %v1051_v3  ;;  %v1565_v12 = vld [vmem:[#allocation2 + $0x388] sm:$0xff]  ;;  %v675_v3 = vld [vmem:[#allocation2 + $0x3d8] sm:$0xff] }
 0x1ba   : > { %v1929_v11 = vsel %vm167_vm0, %v1691_v4, 0.0  ;;  %v1693_v15 = vmul.f32 %v2545_v2, %v1565_v12  ;;  %1181 = vst.msk [vmem:[#allocation2 + $0x3a0] sm:$0xff] %vm167_vm0, %v1052_v10  ;;  %v2560_v4 = vunpack.c.l.bf16 %v2696_v60  ;;  %v2697_v5 = vld [vmem:[%s3612_s1 + $0x1e8] sm:$0xff]  }
 0x1bb   : > { %v1930_v13 = vadd.f32 %v1929_v11, %v1928_v7  ;;  %v1931_v14 = vsel %vm167_vm0, %v1692_v8, 0.0  ;;  %v2561_v8 = vunpack.c.h.bf16 %v2696_v60 }
 0x1bc   : > { %v1933_v23 = vsel %vm167_vm0, %v1693_v15, 0.0  ;;  %v2564_v15 = vunpack.c.l.bf16 %v2697_v5 }
 0x1bd   : > { %v1932_v20 = vadd.f32 %v1931_v14, %v1930_v13  ;;  %v915_v22 = vpop.xlane.xlu0 %914  ;;  %v917_v25 = vpop.xlane.xlu1 %916  ;;  %v677_v13 = vld [vmem:[#allocation2 + $0x3e8] sm:$0xff] }
 0x1be   : > { %v1053_v24 = vadd.f32 %v915_v22, %v669_v16  ;;  %v1054_v29 = vadd.f32 %v917_v25, %v670_v19  ;;  %v919_v32 = vpop.xlane.xlu2 %918  ;;  %v2698_v25 = vld [vmem:[%s3612_s1 + $0x1f0] sm:$0xff]  }
 0x1bf   : > { %v1566_v27 = vld [vmem:[#allocation2 + $0x390] sm:$0xff]  ;;  %v1934_v33 = vadd.f32 %v1933_v23, %v1932_v20  ;;  %v1055_v35 = vadd.f32 %v919_v32, %v671_v26 }
 0x1c0   : > { %v1694_v30 = vmul.f32 %v2548_v17, %v1566_v27  ;;  %v1567_v31 = vld [vmem:[#allocation2 + $0x398] sm:$0xff]  ;;  %1182 = vst.msk [vmem:[#allocation2 + $0x3a8] sm:$0xff] %vm167_vm0, %v1053_v24 }
 0x1c1   : > { %v1695_v34 = vmul.f32 %v2549_v21, %v1567_v31  ;;  %1183 = vst.msk [vmem:[#allocation2 + $0x3b0] sm:$0xff] %vm167_vm0, %v1054_v29  ;;  %v1568_v37 = vld [vmem:[#allocation2 + $0x3a0] sm:$0xff]  ;;  %v678_v29 = vld [vmem:[#allocation2 + $0x3f0] sm:$0xff]  ;;  %v679_v31 = vld [vmem:[#allocation2 + $0x3f8] sm:$0xff] }
 0x1c2   : > { %v1935_v36 = vsel %vm167_vm0, %v1694_v30, 0.0  ;;  %v1696_v41 = vmul.f32 %v2552_v28, %v1568_v37  ;;  %1184 = vst.msk [vmem:[#allocation2 + $0x3b8] sm:$0xff] %vm167_vm0, %v1055_v35  ;;  %v2565_v30 = vunpack.c.h.bf16 %v2697_v5 }
 0x1c3   : > { %v1936_v39 = vadd.f32 %v1935_v36, %v1934_v33  ;;  %v1937_v40 = vsel %vm167_vm0, %v1695_v34, 0.0  ;;  %v2568_v33 = vunpack.c.l.bf16 %v2698_v25 }
 0x1c4   : > { %v1939_v48 = vsel %vm167_vm0, %v1696_v41, 0.0 }
 0x1c5   : > { %v1938_v45 = vadd.f32 %v1937_v40, %v1936_v39  ;;  %v921_v47 = vpop.xlane.xlu0 %920  ;;  %v923_v51 = vpop.xlane.xlu1 %922  ;;  %v2569_v39 = vunpack.c.h.bf16 %v2698_v25 }
 0x1c6   : > { %v1056_v50 = vadd.f32 %v921_v47, %v672_v42  ;;  %v1057_v55 = vadd.f32 %v923_v51, %v673_v44  ;;  %v925_v49 = vpop.xlane.xlu2 %924 }
 0x1c7   : > { %v1569_v53 = vld [vmem:[#allocation2 + $0x3a8] sm:$0xff]  ;;  %v1940_v58 = vadd.f32 %v1939_v48, %v1938_v45  ;;  %v1058_v61 = vadd.f32 %v925_v49, %v674_v52  ;;  %v2699_v45 = vld [vmem:[%s3612_s1 + $0x1f8] sm:$0xff]  }
 0x1c8   : > { %v1697_v56 = vmul.f32 %v2553_v43, %v1569_v53  ;;  %v1570_v57 = vld [vmem:[#allocation2 + $0x3b0] sm:$0xff]  ;;  %1185 = vst.msk [vmem:[#allocation2 + $0x3c0] sm:$0xff] %vm167_vm0, %v1056_v50  ;;  %v2572_v52 = vunpack.c.l.bf16 %v2699_v45 }
 0x1c9   : > { %v1698_v59 = vmul.f32 %v2556_v46, %v1570_v57  ;;  %1186 = vst.msk [vmem:[#allocation2 + $0x3c8] sm:$0xff] %vm167_vm0, %v1057_v55  ;;  %v1571_v63 = vld [vmem:[#allocation2 + $0x3b8] sm:$0xff] }
 0x1ca   : > { %v1941_v62 = vsel %vm167_vm0, %v1697_v56, 0.0  ;;  %v1699_v2 = vmul.f32 %v2557_v54, %v1571_v63  ;;  %1187 = vst.msk [vmem:[#allocation2 + $0x3d0] sm:$0xff] %vm167_vm0, %v1058_v61  ;;  %v2573_v54 = vunpack.c.h.bf16 %v2699_v45 }
 0x1cb   : > { %v1942_v0 = vadd.f32 %v1941_v62, %v1940_v58  ;;  %v1943_v1 = vsel %vm167_vm0, %v1698_v59, 0.0 }
 0x1cc   : > { %v1945_v10 = vsel %vm167_vm0, %v1699_v2, 0.0 }
 0x1cd   : > { %v1944_v7 = vadd.f32 %v1943_v1, %v1942_v0  ;;  %v927_v9 = vpop.xlane.xlu0 %926  ;;  %v929_v12 = vpop.xlane.xlu1 %928 }
 0x1ce   : > { %v1059_v11 = vadd.f32 %v927_v9, %v675_v3  ;;  %v1060_v16 = vadd.f32 %v929_v12, %v676_v6  ;;  %v931_v19 = vpop.xlane.xlu2 %930 }
 0x1cf   : > { %v1572_v14 = vld [vmem:[#allocation2 + $0x3c0] sm:$0xff]  ;;  %v1946_v20 = vadd.f32 %v1945_v10, %v1944_v7  ;;  %v1061_v22 = vadd.f32 %v931_v19, %v677_v13 }
 0x1d0   : > { %v1700_v17 = vmul.f32 %v2560_v4, %v1572_v14  ;;  %v1573_v18 = vld [vmem:[#allocation2 + $0x3c8] sm:$0xff]  ;;  %1188 = vst.msk [vmem:[#allocation2 + $0x3d8] sm:$0xff] %vm167_vm0, %v1059_v11 }
 0x1d1   : > { %v1701_v21 = vmul.f32 %v2561_v8, %v1573_v18  ;;  %1189 = vst.msk [vmem:[#allocation2 + $0x3e0] sm:$0xff] %vm167_vm0, %v1060_v16  ;;  %v1574_v24 = vld [vmem:[#allocation2 + $0x3d0] sm:$0xff] }
 0x1d2   : > { %v1947_v23 = vsel %vm167_vm0, %v1700_v17, 0.0  ;;  %v1702_v28 = vmul.f32 %v2564_v15, %v1574_v24  ;;  %1190 = vst.msk [vmem:[#allocation2 + $0x3e8] sm:$0xff] %vm167_vm0, %v1061_v22 }
 0x1d3   : > { %v1948_v26 = vadd.f32 %v1947_v23, %v1946_v20  ;;  %v1949_v27 = vsel %vm167_vm0, %v1701_v21, 0.0 }
 0x1d4   : > { %v1951_v35 = vsel %vm167_vm0, %v1702_v28, 0.0 }
 0x1d5   : > { %v1950_v32 = vadd.f32 %v1949_v27, %v1948_v26  ;;  %v933_v34 = vpop.xlane.xlu0 %932  ;;  %v935_v37 = vpop.xlane.xlu1 %934 }
 0x1d6   : > { %v1062_v36 = vadd.f32 %v933_v34, %v678_v29  ;;  %v1063_v40 = vadd.f32 %v935_v37, %v679_v31 }
 0x1d7   : > { %v1575_v38 = vld [vmem:[#allocation2 + $0x3d8] sm:$0xff]  ;;  %v1952_v43 = vadd.f32 %v1951_v35, %v1950_v32 }
 0x1d8   : > { %v1703_v41 = vmul.f32 %v2565_v30, %v1575_v38  ;;  %v1576_v42 = vld [vmem:[#allocation2 + $0x3e0] sm:$0xff]  ;;  %1191 = vst.msk [vmem:[#allocation2 + $0x3f0] sm:$0xff] %vm167_vm0, %v1062_v36 }
 0x1d9   : > { %v1704_v44 = vmul.f32 %v2568_v33, %v1576_v42  ;;  %1192 = vst.msk [vmem:[#allocation2 + $0x3f8] sm:$0xff] %vm167_vm0, %v1063_v40  ;;  %v1577_v47 = vld [vmem:[#allocation2 + $0x3e8] sm:$0xff] }
 0x1da   : > { %v1953_v46 = vsel %vm167_vm0, %v1703_v41, 0.0  ;;  %v1705_v51 = vmul.f32 %v2569_v39, %v1577_v47 }
 0x1db   : > { %v1954_v48 = vadd.f32 %v1953_v46, %v1952_v43  ;;  %v1955_v50 = vsel %vm167_vm0, %v1704_v44, 0.0 }
 0x1dc   : > { %v1957_v55 = vsel %vm167_vm0, %v1705_v51, 0.0 }
 0x1dd   : > { %v1956_v53 = vadd.f32 %v1955_v50, %v1954_v48 }
 0x1df   : > { %v1578_v56 = vld [vmem:[#allocation2 + $0x3f0] sm:$0xff]  ;;  %v1958_v58 = vadd.f32 %v1957_v55, %v1956_v53 }
 0x1e0   : > { %v1706_v57 = vmul.f32 %v2572_v52, %v1578_v56  ;;  %v1579_v49 = vld [vmem:[#allocation2 + $0x3f8] sm:$0xff] }
 0x1e1   : > { %v1707_v59 = vmul.f32 %v2573_v54, %v1579_v49 }
 0x1e2   : > { %v1959_v60 = vsel %vm167_vm0, %v1706_v57, 0.0 }
 0x1e3   : > { %v1960_v61 = vadd.f32 %v1959_v60, %v1958_v58  ;;  %v1961_v62 = vsel %vm167_vm0, %v1707_v59, 0.0 }
 0x1e5   : > { %v1962_v63 = vadd.f32 %v1961_v62, %v1960_v61 }
 0x1e7   : > { %v1963_v0 = vrot.slane %v1962_v63, 4 }
 0x1e9   : > { %v1964_v1 = vadd.f32 %v1963_v0, %v1962_v63 }
 0x1eb   : > { %v1965_v2 = vrot.slane %v1964_v1, 2 }
 0x1ed   : > { %v1966_v3 = vadd.f32 %v1965_v2, %v1964_v1 }
 0x1ef   : > { %v1967_v4 = vrot.slane %v1966_v3, 1 }
 0x1f1   : > { %v1968_v5 = vadd.f32 %v1967_v4, %v1966_v3 }
 0x1f3   : > { %v1969_v6 = vmul.f32 0.25, %v1968_v5 }
 0x1f5   : > { %v1970_v7 = vsub.f32 0.0, %v1969_v6 }
 0x1f7   : > { %v1971_v8 = vmul.f32 1.442695, %v1970_v7 }
 0x1f9   : > { %2725 = vpow2.f32 %v1971_v8 }
 0x1ff   : > { %v2726_v9 = vpop.eup %2725 }
 0x200   : > { %v1973_v10 = vadd.f32 1.0, %v2726_v9 }
 0x202   : > { %2727 = vrcp.f32 %v1973_v10  ;;  %v1985_v14 = vand.u32 2147483648, %v1973_v10  ;;  %v1983_v16 = vand.u32 2147483647, %v1973_v10  ;;  %vm1979_vm2 = vweird.f32 %v1973_v10 }
 0x204   : > { %v1986_v18 = vor.u32 1.1754944e-38, %v1985_v14  ;;  %vm1984_vm5 = vcmp.eq.f32.partialorder %v1983_v16, 8.507059e+37 }
 0x208   : > { %v2728_v11 = vpop.eup %2727 }
 0x209   : > { %v1975_v12 = vmul.f32 %v2728_v11, %v1973_v10  ;;  %vm1980_vm1 = vweird.f32 %v2728_v11 }
 0x20a   : > { %vm1981_vm4 = vmor %vm1979_vm2, %vm1980_vm1 }
 0x20b   : > { %v1976_v13 = vsub.f32 1.0, %v1975_v12 }
 0x20d   : > { %v1977_v15 = vmul.f32 %v2728_v11, %v1976_v13 }
 0x20f   : > { %v1978_v17 = vadd.f32 %v2728_v11, %v1977_v15 }
 0x211   : > { %v1982_v19 = vsel %vm1981_vm4, %v2728_v11, %v1978_v17 }
 0x212   : > { %v1987_v20 = vsel %vm1984_vm5, %v1986_v18, %v1982_v19 }
 0x213   : > { %1990 = vst.msk [vmem:[%s162_s16] sm:$0x1] %vm1989_vm3, %v1987_v20 }
 0x214 PF: > { %s12_s11 = sadd.s32 1, %s2751_s11   ;;  %s3614_s9 = smov %s2747_s10 }
 0x215   : > { %p9_p5 = scmp.ge.s32.totalorder %s12_s11, 4   ;;  %s3615_s10 = smov %s3617_s12 }
 0x217   :  { %11 = sbr.rel (!%p9_p5) target bundleno = 2 (0x2), region = 66 }

</bundles_post_ra>
